<compile_context>
chip_gen: v6e
topology: v6e:2x2x1
jax: 0.10.0
libtpu: 0.0.40
codegen_flags: <defaults>
</compile_context>

<pallas_src>
import jax
import jax.numpy as jnp
from jax.experimental import pallas as pl
from jax.experimental.pallas import tpu as pltpu

NUM_CLASSES = 46
FEAT_CHANNELS = 1920   # densenet201 final feature channels
NPAD = 128             # classes padded to one full lane-width


def _head_kernel(f_ref, w_ref, b_ref, o_ref):
    """Fused ReLU + global average pool + linear classifier.

    f_ref: (TB, C, S)   feature tile, channels on sublanes, spatial on lanes
    w_ref: (C, NPAD)    bf16, already transposed, pre-scaled by 1/S, zero-padded
    b_ref: (1, NPAD)    f32, zero-padded
    o_ref: (TB, NPAD)   f32 logits (padded classes)
    """
    f = jnp.maximum(f_ref[...], 0.0)                   # ReLU (VPU)
    pooled = jnp.sum(f, axis=-1)                       # (TB, C); 1/S folded into weight
    w = w_ref[...].astype(jnp.float32)                 # bf16 -> f32 upcast (VPU)
    logits = jnp.dot(pooled, w,
                     preferred_element_type=jnp.float32)   # (TB, NPAD) on MXU
    o_ref[...] = (logits + b_ref[...]).astype(o_ref.dtype)


def modified_densenet201_head(features_nchw, weight, bias, *, batch_tile=8):
    """ReLU -> avg_pool2d(k=H) -> view(B,-1) -> Linear(1920, 46).

    features_nchw: (B, 1920, H, H) float32 NCHW (as produced by the torch backbone)
    weight:        (46, 1920) torch nn.Linear convention
    bias:          (46,)
    """
    B, C, H, W = features_nchw.shape
    assert C == FEAT_CHANNELS and H == W
    S = H * W

    # Free reshape of the contiguous NCHW tensor: no materialized transpose.
    f = features_nchw.reshape(B, C, S)

    # Classifier params: transpose to (C, N), fold the 1/S pooling divide into
    # the weight, pad classes 46 -> 128, cast weight to bf16.
    pad = NPAD - NUM_CLASSES
    w = jnp.pad(weight.T * (1.0 / S), ((0, 0), (0, pad))).astype(jnp.bfloat16)
    b = jnp.pad(bias.astype(jnp.float32).reshape(1, -1), ((0, 0), (0, pad)))

    tb = min(batch_tile, B)
    grid = (pl.cdiv(B, tb),)

    out = pl.pallas_call(
        _head_kernel,
        out_shape=jax.ShapeDtypeStruct((B, NPAD), jnp.float32),
        grid=grid,
        in_specs=[
            pl.BlockSpec((tb, C, S), lambda i: (i, 0, 0)),
            # Constant block index => stays VMEM-resident, no re-DMA per tile.
            pl.BlockSpec((C, NPAD), lambda i: (0, 0)),
            pl.BlockSpec((1, NPAD), lambda i: (0, 0)),
        ],
        out_specs=pl.BlockSpec((tb, NPAD), lambda i: (i, 0)),
        compiler_params=pltpu.CompilerParams(
            dimension_semantics=("parallel",),   # batch tiles shard across TCs (v7x)
            vmem_limit_bytes=32 << 20,           # safe on v5e/v6e/v7x
        ),
    )(f, w, b)

    return out[:, :NUM_CLASSES]


if __name__ == "__main__":
    key = jax.random.PRNGKey(0)
    kf, kw, kb = jax.random.split(key, 3)

    B = 2
    H = 7  # input_size == 224 -> 7x7 feature map
    # Stand-in for densenet201.features(x) output on a 224x224 image.
    features = jax.random.normal(
        kf, (B, FEAT_CHANNELS, H, H), dtype=jnp.float32)

    # Deterministic nn.Linear(1920, 46) init (uniform(-1/sqrt(fan_in), 1/sqrt(fan_in))).
    bound = 1.0 / (FEAT_CHANNELS ** 0.5)
    weight = jax.random.uniform(
        kw, (NUM_CLASSES, FEAT_CHANNELS), jnp.float32, -bound, bound)
    bias = jax.random.uniform(kb, (NUM_CLASSES,), jnp.float32, -bound, bound)

    out = jax.block_until_ready(modified_densenet201_head(features, weight, bias))
    assert out.shape == (B, NUM_CLASSES), out.shape

    S = H * H
    relu_f = jnp.maximum(features, 0.0)

    # Reference using the kernel's declared weight precision (1/S folded, bf16):
    # validates the kernel's arithmetic tightly.
    w_eff = (weight.T * (1.0 / S)).astype(jnp.bfloat16).astype(jnp.float32)
    ref_quant = relu_f.sum(axis=(2, 3)) @ w_eff + bias
    assert jnp.allclose(out, ref_quant, atol=1e-4, rtol=1e-4), "mismatch vs quantized-weight reference"

    # Pure-f32 PyTorch-semantics reference: validates that the bf16 weight cast
    # is a negligible precision change for the module's forward.
    ref_f32 = relu_f.mean(axis=(2, 3)) @ weight.T + bias
    assert jnp.allclose(out, ref_f32, atol=5e-3, rtol=5e-3), "mismatch vs f32 reference"

    print("KERNEL_OK")
</pallas_src>

<mosaic_0001>
module attributes {stable_mosaic.version = 11 : i64} {
  func.func @_head_kernel(%arg0: i32, %arg1: memref<2x1920x49xf32, #tpu.memory_space<vmem>>, %arg2: memref<1920x128xbf16, #tpu.memory_space<vmem>>, %arg3: memref<1x128xf32, #tpu.memory_space<vmem>>, %arg4: memref<2x128xf32, #tpu.memory_space<vmem>>) attributes {dimension_semantics = [#tpu.dimension_semantics<parallel>], iteration_bounds = array<i64: 1>, scalar_prefetch = 0 : i64, scratch_operands = 0 : i64, tpu.core_type = #tpu.core_type<tc>, window_params = [{transform_indices = @transform_0, window_bounds = array<i64: 2, 1920, 49>}, {pipeline_mode = #tpu.pipeline_mode<synchronous>, transform_indices = @transform_1, window_bounds = array<i64: 1920, 128>}, {pipeline_mode = #tpu.pipeline_mode<synchronous>, transform_indices = @transform_2, window_bounds = array<i64: 1, 128>}, {transform_indices = @transform_3, window_bounds = array<i64: 2, 128>}]} {
    %c0 = arith.constant 0 : index
    %c0_0 = arith.constant 0 : index
    %c0_1 = arith.constant 0 : index
    %0 = vector.load %arg1[%c0, %c0_0, %c0_1] : memref<2x1920x49xf32, #tpu.memory_space<vmem>>, vector<2x1920x49xf32>
    %cst = arith.constant 0.000000e+00 : f32
    %1 = vector.broadcast %cst : f32 to vector<2x1920x49xf32>
    %2 = arith.maximumf %0, %1 : vector<2x1920x49xf32>
    %cst_2 = arith.constant dense<0.000000e+00> : vector<2x1920xf32>
    %3 = vector.multi_reduction <add>, %2, %cst_2 [2] : vector<2x1920x49xf32> to vector<2x1920xf32>
    %c0_3 = arith.constant 0 : index
    %c0_4 = arith.constant 0 : index
    %4 = vector.load %arg2[%c0_3, %c0_4] : memref<1920x128xbf16, #tpu.memory_space<vmem>>, vector<1920x128xbf16>
    %5 = arith.extf %4 : vector<1920x128xbf16> to vector<1920x128xf32>
    %cst_5 = arith.constant dense<0.000000e+00> : vector<2x128xf32>
    %6 = tpu.matmul %3, %5, %cst_5 {dimension_numbers = #tpu.dot_dimension_numbers<[1], [0], [0], [1], [0, 0, 1, 1], [], []>} : vector<2x1920xf32>, vector<1920x128xf32>, vector<2x128xf32> -> vector<2x128xf32>
    %c0_6 = arith.constant 0 : index
    %c0_7 = arith.constant 0 : index
    %7 = vector.load %arg3[%c0_6, %c0_7] : memref<1x128xf32, #tpu.memory_space<vmem>>, vector<1x128xf32>
    %8 = vector.broadcast %7 : vector<1x128xf32> to vector<2x128xf32>
    %9 = arith.addf %6, %8 : vector<2x128xf32>
    %c0_8 = arith.constant 0 : index
    %c0_9 = arith.constant 0 : index
    %10 = vector.load %arg4[%c0_8, %c0_9] : memref<2x128xf32, #tpu.memory_space<vmem>>, vector<2x128xf32>
    tpu.vector_store %arg4[%c0_8, %c0_9], %9 {strides = array<i32>} : memref<2x128xf32, #tpu.memory_space<vmem>>, vector<2x128xf32>,
    return
  }
  func.func @transform_0(%arg0: i32) -> (i32, i32, i32) {
    %c0_i32 = arith.constant 0 : i32
    %c0_i32_0 = arith.constant 0 : i32
    %c0_i32_1 = arith.constant 0 : i32
    return %arg0, %c0_i32, %c0_i32_0 : i32, i32, i32
  }
  func.func @transform_1(%arg0: i32) -> (i32, i32) {
    %c0_i32 = arith.constant 0 : i32
    %c0_i32_0 = arith.constant 0 : i32
    %c0_i32_1 = arith.constant 0 : i32
    return %c0_i32, %c0_i32_0 : i32, i32
  }
  func.func @transform_2(%arg0: i32) -> (i32, i32) {
    %c0_i32 = arith.constant 0 : i32
    %c0_i32_0 = arith.constant 0 : i32
    %c0_i32_1 = arith.constant 0 : i32
    return %c0_i32, %c0_i32_0 : i32, i32
  }
  func.func @transform_3(%arg0: i32) -> (i32, i32) {
    %c0_i32 = arith.constant 0 : i32
    %c0_i32_0 = arith.constant 0 : i32
    return %arg0, %c0_i32 : i32, i32
  }
}

</mosaic_0001>

<bundles_post_ra>
// kernel: tpu_custom_call.1
= control target key start
LH: loop header
LB: loop body
LE: loop exit
PB: predicated region body
PF: predicated region fallthrough
CT: control target
= control target key end

     0   :  { %vm975_vm0 = vcmask 400384   ;;  %s11207_s0 = inlined_call_operand.vmem [shape: f32[2,1920,49], index: 0, kind: input, shape index: {}]   ;;  %s11208_s1 = inlined_call_operand.vmem [shape: bf16[1920,128], index: 1, kind: input, shape index: {}]   ;;  %s11209_s2 = inlined_call_operand.vmem [shape: f32[1,128], index: 2, kind: input, shape index: {}]   ;;  %s11210_s3 = inlined_call_operand.hbm [shape: f32[2,128], index: 3, kind: output, shape index: {}]  }
   0x1   :  { %v17_v0 = vld [vmem:[%s11207_s0 + $0x10] sm:$0xff]  ;;  %v15_v1 = vld [vmem:[%s11207_s0] sm:$0xff]  ;;  %v18_v2 = vld [vmem:[%s11207_s0 + $0x18] sm:$0xff] }
   0x2   :  { %v497_v3 = vmax.f32 %v17_v0, 0.0  ;;  %v495_v4 = vmax.f32 %v15_v1, 0.0  ;;  %v498_v5 = vmax.f32 %v18_v2, 0.0  ;;  %v16_v6 = vld [vmem:[%s11207_s0 + $0x8] sm:$0xff]  ;;  %v19_v9 = vld [vmem:[%s11207_s0 + $0x20] sm:$0xff]  ;;  %v22_v16 = vld [vmem:[%s11207_s0 + $0x38] sm:$0xff] }
   0x3   :  { %v496_v7 = vmax.f32 %v16_v6, 0.0  ;;  %v20_v8 = vld [vmem:[%s11207_s0 + $0x28] sm:$0xff]  ;;  %v499_v15 = vmax.f32 %v19_v9, 0.0  ;;  %v21_v17 = vld [vmem:[%s11207_s0 + $0x30] sm:$0xff]  ;;  %v502_v20 = vmax.f32 %v22_v16, 0.0  ;;  %v23_v23 = vld [vmem:[%s11207_s0 + $0x40] sm:$0xff] }
   0x4   :  { %v982_v10 = vsel %vm975_vm0, %v497_v3, 0.0  ;;  %v976_v11 = vsel %vm975_vm0, %v495_v4, 0.0  ;;  %v985_v12 = vsel %vm975_vm0, %v498_v5, 0.0  ;;  %v500_v14 = vmax.f32 %v20_v8, 0.0  ;;  %v24_v22 = vld [vmem:[%s11207_s0 + $0x48] sm:$0xff]  ;;  %v26_v28 = vld [vmem:[%s11207_s0 + $0x58] sm:$0xff] }
   0x5   :  { %983 = vadd.xlane.f32.xlu1 %v982_v10  ;;  %977 = vadd.xlane.f32.xlu0 %v976_v11  ;;  %v979_v13 = vsel %vm975_vm0, %v496_v7, 0.0  ;;  %v988_v19 = vsel %vm975_vm0, %v499_v15, 0.0  ;;  %v501_v21 = vmax.f32 %v21_v17, 0.0  ;;  %v997_v24 = vsel %vm975_vm0, %v502_v20, 0.0  ;;  %v25_v29 = vld [vmem:[%s11207_s0 + $0x50] sm:$0xff]  ;;  %v28_v34 = vld [vmem:[%s11207_s0 + $0x68] sm:$0xff] }
   0x6   :  { %v991_v18 = vsel %vm975_vm0, %v500_v14, 0.0  ;;  %v504_v26 = vmax.f32 %v24_v22, 0.0  ;;  %v503_v27 = vmax.f32 %v23_v23, 0.0  ;;  %v506_v32 = vmax.f32 %v26_v28, 0.0  ;;  %v27_v35 = vld [vmem:[%s11207_s0 + $0x60] sm:$0xff]  ;;  %v30_v40 = vld [vmem:[%s11207_s0 + $0x78] sm:$0xff] }
   0x7   :  { %v994_v25 = vsel %vm975_vm0, %v501_v21, 0.0  ;;  %v505_v33 = vmax.f32 %v25_v29, 0.0  ;;  %v508_v38 = vmax.f32 %v28_v34, 0.0  ;;  %v507_v39 = vmax.f32 %v27_v35, 0.0  ;;  %v29_v41 = vld [vmem:[%s11207_s0 + $0x70] sm:$0xff]  ;;  %v32_v46 = vld [vmem:[%s11207_s0 + $0x88] sm:$0xff] }
   0x8   :  { %v1003_v30 = vsel %vm975_vm0, %v504_v26, 0.0  ;;  %v1000_v31 = vsel %vm975_vm0, %v503_v27, 0.0  ;;  %v1009_v36 = vsel %vm975_vm0, %v506_v32, 0.0  ;;  %v510_v44 = vmax.f32 %v30_v40, 0.0  ;;  %v31_v47 = vld [vmem:[%s11207_s0 + $0x80] sm:$0xff]  ;;  %v34_v52 = vld [vmem:[%s11207_s0 + $0x98] sm:$0xff] }
   0x9   :  { %986 = vadd.xlane.f32.xlu1 %v985_v12  ;;  %980 = vadd.xlane.f32.xlu0 %v979_v13  ;;  %v1006_v37 = vsel %vm975_vm0, %v505_v33, 0.0  ;;  %v1015_v42 = vsel %vm975_vm0, %v508_v38, 0.0  ;;  %v1012_v43 = vsel %vm975_vm0, %v507_v39, 0.0  ;;  %v509_v45 = vmax.f32 %v29_v41, 0.0  ;;  %v33_v53 = vld [vmem:[%s11207_s0 + $0x90] sm:$0xff]  ;;  %v36_v58 = vld [vmem:[%s11207_s0 + $0xa8] sm:$0xff] }
   0xa   :  { %v1021_v48 = vsel %vm975_vm0, %v510_v44, 0.0  ;;  %v512_v50 = vmax.f32 %v32_v46, 0.0  ;;  %v511_v51 = vmax.f32 %v31_v47, 0.0  ;;  %v514_v56 = vmax.f32 %v34_v52, 0.0  ;;  %v35_v59 = vld [vmem:[%s11207_s0 + $0xa0] sm:$0xff]  ;;  %v38_v0 = vld [vmem:[%s11207_s0 + $0xb8] sm:$0xff] }
   0xb   :  { %v1018_v49 = vsel %vm975_vm0, %v509_v45, 0.0  ;;  %v513_v57 = vmax.f32 %v33_v53, 0.0  ;;  %v516_v62 = vmax.f32 %v36_v58, 0.0  ;;  %v515_v63 = vmax.f32 %v35_v59, 0.0  ;;  %v37_v1 = vld [vmem:[%s11207_s0 + $0xb0] sm:$0xff] }
   0xc   :  { %v1027_v54 = vsel %vm975_vm0, %v512_v50, 0.0  ;;  %v1024_v55 = vsel %vm975_vm0, %v511_v51, 0.0  ;;  %v1033_v60 = vsel %vm975_vm0, %v514_v56, 0.0  ;;  %v518_v4 = vmax.f32 %v38_v0, 0.0 }
   0xd   :  { %992 = vadd.xlane.f32.xlu1 %v991_v18  ;;  %989 = vadd.xlane.f32.xlu0 %v988_v19  ;;  %v1030_v61 = vsel %vm975_vm0, %v513_v57, 0.0  ;;  %v1039_v2 = vsel %vm975_vm0, %v516_v62, 0.0  ;;  %v1036_v3 = vsel %vm975_vm0, %v515_v63, 0.0  ;;  %v517_v5 = vmax.f32 %v37_v1, 0.0 }
  0x11   :  { %998 = vadd.xlane.f32.xlu1 %v997_v24  ;;  %995 = vadd.xlane.f32.xlu0 %v994_v25 }
  0x15   :  { %1004 = vadd.xlane.f32.xlu1 %v1003_v30  ;;  %1001 = vadd.xlane.f32.xlu0 %v1000_v31 }
  0x19   :  { %1010 = vadd.xlane.f32.xlu1 %v1009_v36  ;;  %1007 = vadd.xlane.f32.xlu0 %v1006_v37 }
  0x1d   :  { %1016 = vadd.xlane.f32.xlu1 %v1015_v42  ;;  %1013 = vadd.xlane.f32.xlu0 %v1012_v43 }
  0x21   :  { %1022 = vadd.xlane.f32.xlu1 %v1021_v48  ;;  %1019 = vadd.xlane.f32.xlu0 %v1018_v49 }
  0x25   :  { %1028 = vadd.xlane.f32.xlu1 %v1027_v54  ;;  %1025 = vadd.xlane.f32.xlu0 %v1024_v55 }
  0x29   :  { %1034 = vadd.xlane.f32.xlu1 %v1033_v60  ;;  %1031 = vadd.xlane.f32.xlu0 %v1030_v61 }
  0x2a   :  { %8 = vsyncpa [#allocation3], 0  ;;  %v40_v6 = vld [vmem:[%s11207_s0 + $0xc8] sm:$0xff]  ;;  %v39_v7 = vld [vmem:[%s11207_s0 + $0xc0] sm:$0xff]  ;;  %v1045_v8 = vsel %vm975_vm0, %v518_v4, 0.0  ;;  %v1042_v9 = vsel %vm975_vm0, %v517_v5, 0.0 }
  0x2b   :  { %v520_v10 = vmax.f32 %v40_v6, 0.0  ;;  %v519_v11 = vmax.f32 %v39_v7, 0.0  ;;  %v42_v12 = vld [vmem:[%s11207_s0 + $0xd8] sm:$0xff]  ;;  %v41_v13 = vld [vmem:[%s11207_s0 + $0xd0] sm:$0xff]  ;;  %v44_v18 = vld [vmem:[%s11207_s0 + $0xe8] sm:$0xff]  ;;  %vm3394_vm1 = vcmask 130112  }
  0x2c   :  { %v522_v16 = vmax.f32 %v42_v12, 0.0  ;;  %v521_v17 = vmax.f32 %v41_v13, 0.0  ;;  %v43_v19 = vld [vmem:[%s11207_s0 + $0xe0] sm:$0xff]  ;;  %v524_v22 = vmax.f32 %v44_v18, 0.0  ;;  %v46_v24 = vld [vmem:[%s11207_s0 + $0xf8] sm:$0xff]  ;;  %v45_v25 = vld [vmem:[%s11207_s0 + $0xf0] sm:$0xff] }
  0x2d   :  { %1040 = vadd.xlane.f32.xlu1 %v1039_v2  ;;  %1037 = vadd.xlane.f32.xlu0 %v1036_v3  ;;  %v1051_v14 = vsel %vm975_vm0, %v520_v10, 0.0  ;;  %v1048_v15 = vsel %vm975_vm0, %v519_v11, 0.0  ;;  %v523_v23 = vmax.f32 %v43_v19, 0.0  ;;  %v526_v28 = vmax.f32 %v46_v24, 0.0  ;;  %v48_v30 = vld [vmem:[%s11207_s0 + $0x108] sm:$0xff]  ;;  %v47_v31 = vld [vmem:[%s11207_s0 + $0x100] sm:$0xff] }
  0x2e   :  { %v1057_v20 = vsel %vm975_vm0, %v522_v16, 0.0  ;;  %v1054_v21 = vsel %vm975_vm0, %v521_v17, 0.0  ;;  %v1063_v26 = vsel %vm975_vm0, %v524_v22, 0.0  ;;  %v525_v29 = vmax.f32 %v45_v25, 0.0  ;;  %v50_v36 = vld [vmem:[%s11207_s0 + $0x118] sm:$0xff]  ;;  %v49_v37 = vld [vmem:[%s11207_s0 + $0x110] sm:$0xff] }
  0x2f   :  { %v1060_v27 = vsel %vm975_vm0, %v523_v23, 0.0  ;;  %v1069_v32 = vsel %vm975_vm0, %v526_v28, 0.0  ;;  %v528_v34 = vmax.f32 %v48_v30, 0.0  ;;  %v527_v35 = vmax.f32 %v47_v31, 0.0  ;;  %v52_v42 = vld [vmem:[%s11207_s0 + $0x128] sm:$0xff]  ;;  %v51_v43 = vld [vmem:[%s11207_s0 + $0x120] sm:$0xff] }
  0x30   :  { %v1066_v33 = vsel %vm975_vm0, %v525_v29, 0.0  ;;  %v530_v40 = vmax.f32 %v50_v36, 0.0  ;;  %v529_v41 = vmax.f32 %v49_v37, 0.0  ;;  %v532_v46 = vmax.f32 %v52_v42, 0.0  ;;  %v54_v48 = vld [vmem:[%s11207_s0 + $0x138] sm:$0xff]  ;;  %v53_v49 = vld [vmem:[%s11207_s0 + $0x130] sm:$0xff] }
  0x31   :  { %1046 = vadd.xlane.f32.xlu1 %v1045_v8  ;;  %1043 = vadd.xlane.f32.xlu0 %v1042_v9  ;;  %v1075_v38 = vsel %vm975_vm0, %v528_v34, 0.0  ;;  %v1072_v39 = vsel %vm975_vm0, %v527_v35, 0.0  ;;  %v531_v47 = vmax.f32 %v51_v43, 0.0  ;;  %v534_v52 = vmax.f32 %v54_v48, 0.0  ;;  %v56_v54 = vld [vmem:[%s11207_s0 + $0x148] sm:$0xff]  ;;  %v55_v55 = vld [vmem:[%s11207_s0 + $0x140] sm:$0xff] }
  0x32   :  { %v1081_v44 = vsel %vm975_vm0, %v530_v40, 0.0  ;;  %v1078_v45 = vsel %vm975_vm0, %v529_v41, 0.0  ;;  %v1087_v50 = vsel %vm975_vm0, %v532_v46, 0.0  ;;  %v533_v53 = vmax.f32 %v53_v49, 0.0  ;;  %v58_v60 = vld [vmem:[%s11207_s0 + $0x158] sm:$0xff]  ;;  %v57_v61 = vld [vmem:[%s11207_s0 + $0x150] sm:$0xff] }
  0x33   :  { %v1084_v51 = vsel %vm975_vm0, %v531_v47, 0.0  ;;  %v1093_v56 = vsel %vm975_vm0, %v534_v52, 0.0  ;;  %v536_v58 = vmax.f32 %v56_v54, 0.0  ;;  %v535_v59 = vmax.f32 %v55_v55, 0.0  ;;  %v60_v2 = vld [vmem:[%s11207_s0 + $0x168] sm:$0xff]  ;;  %v59_v3 = vld [vmem:[%s11207_s0 + $0x160] sm:$0xff] }
  0x34   :  { %v1090_v57 = vsel %vm975_vm0, %v533_v53, 0.0  ;;  %v538_v0 = vmax.f32 %v58_v60, 0.0  ;;  %v537_v1 = vmax.f32 %v57_v61, 0.0  ;;  %v540_v6 = vmax.f32 %v60_v2, 0.0  ;;  %v62_v8 = vld [vmem:[%s11207_s0 + $0x178] sm:$0xff]  ;;  %v61_v9 = vld [vmem:[%s11207_s0 + $0x170] sm:$0xff] }
  0x35   :  { %1052 = vadd.xlane.f32.xlu1 %v1051_v14  ;;  %1049 = vadd.xlane.f32.xlu0 %v1048_v15  ;;  %v1099_v62 = vsel %vm975_vm0, %v536_v58, 0.0  ;;  %v1096_v63 = vsel %vm975_vm0, %v535_v59, 0.0  ;;  %v539_v7 = vmax.f32 %v59_v3, 0.0  ;;  %v542_v12 = vmax.f32 %v62_v8, 0.0  ;;  %v64_v14 = vld [vmem:[%s11207_s0 + $0x188] sm:$0xff]  ;;  %v63_v15 = vld [vmem:[%s11207_s0 + $0x180] sm:$0xff] }
  0x36   :  { %v1105_v4 = vsel %vm975_vm0, %v538_v0, 0.0  ;;  %v1102_v5 = vsel %vm975_vm0, %v537_v1, 0.0  ;;  %v1111_v10 = vsel %vm975_vm0, %v540_v6, 0.0  ;;  %v541_v13 = vmax.f32 %v61_v9, 0.0  ;;  %s7315_s23 = smov [#allocation2]  }
  0x37   :  { %v1108_v11 = vsel %vm975_vm0, %v539_v7, 0.0  ;;  %v1117_v16 = vsel %vm975_vm0, %v542_v12, 0.0  ;;  %v544_v18 = vmax.f32 %v64_v14, 0.0  ;;  %v543_v19 = vmax.f32 %v63_v15, 0.0 }
  0x38   :  { %v1114_v17 = vsel %vm975_vm0, %v541_v13, 0.0  ;;  %v3383_v12 = vlaneseq  ;;  %vm3401_vm2 = vcmask 195712   ;;  %vm3408_vm3 = vcmask 261312  }
  0x39   :  { %1058 = vadd.xlane.f32.xlu1 %v1057_v20  ;;  %1055 = vadd.xlane.f32.xlu0 %v1054_v21  ;;  %v66_v20 = vld [vmem:[%s11207_s0 + $0x198] sm:$0xff]  ;;  %v65_v21 = vld [vmem:[%s11207_s0 + $0x190] sm:$0xff]  ;;  %v1123_v22 = vsel %vm975_vm0, %v544_v18, 0.0  ;;  %v1120_v23 = vsel %vm975_vm0, %v543_v19, 0.0  ;;  %vm3415_vm4 = vcmask 326912   ;;  %vm3422_vm5 = vcmask 392512  }
  0x3a   :  { %v546_v24 = vmax.f32 %v66_v20, 0.0  ;;  %v545_v25 = vmax.f32 %v65_v21, 0.0  ;;  %v85_v18 = vld [vmem:[%s11207_s0 + $0x230] sm:$0xff]  ;;  %v7620_v19 = vand.u32 127, %v3383_v12  ;;  %vm3429_vm6 = vcmask 458112  }
  0x3b   :  { %vm11215_vm7 = vcmask 523712   ;;  %vm11214_vm8 = vcmask 589312   ;;  %vm11213_vm9 = vcmask 654912   ;;  %vm11212_vm10 = vcmask 720512  }
  0x3c   :  { %v1129_v28 = vsel %vm975_vm0, %v546_v24, 0.0  ;;  %v1126_v29 = vsel %vm975_vm0, %v545_v25, 0.0  ;;  %v88_v24 = vld [vmem:[%s11207_s0 + $0x248] sm:$0xff]  ;;  %v87_v25 = vld [vmem:[%s11207_s0 + $0x240] sm:$0xff]  ;;  %vm3464_vm11 = vcmask 786112   ;;  %vm11211_vm12 = vcmask 851712  }
  0x3d   :  { %1064 = vadd.xlane.f32.xlu1 %v1063_v26  ;;  %1061 = vadd.xlane.f32.xlu0 %v1060_v27  ;;  %v68_v26 = vld [vmem:[%s11207_s0 + $0x1a8] sm:$0xff]  ;;  %v67_v27 = vld [vmem:[%s11207_s0 + $0x1a0] sm:$0xff]  ;;  %vm3478_vm13 = vcmask 917312   ;;  %vm3485_vm14 = vcmask 982912   ;;  %vm3492_vm15 = vcmask 1048512  }
  0x3e   :  { %v548_v30 = vmax.f32 %v68_v26, 0.0  ;;  %v547_v31 = vmax.f32 %v67_v27, 0.0  ;;  %v7630_v26 = vshrl.u32 %v3383_v12, 7  ;;  %v3403_v27 = vadd.s32 4294967272, %v7620_v19  ;;  %v93_v12 = vld [vmem:[%s11207_s0 + $0x270] sm:$0xff] }
  0x40   :  { %v1135_v34 = vsel %vm975_vm0, %v548_v30, 0.0  ;;  %v1132_v35 = vsel %vm975_vm0, %v547_v31, 0.0  ;;  %v568_v30 = vmax.f32 %v88_v24, 0.0  ;;  %v567_v31 = vmax.f32 %v87_v25, 0.0  ;;  %v95_v25 = vld [vmem:[%s11207_s0 + $0x280] sm:$0xff] }
  0x41   :  { %1070 = vadd.xlane.f32.xlu1 %v1069_v32  ;;  %1067 = vadd.xlane.f32.xlu0 %v1066_v33  ;;  %v70_v32 = vld [vmem:[%s11207_s0 + $0x1b8] sm:$0xff]  ;;  %v69_v33 = vld [vmem:[%s11207_s0 + $0x1b0] sm:$0xff]  ;;  %v3459_v24 = vadd.s32 4294967208, %v7620_v19 }
  0x42   :  { %v550_v36 = vmax.f32 %v70_v32, 0.0  ;;  %v549_v37 = vmax.f32 %v69_v33, 0.0 }
  0x44   :  { %v1141_v40 = vsel %vm975_vm0, %v550_v36, 0.0  ;;  %v1138_v41 = vsel %vm975_vm0, %v549_v37, 0.0  ;;  %v3417_v36 = vadd.s32 4294967256, %v7620_v19  ;;  %v90_v37 = vld [vmem:[%s11207_s0 + $0x258] sm:$0xff] }
  0x45   :  { %1076 = vadd.xlane.f32.xlu1 %v1075_v38  ;;  %1073 = vadd.xlane.f32.xlu0 %v1072_v39  ;;  %v72_v38 = vld [vmem:[%s11207_s0 + $0x1c8] sm:$0xff]  ;;  %v71_v39 = vld [vmem:[%s11207_s0 + $0x1c0] sm:$0xff] }
  0x46   :  { %v552_v42 = vmax.f32 %v72_v38, 0.0  ;;  %v551_v43 = vmax.f32 %v71_v39, 0.0  ;;  %v89_v38 = vld [vmem:[%s11207_s0 + $0x250] sm:$0xff]  ;;  %v7646_v39 = vsub.s32 %v7620_v19, %v7630_v26 }
  0x48   :  { %v1147_v46 = vsel %vm975_vm0, %v552_v42, 0.0  ;;  %v1144_v47 = vsel %vm975_vm0, %v551_v43, 0.0  ;;  %v3410_v42 = vadd.s32 4294967264, %v7620_v19 }
  0x49   :  { %1082 = vadd.xlane.f32.xlu1 %v1081_v44  ;;  %1079 = vadd.xlane.f32.xlu0 %v1078_v45  ;;  %v74_v44 = vld [vmem:[%s11207_s0 + $0x1d8] sm:$0xff]  ;;  %v73_v45 = vld [vmem:[%s11207_s0 + $0x1d0] sm:$0xff] }
  0x4a   :  { %v554_v48 = vmax.f32 %v74_v44, 0.0  ;;  %v553_v49 = vmax.f32 %v73_v45, 0.0  ;;  %v1195_v44 = vsel %vm975_vm0, %v568_v30, 0.0  ;;  %v1192_v45 = vsel %vm975_vm0, %v567_v31, 0.0 }
  0x4b   :  { %v3452_v30 = vadd.s32 4294967216, %v7620_v19 }
  0x4c   :  { %v1153_v52 = vsel %vm975_vm0, %v554_v48, 0.0  ;;  %v1150_v53 = vsel %vm975_vm0, %v553_v49, 0.0  ;;  %v92_v48 = vld [vmem:[%s11207_s0 + $0x268] sm:$0xff] }
  0x4d   :  { %1088 = vadd.xlane.f32.xlu1 %v1087_v50  ;;  %1085 = vadd.xlane.f32.xlu0 %v1084_v51  ;;  %v76_v50 = vld [vmem:[%s11207_s0 + $0x1e8] sm:$0xff]  ;;  %v75_v51 = vld [vmem:[%s11207_s0 + $0x1e0] sm:$0xff] }
  0x4e   :  { %v556_v54 = vmax.f32 %v76_v50, 0.0  ;;  %v555_v55 = vmax.f32 %v75_v51, 0.0  ;;  %v7664_v51 = vsub.s32 %v3417_v36, %v7630_v26 }
  0x50   :  { %v1159_v58 = vsel %vm975_vm0, %v556_v54, 0.0  ;;  %v1156_v59 = vsel %vm975_vm0, %v555_v55, 0.0  ;;  %v91_v54 = vld [vmem:[%s11207_s0 + $0x260] sm:$0xff] }
  0x51   :  { %1094 = vadd.xlane.f32.xlu1 %v1093_v56  ;;  %1091 = vadd.xlane.f32.xlu0 %v1090_v57  ;;  %v78_v56 = vld [vmem:[%s11207_s0 + $0x1f8] sm:$0xff]  ;;  %v77_v57 = vld [vmem:[%s11207_s0 + $0x1f0] sm:$0xff] }
  0x52   :  { %v558_v60 = vmax.f32 %v78_v56, 0.0  ;;  %v557_v61 = vmax.f32 %v77_v57, 0.0 }
  0x54   :  { %v1165_v0 = vsel %vm975_vm0, %v558_v60, 0.0  ;;  %v1162_v1 = vsel %vm975_vm0, %v557_v61, 0.0  ;;  %v572_v60 = vmax.f32 %v92_v48, 0.0  ;;  %v7733_v48 = vsub.s32 %v3452_v30, %v7630_v26 }
  0x55   :  { %1100 = vadd.xlane.f32.xlu1 %v1099_v62  ;;  %1097 = vadd.xlane.f32.xlu0 %v1096_v63  ;;  %v80_v62 = vld [vmem:[%s11207_s0 + $0x208] sm:$0xff]  ;;  %v79_v63 = vld [vmem:[%s11207_s0 + $0x200] sm:$0xff] }
  0x56   :  { %v560_v2 = vmax.f32 %v80_v62, 0.0  ;;  %v559_v3 = vmax.f32 %v79_v63, 0.0 }
  0x58   :  { %v1171_v6 = vsel %vm975_vm0, %v560_v2, 0.0  ;;  %v1168_v7 = vsel %vm975_vm0, %v559_v3, 0.0 }
  0x59   :  { %1106 = vadd.xlane.f32.xlu1 %v1105_v4  ;;  %1103 = vadd.xlane.f32.xlu0 %v1102_v5  ;;  %v82_v4 = vld [vmem:[%s11207_s0 + $0x218] sm:$0xff]  ;;  %v81_v5 = vld [vmem:[%s11207_s0 + $0x210] sm:$0xff] }
  0x5a   :  { %v562_v8 = vmax.f32 %v82_v4, 0.0  ;;  %v561_v9 = vmax.f32 %v81_v5, 0.0 }
  0x5c   :  { %v1177_v13 = vsel %vm975_vm0, %v562_v8, 0.0  ;;  %v1174_v14 = vsel %vm975_vm0, %v561_v9, 0.0 }
  0x5d   :  { %1112 = vadd.xlane.f32.xlu1 %v1111_v10  ;;  %1109 = vadd.xlane.f32.xlu0 %v1108_v11  ;;  %v84_v10 = vld [vmem:[%s11207_s0 + $0x228] sm:$0xff]  ;;  %v83_v11 = vld [vmem:[%s11207_s0 + $0x220] sm:$0xff] }
  0x5e   :  { %v564_v15 = vmax.f32 %v84_v10, 0.0 }
  0x60   :  { %v1183_v20 = vsel %vm975_vm0, %v564_v15, 0.0 }
  0x61   :  { %1118 = vadd.xlane.f32.xlu1 %v1117_v16  ;;  %1115 = vadd.xlane.f32.xlu0 %v1114_v17  ;;  %v563_v16 = vmax.f32 %v83_v11, 0.0  ;;  %v86_v17 = vld [vmem:[%s11207_s0 + $0x238] sm:$0xff]  ;;  %v3438_v11 = vadd.s32 4294967232, %v7620_v19 }
  0x63   :  { %v1180_v21 = vsel %vm975_vm0, %v563_v16, 0.0 }
  0x65   :  { %1124 = vadd.xlane.f32.xlu1 %v1123_v22  ;;  %1121 = vadd.xlane.f32.xlu0 %v1120_v23  ;;  %v566_v22 = vmax.f32 %v86_v17, 0.0  ;;  %v565_v23 = vmax.f32 %v85_v18, 0.0  ;;  %v96_v17 = vld [vmem:[%s11207_s0 + $0x288] sm:$0xff] }
  0x66   :  { %v576_v31 = vmax.f32 %v96_v17, 0.0 }
  0x69   :  { %1130 = vadd.xlane.f32.xlu1 %v1129_v28  ;;  %1127 = vadd.xlane.f32.xlu0 %v1126_v29  ;;  %v3389_v28 = vadd.s32 4294967288, %v7620_v19  ;;  %v3396_v29 = vadd.s32 4294967280, %v7620_v19 }
  0x6b   :  { %v7656_v43 = vsub.s32 %v3396_v29, %v7630_v26  ;;  %v7716_v29 = vsub.s32 %v3438_v11, %v7630_v26 }
  0x6d   :  { %1136 = vadd.xlane.f32.xlu1 %v1135_v34  ;;  %1133 = vadd.xlane.f32.xlu0 %v1132_v35  ;;  %v1189_v34 = vsel %vm975_vm0, %v566_v22, 0.0  ;;  %v1186_v35 = vsel %vm975_vm0, %v565_v23, 0.0  ;;  %v573_v23 = vmax.f32 %v93_v12, 0.0 }
  0x71   :  { %1142 = vadd.xlane.f32.xlu1 %v1141_v40  ;;  %1139 = vadd.xlane.f32.xlu0 %v1138_v41  ;;  %v7649_v40 = vsub.s32 %v3403_v27, %v7630_v26  ;;  %v7652_v41 = vsub.s32 %v3389_v28, %v7630_v26 }
  0x75   :  { %1148 = vadd.xlane.f32.xlu1 %v1147_v46  ;;  %1145 = vadd.xlane.f32.xlu0 %v1144_v47  ;;  %v570_v46 = vmax.f32 %v90_v37, 0.0  ;;  %v569_v47 = vmax.f32 %v89_v38, 0.0  ;;  %v1210_v38 = vsel %vm975_vm0, %v573_v23, 0.0 }
  0x77   :  { %v1201_v62 = vsel %vm975_vm0, %v570_v46, 0.0  ;;  %v1198_v63 = vsel %vm975_vm0, %v569_v47, 0.0 }
  0x79   :  { %1154 = vadd.xlane.f32.xlu1 %v1153_v52  ;;  %1151 = vadd.xlane.f32.xlu0 %v1150_v53  ;;  %v3431_v52 = vadd.s32 4294967240, %v7620_v19  ;;  %v3424_v53 = vadd.s32 4294967248, %v7620_v19 }
  0x7b   :  { %v7683_v4 = vsub.s32 %v3431_v52, %v7630_v26  ;;  %v7686_v5 = vsub.s32 %v3424_v53, %v7630_v26  ;;  %v1219_v52 = vsel %vm975_vm0, %v576_v31, 0.0 }
  0x7d   :  { %1160 = vadd.xlane.f32.xlu1 %v1159_v58  ;;  %1157 = vadd.xlane.f32.xlu0 %v1156_v59  ;;  %v7675_v58 = vsub.s32 %v3410_v42, %v7630_v26  ;;  %v7724_v42 = vsub.s32 %v3459_v24, %v7630_v26 }
  0x81   :  { %1166 = vadd.xlane.f32.xlu1 %v1165_v0  ;;  %1163 = vadd.xlane.f32.xlu0 %v1162_v1  ;;  %v571_v0 = vmax.f32 %v91_v54, 0.0 }
  0x83   :  { %v1204_v15 = vsel %vm975_vm0, %v571_v0, 0.0 }
  0x85   :  { %1172 = vadd.xlane.f32.xlu1 %v1171_v6  ;;  %1169 = vadd.xlane.f32.xlu0 %v1168_v7  ;;  %v3445_v6 = vadd.s32 4294967224, %v7620_v19  ;;  %v94_v7 = vld [vmem:[%s11207_s0 + $0x278] sm:$0xff] }
  0x86   :  { %v574_v16 = vmax.f32 %v94_v7, 0.0 }
  0x87   :  { %v7707_v22 = vsub.s32 %v3445_v6, %v7630_v26  ;;  %v99_v6 = vld [vmem:[%s11207_s0 + $0x2a0] sm:$0xff] }
  0x89   :  { %1178 = vadd.xlane.f32.xlu1 %v1177_v13  ;;  %1175 = vadd.xlane.f32.xlu0 %v1174_v14  ;;  %v1207_v13 = vsel %vm975_vm0, %v572_v60, 0.0 }
  0x8d   :  { %1184 = vadd.xlane.f32.xlu1 %v1183_v20  ;;  %1181 = vadd.xlane.f32.xlu0 %v1180_v21 }
  0x8e   :  { %v984_v32 = vpop.xlane.xlu1 %983  ;;  %v978_v33 = vpop.xlane.xlu0 %977 }
  0x8f   :  { %v3388_v55 = vrot.slane %v978_v33, %v7646_v39  ;;  %v3400_v59 = vrot.slane %v984_v32, %v7656_v43  ;;  %v1213_v33 = vsel %vm975_vm0, %v574_v16, 0.0  ;;  %v101_v16 = vld [vmem:[%s11207_s0 + $0x2b0] sm:$0xff] }
  0x90   :  { %v581_v24 = vmax.f32 %v101_v16, 0.0 }
  0x91   :  { %1190 = vadd.xlane.f32.xlu1 %v1189_v34  ;;  %1187 = vadd.xlane.f32.xlu0 %v1186_v35  ;;  %v575_v34 = vmax.f32 %v95_v25, 0.0 }
  0x92   :  { %v987_v49 = vpop.xlane.xlu1 %986  ;;  %v981_v50 = vpop.xlane.xlu0 %980 }
  0x93   :  { %v3407_v56 = vrot.slane %v987_v49, %v7649_v40  ;;  %v3393_v57 = vrot.slane %v981_v50, %v7652_v41  ;;  %v3466_v49 = vadd.s32 4294967200, %v7620_v19  ;;  %v97_v50 = vld [vmem:[%s11207_s0 + $0x290] sm:$0xff]  ;;  %v1216_v54 = vsel %vm975_vm0, %v575_v34, 0.0  ;;  %v103_v34 = vld [vmem:[%s11207_s0 + $0x2c0] sm:$0xff] }
  0x95   :  { %v3395_v61 = vsel %vm3394_vm1, %v3393_v57, %v3388_v55  ;;  %1196 = vadd.xlane.f32.xlu1 %v1195_v44  ;;  %1193 = vadd.xlane.f32.xlu0 %v1192_v45  ;;  %v3473_v44 = vadd.s32 4294967192, %v7620_v19  ;;  %v98_v45 = vld [vmem:[%s11207_s0 + $0x298] sm:$0xff] }
  0x96   :  { %v3402_v1 = vsel %vm3401_vm2, %v3400_v59, %v3395_v61  ;;  %v993_v2 = vpop.xlane.xlu1 %992  ;;  %v990_v3 = vpop.xlane.xlu0 %989  ;;  %v578_v55 = vmax.f32 %v98_v45, 0.0  ;;  %v577_v61 = vmax.f32 %v97_v50, 0.0 }
  0x97   :  { %v3421_v8 = vrot.slane %v993_v2, %v7664_v51  ;;  %v3409_v9 = vsel %vm3408_vm3, %v3407_v56, %v3402_v1  ;;  %v3414_v10 = vrot.slane %v990_v3, %v7675_v58  ;;  %v7744_v60 = vsub.s32 %v3473_v44, %v7630_v26 }
  0x98   :  { %v7753_v2 = vsub.s32 %v3466_v49, %v7630_v26  ;;  %v3480_v3 = vadd.s32 4294967184, %v7620_v19  ;;  %v1234_v44 = vsel %vm975_vm0, %v581_v24, 0.0 }
  0x99   :  { %v3416_v14 = vsel %vm3415_vm4, %v3414_v10, %v3409_v9  ;;  %1202 = vadd.xlane.f32.xlu1 %v1201_v62  ;;  %1199 = vadd.xlane.f32.xlu0 %v1198_v63  ;;  %v3487_v62 = vadd.s32 4294967176, %v7620_v19  ;;  %v100_v63 = vld [vmem:[%s11207_s0 + $0x2a8] sm:$0xff] }
  0x9a   :  { %v999_v18 = vpop.xlane.xlu1 %998  ;;  %v3423_v20 = vsel %vm3422_vm5, %v3421_v8, %v3416_v14  ;;  %v996_v21 = vpop.xlane.xlu0 %995  ;;  %v1225_v8 = vsel %vm975_vm0, %v578_v55, 0.0  ;;  %v580_v9 = vmax.f32 %v100_v63, 0.0  ;;  %v579_v14 = vmax.f32 %v99_v6, 0.0  ;;  %v108_v63 = vld [vmem:[%s11207_s0 + $0x2e8] sm:$0xff] }
  0x9b   :  { %v3435_v27 = vrot.slane %v999_v18, %v7683_v4  ;;  %v3428_v28 = vrot.slane %v996_v21, %v7686_v5  ;;  %v7764_v19 = vsub.s32 %v3487_v62, %v7630_v26 }
  0x9c   :  { %v1228_v30 = vsel %vm975_vm0, %v579_v14, 0.0  ;;  %v110_v14 = vld [vmem:[%s11207_s0 + $0x2f8] sm:$0xff] }
  0x9d   :  { %v3430_v32 = vsel %vm3429_vm6, %v3428_v28, %v3423_v20  ;;  %1208 = vadd.xlane.f32.xlu1 %v1207_v13  ;;  %1205 = vadd.xlane.f32.xlu0 %v1204_v15  ;;  %v1222_v13 = vsel %vm975_vm0, %v577_v61, 0.0  ;;  %v102_v15 = vld [vmem:[%s11207_s0 + $0x2b8] sm:$0xff]  ;;  %v7775_v20 = vsub.s32 %v3480_v3, %v7630_v26  ;;  %v1231_v28 = vsel %vm975_vm0, %v580_v9, 0.0  ;;  %v107_v3 = vld [vmem:[%s11207_s0 + $0x2e0] sm:$0xff] }
  0x9e   :  { %v1005_v35 = vpop.xlane.xlu1 %1004  ;;  %v3437_v36 = vsel %vm11215_vm7, %v3435_v27, %v3430_v32  ;;  %v1002_v37 = vpop.xlane.xlu0 %1001  ;;  %v582_v23 = vmax.f32 %v102_v15, 0.0 }
  0x9f   :  { %v3449_v46 = vrot.slane %v1005_v35, %v7707_v22  ;;  %v3442_v47 = vrot.slane %v1002_v37, %v7716_v29 }
  0xa0   :  { %v1237_v35 = vsel %vm975_vm0, %v582_v23, 0.0 }
  0xa1   :  { %v3444_v53 = vsel %vm11214_vm8, %v3442_v47, %v3437_v36  ;;  %1214 = vadd.xlane.f32.xlu1 %v1213_v33  ;;  %1211 = vadd.xlane.f32.xlu0 %v1210_v38  ;;  %v104_v33 = vld [vmem:[%s11207_s0 + $0x2c8] sm:$0xff] }
  0xa2   :  { %v1011_v56 = vpop.xlane.xlu1 %1010  ;;  %v3451_v57 = vsel %vm11213_vm9, %v3449_v46, %v3444_v53  ;;  %v1008_v59 = vpop.xlane.xlu0 %1007  ;;  %v584_v45 = vmax.f32 %v104_v33, 0.0  ;;  %v583_v46 = vmax.f32 %v103_v34, 0.0  ;;  %v105_v53 = vld [vmem:[%s11207_s0 + $0x2d0] sm:$0xff]  ;;  %v111_v33 = vld [vmem:[%s11207_s0 + $0x300] sm:$0xff] }
  0xa3   :  { %v3463_v0 = vrot.slane %v1011_v56, %v7724_v42  ;;  %v3456_v1 = vrot.slane %v1008_v59, %v7733_v48  ;;  %v585_v62 = vmax.f32 %v105_v53, 0.0  ;;  %v113_v53 = vld [vmem:[%s11207_s0 + $0x310] sm:$0xff] }
  0xa4   :  { %v1240_v59 = vsel %vm975_vm0, %v583_v46, 0.0  ;;  %v591_v46 = vmax.f32 %v111_v33, 0.0  ;;  %v120_v33 = vld [vmem:[%s11207_s0 + $0x348] sm:$0xff] }
  0xa5   :  { %v3458_v7 = vsel %vm11212_vm10, %v3456_v1, %v3451_v57  ;;  %1220 = vadd.xlane.f32.xlu1 %v1219_v52  ;;  %1217 = vadd.xlane.f32.xlu0 %v1216_v54  ;;  %v106_v52 = vld [vmem:[%s11207_s0 + $0x2d8] sm:$0xff]  ;;  %v1243_v57 = vsel %vm975_vm0, %v584_v45, 0.0 }
  0xa6   :  { %v1017_v10 = vpop.xlane.xlu1 %1016  ;;  %v3465_v11 = vsel %vm3464_vm11, %v3463_v0, %v3458_v7  ;;  %v1014_v12 = vpop.xlane.xlu0 %1013  ;;  %v586_v61 = vmax.f32 %v106_v52, 0.0  ;;  %v588_v7 = vmax.f32 %v108_v63, 0.0  ;;  %v593_v63 = vmax.f32 %v113_v53, 0.0 }
  0xa7   :  { %v3477_v17 = vrot.slane %v1017_v10, %v7744_v60  ;;  %v3470_v18 = vrot.slane %v1014_v12, %v7753_v2  ;;  %v1246_v12 = vsel %vm975_vm0, %v585_v62, 0.0  ;;  %v1264_v62 = vsel %vm975_vm0, %v591_v46, 0.0 }
  0xa9   :  { %v3472_v21 = vsel %vm11211_vm12, %v3470_v18, %v3465_v11  ;;  %1226 = vadd.xlane.f32.xlu1 %v1225_v8  ;;  %1223 = vadd.xlane.f32.xlu0 %v1222_v13  ;;  %v1249_v11 = vsel %vm975_vm0, %v586_v61, 0.0  ;;  %v587_v13 = vmax.f32 %v107_v3, 0.0  ;;  %v116_v3 = vld [vmem:[%s11207_s0 + $0x328] sm:$0xff] }
  0xaa   :  { %v1023_v25 = vpop.xlane.xlu1 %1022  ;;  %v1020_v27 = vpop.xlane.xlu0 %1019  ;;  %v3479_v31 = vsel %vm3478_vm13, %v3477_v17, %v3472_v21  ;;  %v109_v17 = vld [vmem:[%s11207_s0 + $0x2f0] sm:$0xff]  ;;  %v590_v21 = vmax.f32 %v110_v14, 0.0 }
  0xab   :  { %v3491_v32 = vrot.slane %v1023_v25, %v7764_v19  ;;  %v3484_v26 = vrot.slane %v1020_v27, %v7775_v20  ;;  %v1255_v27 = vsel %vm975_vm0, %v588_v7, 0.0 }
  0xad   :  { %1232 = vadd.xlane.f32.xlu1 %v1231_v28  ;;  %1229 = vadd.xlane.f32.xlu0 %v1228_v30  ;;  %v3486_v36 = vsel %vm3485_vm14, %v3484_v26, %v3479_v31  ;;  %v1252_v28 = vsel %vm975_vm0, %v587_v13, 0.0  ;;  %v589_v30 = vmax.f32 %v109_v17, 0.0  ;;  %v112_v26 = vld [vmem:[%s11207_s0 + $0x308] sm:$0xff]  ;;  %v596_v13 = vmax.f32 %v116_v3, 0.0 }
  0xae   :  { %v1029_v37 = vpop.xlane.xlu1 %1028  ;;  %v1026_v38 = vpop.xlane.xlu0 %1025  ;;  %v7793_v47 = vsel %vm3492_vm15, %v3491_v32, %v3486_v36  ;;  %v592_v45 = vmax.f32 %v112_v26, 0.0  ;;  %v124_v3 = vld [vmem:[%s11207_s0 + $0x368] sm:$0xff] }
  0xaf   :  { %v3501_v49 = vrot.slane %v1029_v37, %v7652_v41  ;;  %v3497_v50 = vrot.slane %v1026_v38, %v7646_v39 }
  0xb0   :  { %v1267_v61 = vsel %vm975_vm0, %v592_v45, 0.0  ;;  %v600_v45 = vmax.f32 %v120_v33, 0.0  ;;  %v128_v33 = vld [vmem:[%s11207_s0 + $0x388] sm:$0xff] }
  0xb1   :  { %v3502_v54 = vsel %vm3394_vm1, %v3501_v49, %v3497_v50  ;;  %1238 = vadd.xlane.f32.xlu1 %v1237_v35  ;;  %1235 = vadd.xlane.f32.xlu0 %v1234_v44  ;;  %v1261_v35 = vsel %vm975_vm0, %v590_v21, 0.0  ;;  %v1258_v44 = vsel %vm975_vm0, %v589_v30, 0.0  ;;  %v114_v49 = vld [vmem:[%s11207_s0 + $0x318] sm:$0xff] }
  0xb2   :  { %v1035_v55 = vpop.xlane.xlu1 %1034  ;;  %v1032_v56 = vpop.xlane.xlu0 %1031 }
  0xb3   :  { %v3511_v0 = vrot.slane %v1035_v55, %v7649_v40  ;;  %v3506_v1 = vrot.slane %v1032_v56, %v7656_v43  ;;  %v594_v55 = vmax.f32 %v114_v49, 0.0  ;;  %v122_v49 = vld [vmem:[%s11207_s0 + $0x358] sm:$0xff] }
  0xb5   :  { %v3507_v6 = vsel %vm3401_vm2, %v3506_v1, %v3502_v54  ;;  %1244 = vadd.xlane.f32.xlu1 %v1243_v57  ;;  %1241 = vadd.xlane.f32.xlu0 %v1240_v59 }
  0xb6   :  { %v1041_v8 = vpop.xlane.xlu1 %1040  ;;  %v3512_v9 = vsel %vm3408_vm3, %v3511_v0, %v3507_v6  ;;  %v1038_v10 = vpop.xlane.xlu0 %1037  ;;  %v115_v6 = vld [vmem:[%s11207_s0 + $0x320] sm:$0xff] }
  0xb7   :  { %v3521_v15 = vrot.slane %v1041_v8, %v7664_v51  ;;  %v3516_v16 = vrot.slane %v1038_v10, %v7675_v58  ;;  %v1273_v8 = vsel %vm975_vm0, %v594_v55, 0.0  ;;  %v595_v14 = vmax.f32 %v115_v6, 0.0  ;;  %v123_v6 = vld [vmem:[%s11207_s0 + $0x360] sm:$0xff] }
  0xb9   :  { %v3517_v18 = vsel %vm3415_vm4, %v3516_v16, %v3512_v9  ;;  %1250 = vadd.xlane.f32.xlu1 %v1249_v11  ;;  %1247 = vadd.xlane.f32.xlu0 %v1246_v12  ;;  %v1270_v12 = vsel %vm975_vm0, %v593_v63, 0.0 }
  0xba   :  { %v1047_v23 = vpop.xlane.xlu1 %1046  ;;  %v3522_v24 = vsel %vm3422_vm5, %v3521_v15, %v3517_v18  ;;  %v1044_v25 = vpop.xlane.xlu0 %1043  ;;  %v118_v15 = vld [vmem:[%s11207_s0 + $0x338] sm:$0xff]  ;;  %v117_v18 = vld [vmem:[%s11207_s0 + $0x330] sm:$0xff] }
  0xbb   :  { %v3531_v31 = vrot.slane %v1047_v23, %v7683_v4  ;;  %v3526_v32 = vrot.slane %v1044_v25, %v7686_v5  ;;  %v598_v23 = vmax.f32 %v118_v15, 0.0  ;;  %v597_v30 = vmax.f32 %v117_v18, 0.0  ;;  %v126_v15 = vld [vmem:[%s11207_s0 + $0x378] sm:$0xff]  ;;  %v125_v18 = vld [vmem:[%s11207_s0 + $0x370] sm:$0xff] }
  0xbd   :  { %v3527_v34 = vsel %vm3429_vm6, %v3526_v32, %v3522_v24  ;;  %1256 = vadd.xlane.f32.xlu1 %v1255_v27  ;;  %1253 = vadd.xlane.f32.xlu0 %v1252_v28  ;;  %v1279_v27 = vsel %vm975_vm0, %v596_v13, 0.0  ;;  %v1276_v28 = vsel %vm975_vm0, %v595_v14, 0.0  ;;  %v604_v13 = vmax.f32 %v124_v3, 0.0 }
  0xbe   :  { %v1053_v36 = vpop.xlane.xlu1 %1052  ;;  %v3532_v37 = vsel %vm11215_vm7, %v3531_v31, %v3527_v34  ;;  %v1050_v38 = vpop.xlane.xlu0 %1049  ;;  %v119_v34 = vld [vmem:[%s11207_s0 + $0x340] sm:$0xff]  ;;  %v603_v14 = vmax.f32 %v123_v6, 0.0 }
  0xbf   :  { %v3541_v50 = vrot.slane %v1053_v36, %v7707_v22  ;;  %v3536_v52 = vrot.slane %v1050_v38, %v7716_v29  ;;  %v599_v46 = vmax.f32 %v119_v34, 0.0  ;;  %v127_v34 = vld [vmem:[%s11207_s0 + $0x380] sm:$0xff] }
  0xc1   :  { %v3537_v54 = vsel %vm11214_vm8, %v3536_v52, %v3532_v37  ;;  %1262 = vadd.xlane.f32.xlu1 %v1261_v35  ;;  %1259 = vadd.xlane.f32.xlu0 %v1258_v44  ;;  %v1285_v35 = vsel %vm975_vm0, %v598_v23, 0.0  ;;  %v1282_v44 = vsel %vm975_vm0, %v597_v30, 0.0  ;;  %v606_v23 = vmax.f32 %v126_v15, 0.0 }
  0xc2   :  { %v1059_v56 = vpop.xlane.xlu1 %1058  ;;  %v3542_v57 = vsel %vm11213_vm9, %v3541_v50, %v3537_v54  ;;  %v1056_v59 = vpop.xlane.xlu0 %1055  ;;  %v121_v54 = vld [vmem:[%s11207_s0 + $0x350] sm:$0xff]  ;;  %v1300_v30 = vsel %vm975_vm0, %v603_v14, 0.0 }
  0xc3   :  { %v3551_v0 = vrot.slane %v1059_v56, %v7724_v42  ;;  %v3546_v1 = vrot.slane %v1056_v59, %v7733_v48  ;;  %v602_v56 = vmax.f32 %v122_v49, 0.0  ;;  %v601_v63 = vmax.f32 %v121_v54, 0.0 }
  0xc4   :  { %v607_v49 = vmax.f32 %v127_v34, 0.0 }
  0xc5   :  { %v3547_v7 = vsel %vm11212_vm10, %v3546_v1, %v3542_v57  ;;  %1268 = vadd.xlane.f32.xlu1 %v1267_v61  ;;  %1265 = vadd.xlane.f32.xlu0 %v1264_v62  ;;  %v1291_v61 = vsel %vm975_vm0, %v600_v45, 0.0  ;;  %v1288_v62 = vsel %vm975_vm0, %v599_v46, 0.0  ;;  %v608_v46 = vmax.f32 %v128_v33, 0.0 }
  0xc6   :  { %v1065_v9 = vpop.xlane.xlu1 %1064  ;;  %v3552_v10 = vsel %vm3464_vm11, %v3551_v0, %v3547_v7  ;;  %v1062_v11 = vpop.xlane.xlu0 %1061 }
  0xc7   :  { %v3561_v16 = vrot.slane %v1065_v9, %v7744_v60  ;;  %v3556_v17 = vrot.slane %v1062_v11, %v7753_v2 }
  0xc9   :  { %v3557_v21 = vsel %vm11211_vm12, %v3556_v17, %v3552_v10  ;;  %1274 = vadd.xlane.f32.xlu1 %v1273_v8  ;;  %1271 = vadd.xlane.f32.xlu0 %v1270_v12  ;;  %v1297_v8 = vsel %vm975_vm0, %v602_v56, 0.0  ;;  %v1294_v12 = vsel %vm975_vm0, %v601_v63, 0.0  ;;  %v1315_v63 = vsel %vm975_vm0, %v608_v46, 0.0 }
  0xca   :  { %v1071_v24 = vpop.xlane.xlu1 %1070  ;;  %v1068_v25 = vpop.xlane.xlu0 %1067  ;;  %v3562_v31 = vsel %vm3478_vm13, %v3561_v16, %v3557_v21 }
  0xcb   :  { %v3571_v32 = vrot.slane %v1071_v24, %v7764_v19  ;;  %v3566_v26 = vrot.slane %v1068_v25, %v7775_v20 }
  0xcd   :  { %1280 = vadd.xlane.f32.xlu1 %v1279_v27  ;;  %1277 = vadd.xlane.f32.xlu0 %v1276_v28  ;;  %v3567_v36 = vsel %vm3485_vm14, %v3566_v26, %v3562_v31  ;;  %v1303_v28 = vsel %vm975_vm0, %v604_v13, 0.0  ;;  %v605_v31 = vmax.f32 %v125_v18, 0.0 }
  0xce   :  { %v1077_v37 = vpop.xlane.xlu1 %1076  ;;  %v1074_v38 = vpop.xlane.xlu0 %1073  ;;  %v7893_v50 = vsel %vm3492_vm15, %v3571_v32, %v3567_v36  ;;  %v1309_v36 = vsel %vm975_vm0, %v606_v23, 0.0  ;;  %v133_v23 = vld [vmem:[%s11207_s0 + $0x3b0] sm:$0xff] }
  0xcf   :  { %v3580_v52 = vrot.slane %v1077_v37, %v7652_v41  ;;  %v3576_v53 = vrot.slane %v1074_v38, %v7646_v39  ;;  %v1306_v45 = vsel %vm975_vm0, %v605_v31, 0.0 }
  0xd1   :  { %v3581_v55 = vsel %vm3394_vm1, %v3580_v52, %v3576_v53  ;;  %1286 = vadd.xlane.f32.xlu1 %v1285_v35  ;;  %1283 = vadd.xlane.f32.xlu0 %v1282_v44  ;;  %v130_v52 = vld [vmem:[%s11207_s0 + $0x398] sm:$0xff] }
  0xd2   :  { %v1083_v57 = vpop.xlane.xlu1 %1082  ;;  %v1080_v59 = vpop.xlane.xlu0 %1079 }
  0xd3   :  { %v3590_v0 = vrot.slane %v1083_v57, %v7649_v40  ;;  %v3585_v1 = vrot.slane %v1080_v59, %v7656_v43  ;;  %v610_v57 = vmax.f32 %v130_v52, 0.0 }
  0xd5   :  { %v3586_v7 = vsel %vm3401_vm2, %v3585_v1, %v3581_v55  ;;  %1292 = vadd.xlane.f32.xlu1 %v1291_v61  ;;  %1289 = vadd.xlane.f32.xlu0 %v1288_v62  ;;  %v129_v55 = vld [vmem:[%s11207_s0 + $0x390] sm:$0xff] }
  0xd6   :  { %v1089_v9 = vpop.xlane.xlu1 %1088  ;;  %v3591_v10 = vsel %vm3408_vm3, %v3590_v0, %v3586_v7  ;;  %v1086_v11 = vpop.xlane.xlu0 %1085  ;;  %v1312_v0 = vsel %vm975_vm0, %v607_v49, 0.0  ;;  %v609_v1 = vmax.f32 %v129_v55, 0.0  ;;  %v132_v7 = vld [vmem:[%s11207_s0 + $0x3a8] sm:$0xff] }
  0xd7   :  { %v3600_v16 = vrot.slane %v1089_v9, %v7664_v51  ;;  %v3595_v17 = vrot.slane %v1086_v11, %v7675_v58  ;;  %v612_v15 = vmax.f32 %v132_v7, 0.0 }
  0xd8   :  { %v1318_v14 = vsel %vm975_vm0, %v609_v1, 0.0 }
  0xd9   :  { %v3596_v21 = vsel %vm3415_vm4, %v3595_v17, %v3591_v10  ;;  %1298 = vadd.xlane.f32.xlu1 %v1297_v8  ;;  %1295 = vadd.xlane.f32.xlu0 %v1294_v12  ;;  %v131_v8 = vld [vmem:[%s11207_s0 + $0x3a0] sm:$0xff]  ;;  %v1321_v10 = vsel %vm975_vm0, %v610_v57, 0.0  ;;  %v134_v17 = vld [vmem:[%s11207_s0 + $0x3b8] sm:$0xff]  ;;  %v137_v57 = vld [vmem:[%s11207_s0 + $0x3d0] sm:$0xff] }
  0xda   :  { %v1095_v24 = vpop.xlane.xlu1 %1094  ;;  %v3601_v25 = vsel %vm3422_vm5, %v3600_v16, %v3596_v21  ;;  %v1092_v27 = vpop.xlane.xlu0 %1091  ;;  %v611_v16 = vmax.f32 %v131_v8, 0.0  ;;  %v140_v8 = vld [vmem:[%s11207_s0 + $0x3e8] sm:$0xff] }
  0xdb   :  { %v3610_v32 = vrot.slane %v1095_v24, %v7683_v4  ;;  %v3605_v26 = vrot.slane %v1092_v27, %v7686_v5 }
  0xdc   :  { %v1324_v31 = vsel %vm975_vm0, %v611_v16, 0.0  ;;  %v620_v16 = vmax.f32 %v140_v8, 0.0 }
  0xdd   :  { %v3606_v35 = vsel %vm3429_vm6, %v3605_v26, %v3601_v25  ;;  %1304 = vadd.xlane.f32.xlu1 %v1303_v28  ;;  %1301 = vadd.xlane.f32.xlu0 %v1300_v30  ;;  %v614_v25 = vmax.f32 %v134_v17, 0.0  ;;  %v1327_v30 = vsel %vm975_vm0, %v612_v15, 0.0 }
  0xde   :  { %v1101_v37 = vpop.xlane.xlu1 %1100  ;;  %v3611_v38 = vsel %vm11215_vm7, %v3610_v32, %v3606_v35  ;;  %v1098_v44 = vpop.xlane.xlu0 %1097  ;;  %v613_v32 = vmax.f32 %v133_v23, 0.0  ;;  %v136_v35 = vld [vmem:[%s11207_s0 + $0x3c8] sm:$0xff] }
  0xdf   :  { %v3620_v53 = vrot.slane %v1101_v37, %v7707_v22  ;;  %v3615_v54 = vrot.slane %v1098_v44, %v7716_v29  ;;  %v1333_v37 = vsel %vm975_vm0, %v614_v25, 0.0  ;;  %v616_v49 = vmax.f32 %v136_v35, 0.0 }
  0xe0   :  { %v1330_v46 = vsel %vm975_vm0, %v613_v32, 0.0  ;;  %v1351_v32 = vsel %vm975_vm0, %v620_v16, 0.0 }
  0xe1   :  { %v3616_v56 = vsel %vm11214_vm8, %v3615_v54, %v3611_v38  ;;  %1310 = vadd.xlane.f32.xlu1 %v1309_v36  ;;  %1307 = vadd.xlane.f32.xlu0 %v1306_v45  ;;  %v135_v36 = vld [vmem:[%s11207_s0 + $0x3c0] sm:$0xff] }
  0xe2   :  { %v1107_v59 = vpop.xlane.xlu1 %1106  ;;  %v3621_v61 = vsel %vm11213_vm9, %v3620_v53, %v3616_v56  ;;  %v1104_v62 = vpop.xlane.xlu0 %1103  ;;  %v615_v52 = vmax.f32 %v135_v36, 0.0  ;;  %v138_v53 = vld [vmem:[%s11207_s0 + $0x3d8] sm:$0xff]  ;;  %v144_v36 = vld [vmem:[%s11207_s0 + $0x408] sm:$0xff] }
  0xe3   :  { %v3630_v3 = vrot.slane %v1107_v59, %v7724_v42  ;;  %v3625_v6 = vrot.slane %v1104_v62, %v7733_v48 }
  0xe4   :  { %v1336_v1 = vsel %vm975_vm0, %v615_v52, 0.0 }
  0xe5   :  { %v3626_v9 = vsel %vm11212_vm10, %v3625_v6, %v3621_v61  ;;  %1316 = vadd.xlane.f32.xlu1 %v1315_v63  ;;  %1313 = vadd.xlane.f32.xlu0 %v1312_v0  ;;  %v618_v61 = vmax.f32 %v138_v53, 0.0  ;;  %v1339_v0 = vsel %vm975_vm0, %v616_v49, 0.0  ;;  %v624_v53 = vmax.f32 %v144_v36, 0.0 }
  0xe6   :  { %v1113_v11 = vpop.xlane.xlu1 %1112  ;;  %v3631_v12 = vsel %vm3464_vm11, %v3630_v3, %v3626_v9  ;;  %v1110_v13 = vpop.xlane.xlu0 %1109  ;;  %v617_v3 = vmax.f32 %v137_v57, 0.0  ;;  %v139_v9 = vld [vmem:[%s11207_s0 + $0x3e0] sm:$0xff] }
  0xe7   :  { %v3640_v18 = vrot.slane %v1113_v11, %v7744_v60  ;;  %v3635_v21 = vrot.slane %v1110_v13, %v7753_v2  ;;  %v1345_v11 = vsel %vm975_vm0, %v618_v61, 0.0  ;;  %v619_v17 = vmax.f32 %v139_v9, 0.0  ;;  %v145_v61 = vld [vmem:[%s11207_s0 + $0x410] sm:$0xff] }
  0xe8   :  { %v1342_v15 = vsel %vm975_vm0, %v617_v3, 0.0  ;;  %v625_v8 = vmax.f32 %v145_v61, 0.0 }
  0xe9   :  { %v3636_v24 = vsel %vm11211_vm12, %v3635_v21, %v3631_v12  ;;  %1322 = vadd.xlane.f32.xlu1 %v1321_v10  ;;  %1319 = vadd.xlane.f32.xlu0 %v1318_v14 }
  0xea   :  { %v1119_v27 = vpop.xlane.xlu1 %1118  ;;  %v1116_v28 = vpop.xlane.xlu0 %1115  ;;  %v3641_v26 = vsel %vm3478_vm13, %v3640_v18, %v3636_v24  ;;  %v142_v18 = vld [vmem:[%s11207_s0 + $0x3f8] sm:$0xff]  ;;  %v141_v24 = vld [vmem:[%s11207_s0 + $0x3f0] sm:$0xff] }
  0xeb   :  { %v3650_v33 = vrot.slane %v1119_v27, %v7764_v19  ;;  %v3645_v34 = vrot.slane %v1116_v28, %v7775_v20  ;;  %v622_v27 = vmax.f32 %v142_v18, 0.0  ;;  %v1366_v18 = vsel %vm975_vm0, %v625_v8, 0.0 }
  0xed   :  { %1328 = vadd.xlane.f32.xlu1 %v1327_v30  ;;  %1325 = vadd.xlane.f32.xlu0 %v1324_v31  ;;  %v3646_v38 = vsel %vm3485_vm14, %v3645_v34, %v3641_v26  ;;  %v1348_v26 = vsel %vm975_vm0, %v619_v17, 0.0 }
  0xee   :  { %v1125_v44 = vpop.xlane.xlu1 %1124  ;;  %v1122_v45 = vpop.xlane.xlu0 %1121  ;;  %v7990_v54 = vsel %vm3492_vm15, %v3650_v33, %v3646_v38  ;;  %v621_v33 = vmax.f32 %v141_v24, 0.0  ;;  %v150_v24 = vld [vmem:[%s11207_s0 + $0x438] sm:$0xff] }
  0xef   :  { %v3659_v55 = vrot.slane %v1125_v44, %v7652_v41  ;;  %v3655_v56 = vrot.slane %v1122_v45, %v7646_v39  ;;  %v1357_v44 = vsel %vm975_vm0, %v622_v27, 0.0 }
  0xf0   :  { %v1354_v52 = vsel %vm975_vm0, %v621_v33, 0.0 }
  0xf1   :  { %v3660_v59 = vsel %vm3394_vm1, %v3659_v55, %v3655_v56  ;;  %1334 = vadd.xlane.f32.xlu1 %v1333_v37  ;;  %1331 = vadd.xlane.f32.xlu0 %v1330_v46  ;;  %v143_v37 = vld [vmem:[%s11207_s0 + $0x400] sm:$0xff]  ;;  %v146_v56 = vld [vmem:[%s11207_s0 + $0x418] sm:$0xff] }
  0xf2   :  { %v1131_v62 = vpop.xlane.xlu1 %1130  ;;  %v1128_v63 = vpop.xlane.xlu0 %1127  ;;  %v623_v55 = vmax.f32 %v143_v37, 0.0 }
  0xf3   :  { %v3669_v6 = vrot.slane %v1131_v62, %v7649_v40  ;;  %v3664_v7 = vrot.slane %v1128_v63, %v7656_v43  ;;  %v626_v63 = vmax.f32 %v146_v56, 0.0 }
  0xf5   :  { %v3665_v10 = vsel %vm3401_vm2, %v3664_v7, %v3660_v59  ;;  %1340 = vadd.xlane.f32.xlu1 %v1339_v0  ;;  %1337 = vadd.xlane.f32.xlu0 %v1336_v1  ;;  %v1360_v7 = vsel %vm975_vm0, %v623_v55, 0.0 }
  0xf6   :  { %v1137_v12 = vpop.xlane.xlu1 %1136  ;;  %v3670_v13 = vsel %vm3408_vm3, %v3669_v6, %v3665_v10  ;;  %v1134_v14 = vpop.xlane.xlu0 %1133  ;;  %v1363_v6 = vsel %vm975_vm0, %v624_v53, 0.0 }
  0xf7   :  { %v3679_v21 = vrot.slane %v1137_v12, %v7664_v51  ;;  %v3674_v23 = vrot.slane %v1134_v14, %v7675_v58  ;;  %v147_v12 = vld [vmem:[%s11207_s0 + $0x420] sm:$0xff]  ;;  %v1369_v14 = vsel %vm975_vm0, %v626_v63, 0.0 }
  0xf9   :  { %v3675_v25 = vsel %vm3415_vm4, %v3674_v23, %v3670_v13  ;;  %1346 = vadd.xlane.f32.xlu1 %v1345_v11  ;;  %1343 = vadd.xlane.f32.xlu0 %v1342_v15  ;;  %v148_v11 = vld [vmem:[%s11207_s0 + $0x428] sm:$0xff]  ;;  %v627_v23 = vmax.f32 %v147_v12, 0.0 }
  0xfa   :  { %v1143_v28 = vpop.xlane.xlu1 %1142  ;;  %v3680_v30 = vsel %vm3422_vm5, %v3679_v21, %v3675_v25  ;;  %v1140_v31 = vpop.xlane.xlu0 %1139  ;;  %v628_v21 = vmax.f32 %v148_v11, 0.0 }
  0xfb   :  { %v3689_v34 = vrot.slane %v1143_v28, %v7683_v4  ;;  %v3684_v35 = vrot.slane %v1140_v31, %v7686_v5  ;;  %v149_v28 = vld [vmem:[%s11207_s0 + $0x430] sm:$0xff]  ;;  %v630_v31 = vmax.f32 %v150_v24, 0.0 }
  0xfc   :  { %v1375_v33 = vsel %vm975_vm0, %v628_v21, 0.0 }
  0xfd   :  { %v3685_v38 = vsel %vm3429_vm6, %v3684_v35, %v3680_v30  ;;  %1352 = vadd.xlane.f32.xlu1 %v1351_v32  ;;  %1349 = vadd.xlane.f32.xlu0 %v1348_v26  ;;  %v629_v35 = vmax.f32 %v149_v28, 0.0 }
  0xfe   :  { %v1149_v45 = vpop.xlane.xlu1 %1148  ;;  %v3690_v46 = vsel %vm11215_vm7, %v3689_v34, %v3685_v38  ;;  %v1146_v49 = vpop.xlane.xlu0 %1145  ;;  %v1372_v34 = vsel %vm975_vm0, %v627_v23, 0.0 }
  0xff   :  { %v3699_v57 = vrot.slane %v1149_v45, %v7707_v22  ;;  %v3694_v59 = vrot.slane %v1146_v49, %v7716_v29  ;;  %v151_v45 = vld [vmem:[%s11207_s0 + $0x440] sm:$0xff]  ;;  %v1378_v55 = vsel %vm975_vm0, %v629_v35, 0.0 }
 0x101   :  { %v3695_v62 = vsel %vm11214_vm8, %v3694_v59, %v3690_v46  ;;  %1358 = vadd.xlane.f32.xlu1 %v1357_v44  ;;  %1355 = vadd.xlane.f32.xlu0 %v1354_v52  ;;  %v152_v44 = vld [vmem:[%s11207_s0 + $0x448] sm:$0xff]  ;;  %v1381_v46 = vsel %vm975_vm0, %v630_v31, 0.0  ;;  %v154_v59 = vld [vmem:[%s11207_s0 + $0x458] sm:$0xff]  ;;  %v157_v31 = vld [vmem:[%s11207_s0 + $0x470] sm:$0xff] }
 0x102   :  { %v1155_v0 = vpop.xlane.xlu1 %1154  ;;  %v3700_v1 = vsel %vm11213_vm9, %v3699_v57, %v3695_v62  ;;  %v1152_v3 = vpop.xlane.xlu0 %1151  ;;  %v632_v56 = vmax.f32 %v152_v44, 0.0  ;;  %v631_v57 = vmax.f32 %v151_v45, 0.0 }
 0x103   :  { %v3709_v9 = vrot.slane %v1155_v0, %v7724_v42  ;;  %v3704_v10 = vrot.slane %v1152_v3, %v7733_v48  ;;  %v153_v0 = vld [vmem:[%s11207_s0 + $0x450] sm:$0xff]  ;;  %v634_v3 = vmax.f32 %v154_v59, 0.0 }
 0x104   :  { %v1387_v8 = vsel %vm975_vm0, %v632_v56, 0.0 }
 0x105   :  { %v3705_v13 = vsel %vm11212_vm10, %v3704_v10, %v3700_v1  ;;  %1364 = vadd.xlane.f32.xlu1 %v1363_v6  ;;  %1361 = vadd.xlane.f32.xlu0 %v1360_v7  ;;  %v633_v10 = vmax.f32 %v153_v0, 0.0  ;;  %v162_v0 = vld [vmem:[%s11207_s0 + $0x498] sm:$0xff] }
 0x106   :  { %v1161_v15 = vpop.xlane.xlu1 %1160  ;;  %v3710_v16 = vsel %vm3464_vm11, %v3709_v9, %v3705_v13  ;;  %v1158_v17 = vpop.xlane.xlu0 %1157  ;;  %v1384_v9 = vsel %vm975_vm0, %v631_v57, 0.0  ;;  %v156_v13 = vld [vmem:[%s11207_s0 + $0x468] sm:$0xff] }
 0x107   :  { %v3719_v25 = vrot.slane %v1161_v15, %v7744_v60  ;;  %v3714_v27 = vrot.slane %v1158_v17, %v7753_v2  ;;  %v1390_v23 = vsel %vm975_vm0, %v633_v10, 0.0  ;;  %v636_v24 = vmax.f32 %v156_v13, 0.0 }
 0x109   :  { %v3715_v30 = vsel %vm11211_vm12, %v3714_v27, %v3710_v16  ;;  %1370 = vadd.xlane.f32.xlu1 %v1369_v14  ;;  %1367 = vadd.xlane.f32.xlu0 %v1366_v18  ;;  %v155_v14 = vld [vmem:[%s11207_s0 + $0x460] sm:$0xff]  ;;  %v1393_v16 = vsel %vm975_vm0, %v634_v3, 0.0  ;;  %v158_v27 = vld [vmem:[%s11207_s0 + $0x478] sm:$0xff] }
 0x10a   :  { %v1167_v32 = vpop.xlane.xlu1 %1166  ;;  %v1164_v26 = vpop.xlane.xlu0 %1163  ;;  %v3720_v36 = vsel %vm3478_vm13, %v3719_v25, %v3715_v30  ;;  %v635_v25 = vmax.f32 %v155_v14, 0.0 }
 0x10b   :  { %v3729_v37 = vrot.slane %v1167_v32, %v7764_v19  ;;  %v3724_v38 = vrot.slane %v1164_v26, %v7775_v20  ;;  %v638_v26 = vmax.f32 %v158_v27, 0.0 }
 0x10d   :  { %1376 = vadd.xlane.f32.xlu1 %v1375_v33  ;;  %1373 = vadd.xlane.f32.xlu0 %v1372_v34  ;;  %v3725_v49 = vsel %vm3485_vm14, %v3724_v38, %v3720_v36  ;;  %v1399_v36 = vsel %vm975_vm0, %v636_v24, 0.0  ;;  %v637_v38 = vmax.f32 %v157_v31, 0.0 }
 0x10e   :  { %v1173_v52 = vpop.xlane.xlu1 %1172  ;;  %v1170_v53 = vpop.xlane.xlu0 %1169  ;;  %v8087_v61 = vsel %vm3492_vm15, %v3729_v37, %v3725_v49  ;;  %v1396_v37 = vsel %vm975_vm0, %v635_v25, 0.0  ;;  %v159_v49 = vld [vmem:[%s11207_s0 + $0x480] sm:$0xff] }
 0x10f   :  { %v3738_v62 = vrot.slane %v1173_v52, %v7652_v41  ;;  %v3734_v63 = vrot.slane %v1170_v53, %v7646_v39  ;;  %v1405_v53 = vsel %vm975_vm0, %v638_v26, 0.0  ;;  %v1402_v59 = vsel %vm975_vm0, %v637_v38, 0.0 }
 0x111   :  { %v3739_v1 = vsel %vm3394_vm1, %v3738_v62, %v3734_v63  ;;  %1382 = vadd.xlane.f32.xlu1 %v1381_v46  ;;  %1379 = vadd.xlane.f32.xlu0 %v1378_v55  ;;  %v160_v46 = vld [vmem:[%s11207_s0 + $0x488] sm:$0xff]  ;;  %v639_v63 = vmax.f32 %v159_v49, 0.0 }
 0x112   :  { %v1179_v6 = vpop.xlane.xlu1 %1178  ;;  %v1176_v7 = vpop.xlane.xlu0 %1175  ;;  %v640_v62 = vmax.f32 %v160_v46, 0.0 }
 0x113   :  { %v3748_v11 = vrot.slane %v1179_v6, %v7649_v40  ;;  %v3743_v12 = vrot.slane %v1176_v7, %v7656_v43  ;;  %v161_v6 = vld [vmem:[%s11207_s0 + $0x490] sm:$0xff]  ;;  %v1408_v13 = vsel %vm975_vm0, %v639_v63, 0.0 }
 0x114   :  { %v641_v14 = vmax.f32 %v161_v6, 0.0  ;;  %v170_v6 = vld [vmem:[%s11207_s0 + $0x4d8] sm:$0xff] }
 0x115   :  { %v3744_v15 = vsel %vm3401_vm2, %v3743_v12, %v3739_v1  ;;  %1388 = vadd.xlane.f32.xlu1 %v1387_v8  ;;  %1385 = vadd.xlane.f32.xlu0 %v1384_v9  ;;  %v642_v8 = vmax.f32 %v162_v0, 0.0  ;;  %v1411_v12 = vsel %vm975_vm0, %v640_v62, 0.0 }
 0x116   :  { %v1185_v17 = vpop.xlane.xlu1 %1184  ;;  %v3749_v18 = vsel %vm3408_vm3, %v3748_v11, %v3744_v15  ;;  %v1182_v21 = vpop.xlane.xlu0 %1181 }
 0x117   :  { %v3758_v28 = vrot.slane %v1185_v17, %v7664_v51  ;;  %v3753_v30 = vrot.slane %v1182_v21, %v7675_v58  ;;  %v164_v17 = vld [vmem:[%s11207_s0 + $0x4a8] sm:$0xff] }
 0x119   :  { %v3754_v32 = vsel %vm3415_vm4, %v3753_v30, %v3749_v18  ;;  %1394 = vadd.xlane.f32.xlu1 %v1393_v16  ;;  %1391 = vadd.xlane.f32.xlu0 %v1390_v23  ;;  %v163_v18 = vld [vmem:[%s11207_s0 + $0x4a0] sm:$0xff]  ;;  %v1417_v23 = vsel %vm975_vm0, %v642_v8, 0.0  ;;  %v644_v30 = vmax.f32 %v164_v17, 0.0 }
 0x11a   :  { %v1191_v33 = vpop.xlane.xlu1 %1190  ;;  %v3759_v34 = vsel %vm3422_vm5, %v3758_v28, %v3754_v32  ;;  %v1188_v35 = vpop.xlane.xlu0 %1187  ;;  %v1414_v28 = vsel %vm975_vm0, %v641_v14, 0.0  ;;  %v643_v31 = vmax.f32 %v163_v18, 0.0  ;;  %v166_v32 = vld [vmem:[%s11207_s0 + $0x4b8] sm:$0xff] }
 0x11b   :  { %v3768_v44 = vrot.slane %v1191_v33, %v7683_v4  ;;  %v3763_v45 = vrot.slane %v1188_v35, %v7686_v5 }
 0x11c   :  { %v1420_v46 = vsel %vm975_vm0, %v643_v31, 0.0 }
 0x11d   :  { %v3764_v52 = vsel %vm3429_vm6, %v3763_v45, %v3759_v34  ;;  %1400 = vadd.xlane.f32.xlu1 %v1399_v36  ;;  %1397 = vadd.xlane.f32.xlu0 %v1396_v37  ;;  %v165_v34 = vld [vmem:[%s11207_s0 + $0x4b0] sm:$0xff]  ;;  %v646_v36 = vmax.f32 %v166_v32, 0.0  ;;  %v1423_v45 = vsel %vm975_vm0, %v644_v30, 0.0 }
 0x11e   :  { %v1197_v55 = vpop.xlane.xlu1 %1196  ;;  %v3769_v56 = vsel %vm11215_vm7, %v3768_v44, %v3764_v52  ;;  %v1194_v57 = vpop.xlane.xlu0 %1193  ;;  %v645_v49 = vmax.f32 %v165_v34, 0.0  ;;  %v174_v34 = vld [vmem:[%s11207_s0 + $0x4f8] sm:$0xff] }
 0x11f   :  { %v3778_v1 = vrot.slane %v1197_v55, %v7707_v22  ;;  %v3773_v3 = vrot.slane %v1194_v57, %v7716_v29  ;;  %v168_v55 = vld [vmem:[%s11207_s0 + $0x4c8] sm:$0xff] }
 0x120   :  { %v1426_v0 = vsel %vm975_vm0, %v645_v49, 0.0 }
 0x121   :  { %v3774_v7 = vsel %vm11214_vm8, %v3773_v3, %v3769_v56  ;;  %1406 = vadd.xlane.f32.xlu1 %v1405_v53  ;;  %1403 = vadd.xlane.f32.xlu0 %v1402_v59  ;;  %v167_v56 = vld [vmem:[%s11207_s0 + $0x4c0] sm:$0xff]  ;;  %v1429_v59 = vsel %vm975_vm0, %v646_v36, 0.0 }
 0x122   :  { %v1203_v9 = vpop.xlane.xlu1 %1202  ;;  %v3779_v10 = vsel %vm11213_vm9, %v3778_v1, %v3774_v7  ;;  %v1200_v11 = vpop.xlane.xlu0 %1199  ;;  %v648_v1 = vmax.f32 %v168_v55, 0.0  ;;  %v647_v3 = vmax.f32 %v167_v56, 0.0 }
 0x123   :  { %v3788_v15 = vrot.slane %v1203_v9, %v7724_v42  ;;  %v3783_v16 = vrot.slane %v1200_v11, %v7733_v48 }
 0x125   :  { %v3784_v21 = vsel %vm11212_vm10, %v3783_v16, %v3779_v10  ;;  %1412 = vadd.xlane.f32.xlu1 %v1411_v12  ;;  %1409 = vadd.xlane.f32.xlu0 %v1408_v13  ;;  %v169_v10 = vld [vmem:[%s11207_s0 + $0x4d0] sm:$0xff]  ;;  %v650_v12 = vmax.f32 %v170_v6, 0.0  ;;  %v1432_v16 = vsel %vm975_vm0, %v647_v3, 0.0 }
 0x126   :  { %v1209_v24 = vpop.xlane.xlu1 %1208  ;;  %v3789_v25 = vsel %vm3464_vm11, %v3788_v15, %v3784_v21  ;;  %v1206_v27 = vpop.xlane.xlu0 %1205  ;;  %v1435_v15 = vsel %vm975_vm0, %v648_v1, 0.0  ;;  %v649_v17 = vmax.f32 %v169_v10, 0.0 }
 0x127   :  { %v3798_v26 = vrot.slane %v1209_v24, %v7744_v60  ;;  %v3793_v33 = vrot.slane %v1206_v27, %v7753_v2  ;;  %v171_v24 = vld [vmem:[%s11207_s0 + $0x4e0] sm:$0xff]  ;;  %v1441_v27 = vsel %vm975_vm0, %v650_v12, 0.0 }
 0x128   :  { %v1438_v32 = vsel %vm975_vm0, %v649_v17, 0.0 }
 0x129   :  { %v3794_v35 = vsel %vm11211_vm12, %v3793_v33, %v3789_v25  ;;  %1418 = vadd.xlane.f32.xlu1 %v1417_v23  ;;  %1415 = vadd.xlane.f32.xlu0 %v1414_v28  ;;  %v172_v23 = vld [vmem:[%s11207_s0 + $0x4e8] sm:$0xff]  ;;  %v651_v33 = vmax.f32 %v171_v24, 0.0 }
 0x12a   :  { %v1215_v37 = vpop.xlane.xlu1 %1214  ;;  %v3799_v38 = vsel %vm3478_vm13, %v3798_v26, %v3794_v35  ;;  %v1212_v44 = vpop.xlane.xlu0 %1211  ;;  %v652_v26 = vmax.f32 %v172_v23, 0.0 }
 0x12b   :  { %v3808_v52 = vrot.slane %v1215_v37, %v7764_v19  ;;  %v3803_v53 = vrot.slane %v1212_v44, %v7775_v20  ;;  %v173_v37 = vld [vmem:[%s11207_s0 + $0x4f0] sm:$0xff]  ;;  %v654_v44 = vmax.f32 %v174_v34, 0.0 }
 0x12c   :  { %v653_v55 = vmax.f32 %v173_v37, 0.0 }
 0x12d   :  { %v3804_v57 = vsel %vm3485_vm14, %v3803_v53, %v3799_v38  ;;  %1424 = vadd.xlane.f32.xlu1 %v1423_v45  ;;  %1421 = vadd.xlane.f32.xlu0 %v1420_v46  ;;  %v1444_v53 = vsel %vm975_vm0, %v651_v33, 0.0 }
 0x12e   :  { %v1221_v62 = vpop.xlane.xlu1 %1220  ;;  %v1218_v63 = vpop.xlane.xlu0 %1217  ;;  %v8184_v7 = vsel %vm3492_vm15, %v3808_v52, %v3804_v57  ;;  %v1447_v52 = vsel %vm975_vm0, %v652_v26, 0.0 }
 0x12f   :  { %v3817_v8 = vrot.slane %v1221_v62, %v7652_v41  ;;  %v3813_v9 = vrot.slane %v1218_v63, %v7646_v39  ;;  %v175_v62 = vld [vmem:[%s11207_s0 + $0x500] sm:$0xff] }
 0x130   :  { %v655_v10 = vmax.f32 %v175_v62, 0.0 }
 0x131   :  { %v3818_v11 = vsel %vm3394_vm1, %v3817_v8, %v3813_v9  ;;  %1430 = vadd.xlane.f32.xlu1 %v1429_v59  ;;  %1427 = vadd.xlane.f32.xlu0 %v1426_v0  ;;  %v176_v59 = vld [vmem:[%s11207_s0 + $0x508] sm:$0xff]  ;;  %v1453_v0 = vsel %vm975_vm0, %v654_v44, 0.0  ;;  %v1450_v8 = vsel %vm975_vm0, %v653_v55, 0.0  ;;  %v182_v44 = vld [vmem:[%s11207_s0 + $0x538] sm:$0xff] }
 0x132   :  { %v1227_v13 = vpop.xlane.xlu1 %1226  ;;  %v1224_v14 = vpop.xlane.xlu0 %1223  ;;  %v656_v9 = vmax.f32 %v176_v59, 0.0  ;;  %v1456_v24 = vsel %vm975_vm0, %v655_v10, 0.0 }
 0x133   :  { %v3827_v18 = vrot.slane %v1227_v13, %v7649_v40  ;;  %v3822_v21 = vrot.slane %v1224_v14, %v7656_v43  ;;  %v177_v14 = vld [vmem:[%s11207_s0 + $0x510] sm:$0xff] }
 0x134   :  { %v1459_v23 = vsel %vm975_vm0, %v656_v9, 0.0 }
 0x135   :  { %v3823_v25 = vsel %vm3401_vm2, %v3822_v21, %v3818_v11  ;;  %1436 = vadd.xlane.f32.xlu1 %v1435_v15  ;;  %1433 = vadd.xlane.f32.xlu0 %v1432_v16  ;;  %v178_v11 = vld [vmem:[%s11207_s0 + $0x518] sm:$0xff] }
 0x136   :  { %v1233_v28 = vpop.xlane.xlu1 %1232  ;;  %v3828_v30 = vsel %vm3408_vm3, %v3827_v18, %v3823_v25  ;;  %v1230_v31 = vpop.xlane.xlu0 %1229  ;;  %v658_v16 = vmax.f32 %v178_v11, 0.0  ;;  %v657_v25 = vmax.f32 %v177_v14, 0.0 }
 0x137   :  { %v3837_v35 = vrot.slane %v1233_v28, %v7664_v51  ;;  %v3832_v36 = vrot.slane %v1230_v31, %v7675_v58  ;;  %v179_v31 = vld [vmem:[%s11207_s0 + $0x520] sm:$0xff] }
 0x138   :  { %v1465_v26 = vsel %vm975_vm0, %v658_v16, 0.0 }
 0x139   :  { %v3833_v38 = vsel %vm3415_vm4, %v3832_v36, %v3828_v30  ;;  %1442 = vadd.xlane.f32.xlu1 %v1441_v27  ;;  %1439 = vadd.xlane.f32.xlu0 %v1438_v32  ;;  %v180_v30 = vld [vmem:[%s11207_s0 + $0x528] sm:$0xff]  ;;  %v1462_v36 = vsel %vm975_vm0, %v657_v25, 0.0 }
 0x13a   :  { %v1239_v45 = vpop.xlane.xlu1 %1238  ;;  %v3838_v46 = vsel %vm3422_vm5, %v3837_v35, %v3833_v38  ;;  %v1236_v49 = vpop.xlane.xlu0 %1235  ;;  %v660_v37 = vmax.f32 %v180_v30, 0.0  ;;  %v659_v38 = vmax.f32 %v179_v31, 0.0 }
 0x13b   :  { %v3847_v56 = vrot.slane %v1239_v45, %v7683_v4  ;;  %v3842_v57 = vrot.slane %v1236_v49, %v7686_v5  ;;  %v181_v49 = vld [vmem:[%s11207_s0 + $0x530] sm:$0xff] }
 0x13c   :  { %v1468_v59 = vsel %vm975_vm0, %v659_v38, 0.0  ;;  %v661_v62 = vmax.f32 %v181_v49, 0.0 }
 0x13d   :  { %v3843_v63 = vsel %vm3429_vm6, %v3842_v57, %v3838_v46  ;;  %1448 = vadd.xlane.f32.xlu1 %v1447_v52  ;;  %1445 = vadd.xlane.f32.xlu0 %v1444_v53  ;;  %v662_v53 = vmax.f32 %v182_v44, 0.0  ;;  %v1471_v57 = vsel %vm975_vm0, %v660_v37, 0.0 }
 0x13e   :  { %v1245_v1 = vpop.xlane.xlu1 %1244  ;;  %v3848_v3 = vsel %vm11215_vm7, %v3847_v56, %v3843_v63  ;;  %v1242_v6 = vpop.xlane.xlu0 %1241 }
 0x13f   :  { %v3857_v12 = vrot.slane %v1245_v1, %v7707_v22  ;;  %v3852_v13 = vrot.slane %v1242_v6, %v7716_v29  ;;  %v183_v6 = vld [vmem:[%s11207_s0 + $0x540] sm:$0xff] }
 0x140   :  { %v663_v14 = vmax.f32 %v183_v6, 0.0 }
 0x141   :  { %v3853_v15 = vsel %vm11214_vm8, %v3852_v13, %v3848_v3  ;;  %1454 = vadd.xlane.f32.xlu1 %v1453_v0  ;;  %1451 = vadd.xlane.f32.xlu0 %v1450_v8  ;;  %v184_v3 = vld [vmem:[%s11207_s0 + $0x548] sm:$0xff]  ;;  %v1477_v8 = vsel %vm975_vm0, %v662_v53, 0.0 }
 0x142   :  { %v1251_v17 = vpop.xlane.xlu1 %1250  ;;  %v3858_v18 = vsel %vm11213_vm9, %v3857_v12, %v3853_v15  ;;  %v1248_v21 = vpop.xlane.xlu0 %1247  ;;  %v1474_v12 = vsel %vm975_vm0, %v661_v62, 0.0  ;;  %v664_v13 = vmax.f32 %v184_v3, 0.0  ;;  %v186_v15 = vld [vmem:[%s11207_s0 + $0x558] sm:$0xff]  ;;  %v1480_v30 = vsel %vm975_vm0, %v663_v14, 0.0 }
 0x143   :  { %v3867_v27 = vrot.slane %v1251_v17, %v7724_v42  ;;  %v3862_v28 = vrot.slane %v1248_v21, %v7733_v48  ;;  %v185_v21 = vld [vmem:[%s11207_s0 + $0x550] sm:$0xff] }
 0x144   :  { %v665_v31 = vmax.f32 %v185_v21, 0.0 }
 0x145   :  { %v3863_v32 = vsel %vm11212_vm10, %v3862_v28, %v3858_v18  ;;  %1460 = vadd.xlane.f32.xlu1 %v1459_v23  ;;  %1457 = vadd.xlane.f32.xlu0 %v1456_v24  ;;  %v666_v24 = vmax.f32 %v186_v15, 0.0  ;;  %v1483_v28 = vsel %vm975_vm0, %v664_v13, 0.0 }
 0x146   :  { %v1257_v33 = vpop.xlane.xlu1 %1256  ;;  %v3868_v34 = vsel %vm3464_vm11, %v3867_v27, %v3863_v32  ;;  %v1254_v35 = vpop.xlane.xlu0 %1253 }
 0x147   :  { %v3877_v45 = vrot.slane %v1257_v33, %v7744_v60  ;;  %v3872_v46 = vrot.slane %v1254_v35, %v7753_v2  ;;  %v188_v33 = vld [vmem:[%s11207_s0 + $0x568] sm:$0xff] }
 0x149   :  { %v3873_v52 = vsel %vm11211_vm12, %v3872_v46, %v3868_v34  ;;  %1466 = vadd.xlane.f32.xlu1 %v1465_v26  ;;  %1463 = vadd.xlane.f32.xlu0 %v1462_v36  ;;  %v187_v34 = vld [vmem:[%s11207_s0 + $0x560] sm:$0xff]  ;;  %v1489_v36 = vsel %vm975_vm0, %v666_v24, 0.0  ;;  %v668_v46 = vmax.f32 %v188_v33, 0.0  ;;  %v194_v24 = vld [vmem:[%s11207_s0 + $0x598] sm:$0xff] }
 0x14a   :  { %v1263_v55 = vpop.xlane.xlu1 %1262  ;;  %v1260_v56 = vpop.xlane.xlu0 %1259  ;;  %v3878_v63 = vsel %vm3478_vm13, %v3877_v45, %v3873_v52  ;;  %v1486_v45 = vsel %vm975_vm0, %v665_v31, 0.0  ;;  %v667_v49 = vmax.f32 %v187_v34, 0.0  ;;  %v190_v52 = vld [vmem:[%s11207_s0 + $0x578] sm:$0xff]  ;;  %v674_v31 = vmax.f32 %v194_v24, 0.0 }
 0x14b   :  { %v3887_v0 = vrot.slane %v1263_v55, %v7764_v19  ;;  %v3882_v1 = vrot.slane %v1260_v56, %v7775_v20  ;;  %v189_v56 = vld [vmem:[%s11207_s0 + $0x570] sm:$0xff] }
 0x14c   :  { %v1492_v3 = vsel %vm975_vm0, %v667_v49, 0.0  ;;  %v669_v6 = vmax.f32 %v189_v56, 0.0  ;;  %v1513_v49 = vsel %vm975_vm0, %v674_v31, 0.0  ;;  %v202_v31 = vld [vmem:[%s11207_s0 + $0x5d8] sm:$0xff] }
 0x14d   :  { %1472 = vadd.xlane.f32.xlu1 %v1471_v57  ;;  %1469 = vadd.xlane.f32.xlu0 %v1468_v59  ;;  %v3883_v9 = vsel %vm3485_vm14, %v3882_v1, %v3878_v63  ;;  %v670_v59 = vmax.f32 %v190_v52, 0.0  ;;  %v1495_v1 = vsel %vm975_vm0, %v668_v46, 0.0 }
 0x14e   :  { %v1269_v10 = vpop.xlane.xlu1 %1268  ;;  %v1266_v11 = vpop.xlane.xlu0 %1265  ;;  %v8281_v16 = vsel %vm3492_vm15, %v3887_v0, %v3883_v9 }
 0x14f   :  { %v3896_v17 = vrot.slane %v1269_v10, %v7652_v41  ;;  %v3892_v18 = vrot.slane %v1266_v11, %v7646_v39  ;;  %v192_v10 = vld [vmem:[%s11207_s0 + $0x588] sm:$0xff]  ;;  %v191_v11 = vld [vmem:[%s11207_s0 + $0x580] sm:$0xff]  ;;  %v1501_v13 = vsel %vm975_vm0, %v670_v59, 0.0 }
 0x150   :  { %v672_v21 = vmax.f32 %v192_v10, 0.0 }
 0x151   :  { %v3897_v23 = vsel %vm3394_vm1, %v3896_v17, %v3892_v18  ;;  %1478 = vadd.xlane.f32.xlu1 %v1477_v8  ;;  %1475 = vadd.xlane.f32.xlu0 %v1474_v12  ;;  %v1498_v18 = vsel %vm975_vm0, %v669_v6, 0.0 }
 0x152   :  { %v1275_v25 = vpop.xlane.xlu1 %1274  ;;  %v1272_v27 = vpop.xlane.xlu0 %1271  ;;  %v1507_v34 = vsel %vm975_vm0, %v672_v21, 0.0 }
 0x153   :  { %v3906_v32 = vrot.slane %v1275_v25, %v7649_v40  ;;  %v3901_v26 = vrot.slane %v1272_v27, %v7656_v43 }
 0x155   :  { %v3902_v35 = vsel %vm3401_vm2, %v3901_v26, %v3897_v23  ;;  %1484 = vadd.xlane.f32.xlu1 %v1483_v28  ;;  %1481 = vadd.xlane.f32.xlu0 %v1480_v30  ;;  %v671_v23 = vmax.f32 %v191_v11, 0.0  ;;  %v193_v28 = vld [vmem:[%s11207_s0 + $0x590] sm:$0xff] }
 0x156   :  { %v1281_v37 = vpop.xlane.xlu1 %1280  ;;  %v3907_v38 = vsel %vm3408_vm3, %v3906_v32, %v3902_v35  ;;  %v1278_v44 = vpop.xlane.xlu0 %1277 }
 0x157   :  { %v3916_v53 = vrot.slane %v1281_v37, %v7664_v51  ;;  %v3911_v55 = vrot.slane %v1278_v44, %v7675_v58  ;;  %v1504_v35 = vsel %vm975_vm0, %v671_v23, 0.0  ;;  %v196_v44 = vld [vmem:[%s11207_s0 + $0x5a8] sm:$0xff] }
 0x159   :  { %v3912_v57 = vsel %vm3415_vm4, %v3911_v55, %v3907_v38  ;;  %1490 = vadd.xlane.f32.xlu1 %v1489_v36  ;;  %1487 = vadd.xlane.f32.xlu0 %v1486_v45  ;;  %v673_v36 = vmax.f32 %v193_v28, 0.0  ;;  %v195_v45 = vld [vmem:[%s11207_s0 + $0x5a0] sm:$0xff] }
 0x15a   :  { %v1287_v62 = vpop.xlane.xlu1 %1286  ;;  %v3917_v63 = vsel %vm3422_vm5, %v3916_v53, %v3912_v57  ;;  %v1284_v0 = vpop.xlane.xlu0 %1283  ;;  %v676_v57 = vmax.f32 %v196_v44, 0.0  ;;  %v675_v59 = vmax.f32 %v195_v45, 0.0 }
 0x15b   :  { %v3926_v8 = vrot.slane %v1287_v62, %v7683_v4  ;;  %v3921_v9 = vrot.slane %v1284_v0, %v7686_v5  ;;  %v1510_v56 = vsel %vm975_vm0, %v673_v36, 0.0  ;;  %v198_v62 = vld [vmem:[%s11207_s0 + $0x5b8] sm:$0xff]  ;;  %v682_v36 = vmax.f32 %v202_v31, 0.0 }
 0x15c   :  { %v678_v6 = vmax.f32 %v198_v62, 0.0  ;;  %v1519_v11 = vsel %vm975_vm0, %v676_v57, 0.0 }
 0x15d   :  { %v3922_v12 = vsel %vm3429_vm6, %v3921_v9, %v3917_v63  ;;  %1496 = vadd.xlane.f32.xlu1 %v1495_v1  ;;  %1493 = vadd.xlane.f32.xlu0 %v1492_v3  ;;  %v197_v1 = vld [vmem:[%s11207_s0 + $0x5b0] sm:$0xff]  ;;  %v1537_v57 = vsel %vm975_vm0, %v682_v36, 0.0 }
 0x15e   :  { %v1293_v14 = vpop.xlane.xlu1 %1292  ;;  %v3927_v15 = vsel %vm11215_vm7, %v3926_v8, %v3922_v12  ;;  %v1290_v17 = vpop.xlane.xlu0 %1289  ;;  %v1516_v12 = vsel %vm975_vm0, %v675_v59, 0.0  ;;  %v1525_v23 = vsel %vm975_vm0, %v678_v6, 0.0  ;;  %v206_v6 = vld [vmem:[%s11207_s0 + $0x5f8] sm:$0xff] }
 0x15f   :  { %v3936_v25 = vrot.slane %v1293_v14, %v7707_v22  ;;  %v3931_v27 = vrot.slane %v1290_v17, %v7716_v29  ;;  %v200_v17 = vld [vmem:[%s11207_s0 + $0x5c8] sm:$0xff] }
 0x160   :  { %v680_v28 = vmax.f32 %v200_v17, 0.0 }
 0x161   :  { %v3932_v30 = vsel %vm11214_vm8, %v3931_v27, %v3927_v15  ;;  %1502 = vadd.xlane.f32.xlu1 %v1501_v13  ;;  %1499 = vadd.xlane.f32.xlu0 %v1498_v18  ;;  %v677_v13 = vmax.f32 %v197_v1, 0.0  ;;  %v199_v18 = vld [vmem:[%s11207_s0 + $0x5c0] sm:$0xff] }
 0x162   :  { %v1299_v32 = vpop.xlane.xlu1 %1298  ;;  %v3937_v26 = vsel %vm11213_vm9, %v3936_v25, %v3932_v30  ;;  %v1296_v33 = vpop.xlane.xlu0 %1295  ;;  %v679_v30 = vmax.f32 %v199_v18, 0.0  ;;  %v1531_v44 = vsel %vm975_vm0, %v680_v28, 0.0 }
 0x163   :  { %v3946_v37 = vrot.slane %v1299_v32, %v7724_v42  ;;  %v3941_v38 = vrot.slane %v1296_v33, %v7733_v48  ;;  %v1522_v27 = vsel %vm975_vm0, %v677_v13, 0.0 }
 0x164   :  { %v1528_v45 = vsel %vm975_vm0, %v679_v30, 0.0 }
 0x165   :  { %v3942_v46 = vsel %vm11212_vm10, %v3941_v38, %v3937_v26  ;;  %1508 = vadd.xlane.f32.xlu1 %v1507_v34  ;;  %1505 = vadd.xlane.f32.xlu0 %v1504_v35  ;;  %v201_v34 = vld [vmem:[%s11207_s0 + $0x5d0] sm:$0xff] }
 0x166   :  { %v1305_v52 = vpop.xlane.xlu1 %1304  ;;  %v3947_v53 = vsel %vm3464_vm11, %v3946_v37, %v3942_v46  ;;  %v1302_v55 = vpop.xlane.xlu0 %1301  ;;  %v681_v46 = vmax.f32 %v201_v34, 0.0 }
 0x167   :  { %v3956_v63 = vrot.slane %v1305_v52, %v7744_v60  ;;  %v3951_v0 = vrot.slane %v1302_v55, %v7753_v2  ;;  %v203_v55 = vld [vmem:[%s11207_s0 + $0x5e0] sm:$0xff] }
 0x169   :  { %v3952_v3 = vsel %vm11211_vm12, %v3951_v0, %v3947_v53  ;;  %1514 = vadd.xlane.f32.xlu1 %v1513_v49  ;;  %1511 = vadd.xlane.f32.xlu0 %v1510_v56  ;;  %v204_v53 = vld [vmem:[%s11207_s0 + $0x5e8] sm:$0xff]  ;;  %v1534_v0 = vsel %vm975_vm0, %v681_v46, 0.0 }
 0x16a   :  { %v1311_v8 = vpop.xlane.xlu1 %1310  ;;  %v3957_v9 = vsel %vm3478_vm13, %v3956_v63, %v3952_v3  ;;  %v1308_v10 = vpop.xlane.xlu0 %1307  ;;  %v684_v1 = vmax.f32 %v204_v53, 0.0  ;;  %v683_v3 = vmax.f32 %v203_v55, 0.0 }
 0x16b   :  { %v3966_v14 = vrot.slane %v1311_v8, %v7764_v19  ;;  %v3961_v15 = vrot.slane %v1308_v10, %v7775_v20  ;;  %v205_v10 = vld [vmem:[%s11207_s0 + $0x5f0] sm:$0xff] }
 0x16c   :  { %v1543_v17 = vsel %vm975_vm0, %v684_v1, 0.0  ;;  %v1540_v18 = vsel %vm975_vm0, %v683_v3, 0.0  ;;  %v211_v1 = vld [vmem:[%s11207_s0 + $0x620] sm:$0xff] }
 0x16d   :  { %v3962_v21 = vsel %vm3485_vm14, %v3961_v15, %v3957_v9  ;;  %1520 = vadd.xlane.f32.xlu1 %v1519_v11  ;;  %1517 = vadd.xlane.f32.xlu0 %v1516_v12  ;;  %v686_v12 = vmax.f32 %v206_v6, 0.0 }
 0x16e   :  { %v1317_v24 = vpop.xlane.xlu1 %1316  ;;  %v1314_v25 = vpop.xlane.xlu0 %1313  ;;  %v8378_v32 = vsel %vm3492_vm15, %v3966_v14, %v3962_v21  ;;  %v685_v21 = vmax.f32 %v205_v10, 0.0 }
 0x16f   :  { %v3975_v26 = vrot.slane %v1317_v24, %v7652_v41  ;;  %v3971_v33 = vrot.slane %v1314_v25, %v7646_v39  ;;  %v208_v25 = vld [vmem:[%s11207_s0 + $0x608] sm:$0xff]  ;;  %v1549_v30 = vsel %vm975_vm0, %v686_v12, 0.0 }
 0x170   :  { %v1546_v34 = vsel %vm975_vm0, %v685_v21, 0.0 }
 0x171   :  { %v3976_v35 = vsel %vm3394_vm1, %v3975_v26, %v3971_v33  ;;  %1526 = vadd.xlane.f32.xlu1 %v1525_v23  ;;  %1523 = vadd.xlane.f32.xlu0 %v1522_v27  ;;  %v207_v27 = vld [vmem:[%s11207_s0 + $0x600] sm:$0xff] }
 0x172   :  { %v1323_v37 = vpop.xlane.xlu1 %1322  ;;  %v1320_v38 = vpop.xlane.xlu0 %1319  ;;  %v687_v36 = vmax.f32 %v207_v27, 0.0 }
 0x173   :  { %v3985_v49 = vrot.slane %v1323_v37, %v7649_v40  ;;  %v3980_v52 = vrot.slane %v1320_v38, %v7656_v43  ;;  %v210_v37 = vld [vmem:[%s11207_s0 + $0x618] sm:$0xff] }
 0x175   :  { %v3981_v56 = vsel %vm3401_vm2, %v3980_v52, %v3976_v35  ;;  %1532 = vadd.xlane.f32.xlu1 %v1531_v44  ;;  %1529 = vadd.xlane.f32.xlu0 %v1528_v45  ;;  %v688_v35 = vmax.f32 %v208_v25, 0.0  ;;  %v209_v45 = vld [vmem:[%s11207_s0 + $0x610] sm:$0xff] }
 0x176   :  { %v1329_v59 = vpop.xlane.xlu1 %1328  ;;  %v3986_v62 = vsel %vm3408_vm3, %v3985_v49, %v3981_v56  ;;  %v1326_v63 = vpop.xlane.xlu0 %1325  ;;  %v690_v49 = vmax.f32 %v210_v37, 0.0 }
 0x177   :  { %v3995_v8 = vrot.slane %v1329_v59, %v7664_v51  ;;  %v3990_v9 = vrot.slane %v1326_v63, %v7675_v58  ;;  %v1555_v56 = vsel %vm975_vm0, %v688_v35, 0.0  ;;  %v689_v59 = vmax.f32 %v209_v45, 0.0  ;;  %v215_v35 = vld [vmem:[%s11207_s0 + $0x640] sm:$0xff] }
 0x178   :  { %v1561_v6 = vsel %vm975_vm0, %v690_v49, 0.0  ;;  %v695_v49 = vmax.f32 %v215_v35, 0.0 }
 0x179   :  { %v3991_v11 = vsel %vm3415_vm4, %v3990_v9, %v3986_v62  ;;  %1538 = vadd.xlane.f32.xlu1 %v1537_v57  ;;  %1535 = vadd.xlane.f32.xlu0 %v1534_v0  ;;  %v1552_v57 = vsel %vm975_vm0, %v687_v36, 0.0  ;;  %v212_v0 = vld [vmem:[%s11207_s0 + $0x628] sm:$0xff] }
 0x17a   :  { %v1335_v13 = vpop.xlane.xlu1 %1334  ;;  %v3996_v14 = vsel %vm3422_vm5, %v3995_v8, %v3991_v11  ;;  %v1332_v15 = vpop.xlane.xlu0 %1331  ;;  %v1558_v11 = vsel %vm975_vm0, %v689_v59, 0.0  ;;  %v692_v12 = vmax.f32 %v212_v0, 0.0 }
 0x17b   :  { %v4005_v23 = vrot.slane %v1335_v13, %v7683_v4  ;;  %v4000_v24 = vrot.slane %v1332_v15, %v7686_v5  ;;  %v691_v13 = vmax.f32 %v211_v1, 0.0 }
 0x17c   :  { %v1567_v27 = vsel %vm975_vm0, %v692_v12, 0.0 }
 0x17d   :  { %v4001_v28 = vsel %vm3429_vm6, %v4000_v24, %v3996_v14  ;;  %1544 = vadd.xlane.f32.xlu1 %v1543_v17  ;;  %1541 = vadd.xlane.f32.xlu0 %v1540_v18  ;;  %v214_v14 = vld [vmem:[%s11207_s0 + $0x638] sm:$0xff]  ;;  %v213_v18 = vld [vmem:[%s11207_s0 + $0x630] sm:$0xff] }
 0x17e   :  { %v1341_v31 = vpop.xlane.xlu1 %1340  ;;  %v4006_v26 = vsel %vm11215_vm7, %v4005_v23, %v4001_v28  ;;  %v1338_v33 = vpop.xlane.xlu0 %1337  ;;  %v694_v23 = vmax.f32 %v214_v14, 0.0  ;;  %v1564_v28 = vsel %vm975_vm0, %v691_v13, 0.0 }
 0x17f   :  { %v4015_v38 = vrot.slane %v1341_v31, %v7707_v22  ;;  %v4010_v44 = vrot.slane %v1338_v33, %v7716_v29 }
 0x180   :  { %v1573_v36 = vsel %vm975_vm0, %v694_v23, 0.0 }
 0x181   :  { %v4011_v46 = vsel %vm11214_vm8, %v4010_v44, %v4006_v26  ;;  %1550 = vadd.xlane.f32.xlu1 %v1549_v30  ;;  %1547 = vadd.xlane.f32.xlu0 %v1546_v34  ;;  %v693_v30 = vmax.f32 %v213_v18, 0.0  ;;  %v216_v34 = vld [vmem:[%s11207_s0 + $0x648] sm:$0xff] }
 0x182   :  { %v1347_v52 = vpop.xlane.xlu1 %1346  ;;  %v4016_v53 = vsel %vm11213_vm9, %v4015_v38, %v4011_v46  ;;  %v1344_v55 = vpop.xlane.xlu0 %1343  ;;  %v696_v46 = vmax.f32 %v216_v34, 0.0 }
 0x183   :  { %v4025_v62 = vrot.slane %v1347_v52, %v7724_v42  ;;  %v4020_v63 = vrot.slane %v1344_v55, %v7733_v48  ;;  %v1570_v45 = vsel %vm975_vm0, %v693_v30, 0.0  ;;  %v218_v52 = vld [vmem:[%s11207_s0 + $0x658] sm:$0xff] }
 0x184   :  { %v1579_v1 = vsel %vm975_vm0, %v696_v46, 0.0  ;;  %v223_v46 = vld [vmem:[%s11207_s0 + $0x680] sm:$0xff] }
 0x185   :  { %v4021_v3 = vsel %vm11212_vm10, %v4020_v63, %v4016_v53  ;;  %1556 = vadd.xlane.f32.xlu1 %v1555_v56  ;;  %1553 = vadd.xlane.f32.xlu0 %v1552_v57  ;;  %v217_v57 = vld [vmem:[%s11207_s0 + $0x650] sm:$0xff] }
 0x186   :  { %v1353_v8 = vpop.xlane.xlu1 %1352  ;;  %v4026_v9 = vsel %vm3464_vm11, %v4025_v62, %v4021_v3  ;;  %v1350_v10 = vpop.xlane.xlu0 %1349  ;;  %v698_v62 = vmax.f32 %v218_v52, 0.0  ;;  %v1576_v3 = vsel %vm975_vm0, %v695_v49, 0.0 }
 0x187   :  { %v4035_v15 = vrot.slane %v1353_v8, %v7744_v60  ;;  %v4030_v17 = vrot.slane %v1350_v10, %v7753_v2  ;;  %v220_v10 = vld [vmem:[%s11207_s0 + $0x668] sm:$0xff] }
 0x188   :  { %v1585_v13 = vsel %vm975_vm0, %v698_v62, 0.0 }
 0x189   :  { %v4031_v21 = vsel %vm11211_vm12, %v4030_v17, %v4026_v9  ;;  %1562 = vadd.xlane.f32.xlu1 %v1561_v6  ;;  %1559 = vadd.xlane.f32.xlu0 %v1558_v11  ;;  %v697_v6 = vmax.f32 %v217_v57, 0.0  ;;  %v219_v11 = vld [vmem:[%s11207_s0 + $0x660] sm:$0xff] }
 0x18a   :  { %v1359_v24 = vpop.xlane.xlu1 %1358  ;;  %v1356_v25 = vpop.xlane.xlu0 %1355  ;;  %v4036_v31 = vsel %vm3478_vm13, %v4035_v15, %v4031_v21  ;;  %v700_v21 = vmax.f32 %v220_v10, 0.0  ;;  %v699_v23 = vmax.f32 %v219_v11, 0.0 }
 0x18b   :  { %v4045_v26 = vrot.slane %v1359_v24, %v7764_v19  ;;  %v4040_v33 = vrot.slane %v1356_v25, %v7775_v20  ;;  %v1582_v18 = vsel %vm975_vm0, %v697_v6, 0.0  ;;  %v222_v24 = vld [vmem:[%s11207_s0 + $0x678] sm:$0xff]  ;;  %v225_v6 = vld [vmem:[%s11207_s0 + $0x690] sm:$0xff] }
 0x18c   :  { %v1591_v35 = vsel %vm975_vm0, %v700_v21, 0.0  ;;  %v228_v21 = vld [vmem:[%s11207_s0 + $0x6a8] sm:$0xff] }
 0x18d   :  { %1568 = vadd.xlane.f32.xlu1 %v1567_v27  ;;  %1565 = vadd.xlane.f32.xlu0 %v1564_v28  ;;  %v4041_v37 = vsel %vm3485_vm14, %v4040_v33, %v4036_v31  ;;  %v221_v28 = vld [vmem:[%s11207_s0 + $0x670] sm:$0xff]  ;;  %v702_v31 = vmax.f32 %v222_v24, 0.0 }
 0x18e   :  { %v1365_v38 = vpop.xlane.xlu1 %1364  ;;  %v1362_v44 = vpop.xlane.xlu0 %1361  ;;  %v8475_v53 = vsel %vm3492_vm15, %v4045_v26, %v4041_v37  ;;  %v701_v37 = vmax.f32 %v221_v28, 0.0 }
 0x18f   :  { %v4054_v55 = vrot.slane %v1365_v38, %v7652_v41  ;;  %v4050_v56 = vrot.slane %v1362_v44, %v7646_v39  ;;  %v1597_v52 = vsel %vm975_vm0, %v702_v31, 0.0 }
 0x191   :  { %v4055_v59 = vsel %vm3394_vm1, %v4054_v55, %v4050_v56  ;;  %1574 = vadd.xlane.f32.xlu1 %v1573_v36  ;;  %1571 = vadd.xlane.f32.xlu0 %v1570_v45  ;;  %v1588_v36 = vsel %vm975_vm0, %v699_v23, 0.0  ;;  %v224_v45 = vld [vmem:[%s11207_s0 + $0x688] sm:$0xff]  ;;  %v227_v23 = vld [vmem:[%s11207_s0 + $0x6a0] sm:$0xff] }
 0x192   :  { %v1371_v63 = vpop.xlane.xlu1 %1370  ;;  %v1368_v0 = vpop.xlane.xlu0 %1367  ;;  %v704_v62 = vmax.f32 %v224_v45, 0.0 }
 0x193   :  { %v4064_v8 = vrot.slane %v1371_v63, %v7649_v40  ;;  %v4059_v9 = vrot.slane %v1368_v0, %v7656_v43  ;;  %v703_v63 = vmax.f32 %v223_v46, 0.0  ;;  %v226_v0 = vld [vmem:[%s11207_s0 + $0x698] sm:$0xff] }
 0x195   :  { %v4060_v12 = vsel %vm3401_vm2, %v4059_v9, %v4055_v59  ;;  %1580 = vadd.xlane.f32.xlu1 %v1579_v1  ;;  %1577 = vadd.xlane.f32.xlu0 %v1576_v3  ;;  %v1594_v59 = vsel %vm975_vm0, %v701_v37, 0.0  ;;  %v706_v9 = vmax.f32 %v226_v0, 0.0  ;;  %v229_v37 = vld [vmem:[%s11207_s0 + $0x6b0] sm:$0xff] }
 0x196   :  { %v1377_v14 = vpop.xlane.xlu1 %1376  ;;  %v4065_v15 = vsel %vm3408_vm3, %v4064_v8, %v4060_v12  ;;  %v1374_v17 = vpop.xlane.xlu0 %1373 }
 0x197   :  { %v4074_v25 = vrot.slane %v1377_v14, %v7664_v51  ;;  %v4069_v27 = vrot.slane %v1374_v17, %v7675_v58  ;;  %v1600_v14 = vsel %vm975_vm0, %v703_v63, 0.0  ;;  %v231_v63 = vld [vmem:[%s11207_s0 + $0x6c0] sm:$0xff] }
 0x199   :  { %v4070_v30 = vsel %vm3415_vm4, %v4069_v27, %v4065_v15  ;;  %1586 = vadd.xlane.f32.xlu1 %v1585_v13  ;;  %1583 = vadd.xlane.f32.xlu0 %v1582_v18  ;;  %v1603_v13 = vsel %vm975_vm0, %v704_v62, 0.0  ;;  %v705_v15 = vmax.f32 %v225_v6, 0.0  ;;  %v232_v62 = vld [vmem:[%s11207_s0 + $0x6c8] sm:$0xff] }
 0x19a   :  { %v1383_v26 = vpop.xlane.xlu1 %1382  ;;  %v4075_v33 = vsel %vm3422_vm5, %v4074_v25, %v4070_v30  ;;  %v1380_v34 = vpop.xlane.xlu0 %1379  ;;  %v1609_v25 = vsel %vm975_vm0, %v706_v9, 0.0  ;;  %v712_v9 = vmax.f32 %v232_v62, 0.0 }
 0x19b   :  { %v4084_v38 = vrot.slane %v1383_v26, %v7683_v4  ;;  %v4079_v44 = vrot.slane %v1380_v34, %v7686_v5  ;;  %v1606_v31 = vsel %vm975_vm0, %v705_v15, 0.0  ;;  %v708_v26 = vmax.f32 %v228_v21, 0.0  ;;  %v230_v34 = vld [vmem:[%s11207_s0 + $0x6b8] sm:$0xff]  ;;  %v233_v15 = vld [vmem:[%s11207_s0 + $0x6d0] sm:$0xff] }
 0x19d   :  { %v4080_v49 = vsel %vm3429_vm6, %v4079_v44, %v4075_v33  ;;  %1592 = vadd.xlane.f32.xlu1 %v1591_v35  ;;  %1589 = vadd.xlane.f32.xlu0 %v1588_v36  ;;  %v707_v33 = vmax.f32 %v227_v23, 0.0  ;;  %v710_v44 = vmax.f32 %v230_v34, 0.0 }
 0x19e   :  { %v1389_v55 = vpop.xlane.xlu1 %1388  ;;  %v4085_v56 = vsel %vm11215_vm7, %v4084_v38, %v4080_v49  ;;  %v1386_v57 = vpop.xlane.xlu0 %1385 }
 0x19f   :  { %v4094_v1 = vrot.slane %v1389_v55, %v7707_v22  ;;  %v4089_v3 = vrot.slane %v1386_v57, %v7716_v29  ;;  %v1612_v55 = vsel %vm975_vm0, %v707_v33, 0.0 }
 0x1a1   :  { %v4090_v8 = vsel %vm11214_vm8, %v4089_v3, %v4085_v56  ;;  %1598 = vadd.xlane.f32.xlu1 %v1597_v52  ;;  %1595 = vadd.xlane.f32.xlu0 %v1594_v59  ;;  %v1615_v52 = vsel %vm975_vm0, %v708_v26, 0.0  ;;  %v709_v56 = vmax.f32 %v229_v37, 0.0  ;;  %v235_v26 = vld [vmem:[%s11207_s0 + $0x6e0] sm:$0xff] }
 0x1a2   :  { %v1395_v10 = vpop.xlane.xlu1 %1394  ;;  %v4095_v11 = vsel %vm11213_vm9, %v4094_v1, %v4090_v8  ;;  %v1392_v12 = vpop.xlane.xlu0 %1391  ;;  %v1621_v1 = vsel %vm975_vm0, %v710_v44, 0.0 }
 0x1a3   :  { %v4104_v17 = vrot.slane %v1395_v10, %v7724_v42  ;;  %v4099_v18 = vrot.slane %v1392_v12, %v7733_v48  ;;  %v1618_v8 = vsel %vm975_vm0, %v709_v56, 0.0  ;;  %v711_v10 = vmax.f32 %v231_v63, 0.0 }
 0x1a5   :  { %v4100_v24 = vsel %vm11212_vm10, %v4099_v18, %v4095_v11  ;;  %1604 = vadd.xlane.f32.xlu1 %v1603_v13  ;;  %1601 = vadd.xlane.f32.xlu0 %v1600_v14  ;;  %v234_v11 = vld [vmem:[%s11207_s0 + $0x6d8] sm:$0xff] }
 0x1a6   :  { %v1401_v27 = vpop.xlane.xlu1 %1400  ;;  %v4105_v28 = vsel %vm3464_vm11, %v4104_v17, %v4100_v24  ;;  %v1398_v30 = vpop.xlane.xlu0 %1397  ;;  %v714_v18 = vmax.f32 %v234_v11, 0.0  ;;  %v1627_v24 = vsel %vm975_vm0, %v712_v9, 0.0  ;;  %v240_v9 = vld [vmem:[%s11207_s0 + $0x708] sm:$0xff] }
 0x1a7   :  { %v4114_v35 = vrot.slane %v1401_v27, %v7744_v60  ;;  %v4109_v36 = vrot.slane %v1398_v30, %v7753_v2  ;;  %v713_v27 = vmax.f32 %v233_v15, 0.0 }
 0x1a8   :  { %v1633_v34 = vsel %vm975_vm0, %v714_v18, 0.0 }
 0x1a9   :  { %v4110_v38 = vsel %vm11211_vm12, %v4109_v36, %v4105_v28  ;;  %1610 = vadd.xlane.f32.xlu1 %v1609_v25  ;;  %1607 = vadd.xlane.f32.xlu0 %v1606_v31  ;;  %v1624_v25 = vsel %vm975_vm0, %v711_v10, 0.0  ;;  %v236_v31 = vld [vmem:[%s11207_s0 + $0x6e8] sm:$0xff]  ;;  %v239_v10 = vld [vmem:[%s11207_s0 + $0x700] sm:$0xff] }
 0x1aa   :  { %v1407_v45 = vpop.xlane.xlu1 %1406  ;;  %v4115_v46 = vsel %vm3478_vm13, %v4114_v35, %v4110_v38  ;;  %v1404_v49 = vpop.xlane.xlu0 %1403  ;;  %v1630_v38 = vsel %vm975_vm0, %v713_v27, 0.0  ;;  %v716_v44 = vmax.f32 %v236_v31, 0.0 }
 0x1ab   :  { %v4124_v57 = vrot.slane %v1407_v45, %v7764_v19  ;;  %v4119_v59 = vrot.slane %v1404_v49, %v7775_v20  ;;  %v715_v45 = vmax.f32 %v235_v26, 0.0 }
 0x1ad   :  { %v4120_v0 = vsel %vm3485_vm14, %v4119_v59, %v4115_v46  ;;  %1616 = vadd.xlane.f32.xlu1 %v1615_v52  ;;  %1613 = vadd.xlane.f32.xlu0 %v1612_v55  ;;  %v238_v46 = vld [vmem:[%s11207_s0 + $0x6f8] sm:$0xff]  ;;  %v237_v55 = vld [vmem:[%s11207_s0 + $0x6f0] sm:$0xff] }
 0x1ae   :  { %v1413_v3 = vpop.xlane.xlu1 %1412  ;;  %v1410_v6 = vpop.xlane.xlu0 %1409  ;;  %v8572_v12 = vsel %vm3492_vm15, %v4124_v57, %v4120_v0  ;;  %v718_v57 = vmax.f32 %v238_v46, 0.0  ;;  %v1639_v0 = vsel %vm975_vm0, %v716_v44, 0.0  ;;  %v243_v46 = vld [vmem:[%s11207_s0 + $0x720] sm:$0xff] }
 0x1af   :  { %11216 = vst [vmem:[#allocation5_spill] sm:$0xff] %v8572_v12  ;;  %v4133_v13 = vrot.slane %v1413_v3, %v7652_v41  ;;  %v4129_v14 = vrot.slane %v1410_v6, %v7646_v39  ;;  %v717_v3 = vmax.f32 %v237_v55, 0.0 }
 0x1b1   :  { %v4134_v17 = vsel %vm3394_vm1, %v4133_v13, %v4129_v14  ;;  %1622 = vadd.xlane.f32.xlu1 %v1621_v1  ;;  %1619 = vadd.xlane.f32.xlu0 %v1618_v8  ;;  %v1636_v1 = vsel %vm975_vm0, %v715_v45, 0.0  ;;  %v1645_v13 = vsel %vm975_vm0, %v718_v57, 0.0  ;;  %v1642_v18 = vsel %vm975_vm0, %v717_v3, 0.0  ;;  %v244_v45 = vld [vmem:[%s11207_s0 + $0x728] sm:$0xff] }
 0x1b2   :  { %v1419_v21 = vpop.xlane.xlu1 %1418  ;;  %v1416_v23 = vpop.xlane.xlu0 %1415 }
 0x1b3   :  { %v4143_v28 = vrot.slane %v1419_v21, %v7649_v40  ;;  %v4138_v30 = vrot.slane %v1416_v23, %v7656_v43  ;;  %v720_v21 = vmax.f32 %v240_v9, 0.0  ;;  %v719_v23 = vmax.f32 %v239_v10, 0.0 }
 0x1b5   :  { %v4139_v33 = vsel %vm3401_vm2, %v4138_v30, %v4134_v17  ;;  %1628 = vadd.xlane.f32.xlu1 %v1627_v24  ;;  %1625 = vadd.xlane.f32.xlu0 %v1624_v25  ;;  %v242_v24 = vld [vmem:[%s11207_s0 + $0x718] sm:$0xff] }
 0x1b6   :  { %v1425_v35 = vpop.xlane.xlu1 %1424  ;;  %v4144_v36 = vsel %vm3408_vm3, %v4143_v28, %v4139_v33  ;;  %v1422_v37 = vpop.xlane.xlu0 %1421  ;;  %v241_v28 = vld [vmem:[%s11207_s0 + $0x710] sm:$0xff]  ;;  %v722_v31 = vmax.f32 %v242_v24, 0.0  ;;  %v247_v24 = vld [vmem:[%s11207_s0 + $0x740] sm:$0xff] }
 0x1b7   :  { %v4153_v49 = vrot.slane %v1425_v35, %v7664_v51  ;;  %v4148_v52 = vrot.slane %v1422_v37, %v7675_v58  ;;  %v1651_v35 = vsel %vm975_vm0, %v720_v21, 0.0  ;;  %v721_v37 = vmax.f32 %v241_v28, 0.0 }
 0x1b9   :  { %v4149_v56 = vsel %vm3415_vm4, %v4148_v52, %v4144_v36  ;;  %1634 = vadd.xlane.f32.xlu1 %v1633_v34  ;;  %1631 = vadd.xlane.f32.xlu0 %v1630_v38  ;;  %v1648_v36 = vsel %vm975_vm0, %v719_v23, 0.0  ;;  %v1657_v52 = vsel %vm975_vm0, %v722_v31, 0.0  ;;  %v248_v23 = vld [vmem:[%s11207_s0 + $0x748] sm:$0xff] }
 0x1ba   :  { %v1431_v59 = vpop.xlane.xlu1 %1430  ;;  %v4154_v62 = vsel %vm3422_vm5, %v4153_v49, %v4149_v56  ;;  %v1428_v63 = vpop.xlane.xlu0 %1427 }
 0x1bb   :  { %v4163_v6 = vrot.slane %v1431_v59, %v7683_v4  ;;  %v4158_v8 = vrot.slane %v1428_v63, %v7686_v5  ;;  %v1654_v59 = vsel %vm975_vm0, %v721_v37, 0.0  ;;  %v723_v63 = vmax.f32 %v243_v46, 0.0 }
 0x1bd   :  { %v4159_v11 = vsel %vm3429_vm6, %v4158_v8, %v4154_v62  ;;  %1640 = vadd.xlane.f32.xlu1 %v1639_v0  ;;  %1637 = vadd.xlane.f32.xlu0 %v1636_v1  ;;  %v724_v62 = vmax.f32 %v244_v45, 0.0  ;;  %v246_v0 = vld [vmem:[%s11207_s0 + $0x738] sm:$0xff] }
 0x1be   :  { %v1437_v14 = vpop.xlane.xlu1 %1436  ;;  %v4164_v15 = vsel %vm11215_vm7, %v4163_v6, %v4159_v11  ;;  %v1434_v17 = vpop.xlane.xlu0 %1433  ;;  %v245_v6 = vld [vmem:[%s11207_s0 + $0x730] sm:$0xff]  ;;  %v726_v9 = vmax.f32 %v246_v0, 0.0 }
 0x1bf   :  { %v4173_v25 = vrot.slane %v1437_v14, %v7707_v22  ;;  %v4168_v27 = vrot.slane %v1434_v17, %v7716_v29  ;;  %v1660_v14 = vsel %vm975_vm0, %v723_v63, 0.0  ;;  %v251_v63 = vld [vmem:[%s11207_s0 + $0x760] sm:$0xff] }
 0x1c1   :  { %v4169_v30 = vsel %vm11214_vm8, %v4168_v27, %v4164_v15  ;;  %1646 = vadd.xlane.f32.xlu1 %v1645_v13  ;;  %1643 = vadd.xlane.f32.xlu0 %v1642_v18  ;;  %v1663_v13 = vsel %vm975_vm0, %v724_v62, 0.0  ;;  %v725_v15 = vmax.f32 %v245_v6, 0.0  ;;  %v252_v62 = vld [vmem:[%s11207_s0 + $0x768] sm:$0xff] }
 0x1c2   :  { %v1443_v26 = vpop.xlane.xlu1 %1442  ;;  %v4174_v33 = vsel %vm11213_vm9, %v4173_v25, %v4169_v30  ;;  %v1440_v34 = vpop.xlane.xlu0 %1439  ;;  %v1669_v25 = vsel %vm975_vm0, %v726_v9, 0.0 }
 0x1c3   :  { %v4183_v38 = vrot.slane %v1443_v26, %v7724_v42  ;;  %v4178_v44 = vrot.slane %v1440_v34, %v7733_v48  ;;  %v1666_v31 = vsel %vm975_vm0, %v725_v15, 0.0  ;;  %v728_v26 = vmax.f32 %v248_v23, 0.0  ;;  %v250_v34 = vld [vmem:[%s11207_s0 + $0x758] sm:$0xff] }
 0x1c4   :  { %v730_v45 = vmax.f32 %v250_v34, 0.0  ;;  %v255_v34 = vld [vmem:[%s11207_s0 + $0x780] sm:$0xff] }
 0x1c5   :  { %v4179_v49 = vsel %vm11212_vm10, %v4178_v44, %v4174_v33  ;;  %1652 = vadd.xlane.f32.xlu1 %v1651_v35  ;;  %1649 = vadd.xlane.f32.xlu0 %v1648_v36  ;;  %v727_v33 = vmax.f32 %v247_v24, 0.0 }
 0x1c6   :  { %v1449_v55 = vpop.xlane.xlu1 %1448  ;;  %v4184_v56 = vsel %vm3464_vm11, %v4183_v38, %v4179_v49  ;;  %v1446_v57 = vpop.xlane.xlu0 %1445  ;;  %v249_v38 = vld [vmem:[%s11207_s0 + $0x750] sm:$0xff] }
 0x1c7   :  { %v4193_v1 = vrot.slane %v1449_v55, %v7744_v60  ;;  %v4188_v3 = vrot.slane %v1446_v57, %v7753_v2  ;;  %v1672_v55 = vsel %vm975_vm0, %v727_v33, 0.0  ;;  %v256_v33 = vld [vmem:[%s11207_s0 + $0x788] sm:$0xff] }
 0x1c9   :  { %v4189_v8 = vsel %vm11211_vm12, %v4188_v3, %v4184_v56  ;;  %1658 = vadd.xlane.f32.xlu1 %v1657_v52  ;;  %1655 = vadd.xlane.f32.xlu0 %v1654_v59  ;;  %v1675_v52 = vsel %vm975_vm0, %v728_v26, 0.0  ;;  %v729_v56 = vmax.f32 %v249_v38, 0.0 }
 0x1ca   :  { %v1455_v10 = vpop.xlane.xlu1 %1454  ;;  %v1452_v11 = vpop.xlane.xlu0 %1451  ;;  %v4194_v17 = vsel %vm3478_vm13, %v4193_v1, %v4189_v8  ;;  %v1681_v1 = vsel %vm975_vm0, %v730_v45, 0.0 }
 0x1cb   :  { %v4203_v18 = vrot.slane %v1455_v10, %v7764_v19  ;;  %v4198_v21 = vrot.slane %v1452_v11, %v7775_v20  ;;  %v1678_v9 = vsel %vm975_vm0, %v729_v56, 0.0  ;;  %v732_v10 = vmax.f32 %v252_v62, 0.0 }
 0x1cc   :  { %v731_v11 = vmax.f32 %v251_v63, 0.0 }
 0x1cd   :  { %1664 = vadd.xlane.f32.xlu1 %v1663_v13  ;;  %1661 = vadd.xlane.f32.xlu0 %v1660_v14  ;;  %v4199_v27 = vsel %vm3485_vm14, %v4198_v21, %v4194_v17  ;;  %v254_v13 = vld [vmem:[%s11207_s0 + $0x778] sm:$0xff]  ;;  %v253_v17 = vld [vmem:[%s11207_s0 + $0x770] sm:$0xff] }
 0x1ce   :  { %v1461_v28 = vpop.xlane.xlu1 %1460  ;;  %v1458_v30 = vpop.xlane.xlu0 %1457  ;;  %v8669_v35 = vsel %vm3492_vm15, %v4203_v18, %v4199_v27  ;;  %v734_v21 = vmax.f32 %v254_v13, 0.0  ;;  %v1687_v27 = vsel %vm975_vm0, %v732_v10, 0.0  ;;  %v260_v13 = vld [vmem:[%s11207_s0 + $0x7a8] sm:$0xff] }
 0x1cf   :  { %11217 = vst [vmem:[#allocation6_spill] sm:$0xff] %v8669_v35  ;;  %v4212_v36 = vrot.slane %v1461_v28, %v7652_v41  ;;  %v4208_v37 = vrot.slane %v1458_v30, %v7646_v39  ;;  %v1684_v28 = vsel %vm975_vm0, %v731_v11, 0.0  ;;  %v733_v30 = vmax.f32 %v253_v17, 0.0 }
 0x1d1   :  { %v4213_v44 = vsel %vm3394_vm1, %v4212_v36, %v4208_v37  ;;  %1670 = vadd.xlane.f32.xlu1 %v1669_v25  ;;  %1667 = vadd.xlane.f32.xlu0 %v1666_v31  ;;  %v1693_v37 = vsel %vm975_vm0, %v734_v21, 0.0 }
 0x1d2   :  { %v1467_v46 = vpop.xlane.xlu1 %1466  ;;  %v1464_v49 = vpop.xlane.xlu0 %1463 }
 0x1d3   :  { %v4222_v57 = vrot.slane %v1467_v46, %v7649_v40  ;;  %v4217_v59 = vrot.slane %v1464_v49, %v7656_v43  ;;  %v1690_v46 = vsel %vm975_vm0, %v733_v30, 0.0  ;;  %v736_v49 = vmax.f32 %v256_v33, 0.0 }
 0x1d5   :  { %v4218_v0 = vsel %vm3401_vm2, %v4217_v59, %v4213_v44  ;;  %1676 = vadd.xlane.f32.xlu1 %v1675_v52  ;;  %1673 = vadd.xlane.f32.xlu0 %v1672_v55  ;;  %v735_v52 = vmax.f32 %v255_v34, 0.0  ;;  %v258_v55 = vld [vmem:[%s11207_s0 + $0x798] sm:$0xff]  ;;  %v257_v59 = vld [vmem:[%s11207_s0 + $0x790] sm:$0xff] }
 0x1d6   :  { %v1473_v3 = vpop.xlane.xlu1 %1472  ;;  %v4223_v6 = vsel %vm3408_vm3, %v4222_v57, %v4218_v0  ;;  %v1470_v8 = vpop.xlane.xlu0 %1469  ;;  %v738_v63 = vmax.f32 %v258_v55, 0.0  ;;  %v264_v55 = vld [vmem:[%s11207_s0 + $0x7c8] sm:$0xff] }
 0x1d7   :  { %v4232_v14 = vrot.slane %v1473_v3, %v7664_v51  ;;  %v4227_v15 = vrot.slane %v1470_v8, %v7675_v58  ;;  %v1696_v8 = vsel %vm975_vm0, %v735_v52, 0.0 }
 0x1d8   :  { %v1705_v17 = vsel %vm975_vm0, %v738_v63, 0.0 }
 0x1d9   :  { %v4228_v18 = vsel %vm3415_vm4, %v4227_v15, %v4223_v6  ;;  %1682 = vadd.xlane.f32.xlu1 %v1681_v1  ;;  %1679 = vadd.xlane.f32.xlu0 %v1678_v9  ;;  %v1699_v6 = vsel %vm975_vm0, %v736_v49, 0.0  ;;  %v737_v9 = vmax.f32 %v257_v59, 0.0 }
 0x1da   :  { %v1479_v23 = vpop.xlane.xlu1 %1478  ;;  %v4233_v24 = vsel %vm3422_vm5, %v4232_v14, %v4228_v18  ;;  %v1476_v25 = vpop.xlane.xlu0 %1475  ;;  %v259_v14 = vld [vmem:[%s11207_s0 + $0x7a0] sm:$0xff] }
 0x1db   :  { %v4242_v31 = vrot.slane %v1479_v23, %v7683_v4  ;;  %v4237_v26 = vrot.slane %v1476_v25, %v7686_v5  ;;  %v740_v25 = vmax.f32 %v260_v13, 0.0 }
 0x1dd   :  { %v4238_v36 = vsel %vm3429_vm6, %v4237_v26, %v4233_v24  ;;  %1688 = vadd.xlane.f32.xlu1 %v1687_v27  ;;  %1685 = vadd.xlane.f32.xlu0 %v1684_v28  ;;  %v1702_v24 = vsel %vm975_vm0, %v737_v9, 0.0  ;;  %v739_v27 = vmax.f32 %v259_v14, 0.0  ;;  %v262_v28 = vld [vmem:[%s11207_s0 + $0x7b8] sm:$0xff]  ;;  %v261_v26 = vld [vmem:[%s11207_s0 + $0x7b0] sm:$0xff] }
 0x1de   :  { %v1485_v38 = vpop.xlane.xlu1 %1484  ;;  %v4243_v44 = vsel %vm11215_vm7, %v4242_v31, %v4238_v36  ;;  %v1482_v45 = vpop.xlane.xlu0 %1481  ;;  %v742_v34 = vmax.f32 %v262_v28, 0.0  ;;  %v267_v28 = vld [vmem:[%s11207_s0 + $0x7e0] sm:$0xff] }
 0x1df   :  { %v4252_v56 = vrot.slane %v1485_v38, %v7707_v22  ;;  %v4247_v57 = vrot.slane %v1482_v45, %v7716_v29  ;;  %v1708_v45 = vsel %vm975_vm0, %v739_v27, 0.0  ;;  %v268_v27 = vld [vmem:[%s11207_s0 + $0x7e8] sm:$0xff] }
 0x1e0   :  { %v1717_v59 = vsel %vm975_vm0, %v742_v34, 0.0 }
 0x1e1   :  { %v4248_v62 = vsel %vm11214_vm8, %v4247_v57, %v4243_v44  ;;  %1694 = vadd.xlane.f32.xlu1 %v1693_v37  ;;  %1691 = vadd.xlane.f32.xlu0 %v1690_v46  ;;  %v1711_v44 = vsel %vm975_vm0, %v740_v25, 0.0  ;;  %v741_v46 = vmax.f32 %v261_v26, 0.0 }
 0x1e2   :  { %v1491_v0 = vpop.xlane.xlu1 %1490  ;;  %v4253_v1 = vsel %vm11213_vm9, %v4252_v56, %v4248_v62  ;;  %v1488_v3 = vpop.xlane.xlu0 %1487  ;;  %v263_v56 = vld [vmem:[%s11207_s0 + $0x7c0] sm:$0xff] }
 0x1e3   :  { %v4262_v10 = vrot.slane %v1491_v0, %v7724_v42  ;;  %v4257_v11 = vrot.slane %v1488_v3, %v7733_v48  ;;  %v1714_v0 = vsel %vm975_vm0, %v741_v46, 0.0  ;;  %v743_v3 = vmax.f32 %v263_v56, 0.0 }
 0x1e5   :  { %v4258_v15 = vsel %vm11212_vm10, %v4257_v11, %v4253_v1  ;;  %1700 = vadd.xlane.f32.xlu1 %v1699_v6  ;;  %1697 = vadd.xlane.f32.xlu0 %v1696_v8  ;;  %v744_v1 = vmax.f32 %v264_v55, 0.0  ;;  %v266_v6 = vld [vmem:[%s11207_s0 + $0x7d8] sm:$0xff]  ;;  %v265_v11 = vld [vmem:[%s11207_s0 + $0x7d0] sm:$0xff] }
 0x1e6   :  { %v1497_v18 = vpop.xlane.xlu1 %1496  ;;  %v4263_v21 = vsel %vm3464_vm11, %v4262_v10, %v4258_v15  ;;  %v1494_v23 = vpop.xlane.xlu0 %1493  ;;  %v746_v14 = vmax.f32 %v266_v6, 0.0  ;;  %v272_v6 = vld [vmem:[%s11207_s0 + $0x808] sm:$0xff] }
 0x1e7   :  { %v4272_v30 = vrot.slane %v1497_v18, %v7744_v60  ;;  %v4267_v31 = vrot.slane %v1494_v23, %v7753_v2  ;;  %v1723_v18 = vsel %vm975_vm0, %v744_v1, 0.0  ;;  %v745_v23 = vmax.f32 %v265_v11, 0.0 }
 0x1e9   :  { %v4268_v33 = vsel %vm11211_vm12, %v4267_v31, %v4263_v21  ;;  %1706 = vadd.xlane.f32.xlu1 %v1705_v17  ;;  %1703 = vadd.xlane.f32.xlu0 %v1702_v24  ;;  %v1720_v21 = vsel %vm975_vm0, %v743_v3, 0.0  ;;  %v1729_v31 = vsel %vm975_vm0, %v746_v14, 0.0 }
 0x1ea   :  { %v1503_v36 = vpop.xlane.xlu1 %1502  ;;  %v4273_v37 = vsel %vm3478_vm13, %v4272_v30, %v4268_v33  ;;  %v1500_v38 = vpop.xlane.xlu0 %1499 }
 0x1eb   :  { %v4282_v49 = vrot.slane %v1503_v36, %v7764_v19  ;;  %v4277_v52 = vrot.slane %v1500_v38, %v7775_v20  ;;  %v1726_v36 = vsel %vm975_vm0, %v745_v23, 0.0  ;;  %v747_v38 = vmax.f32 %v267_v28, 0.0  ;;  %v274_v23 = vld [vmem:[%s11207_s0 + $0x818] sm:$0xff] }
 0x1ed   :  { %v4278_v57 = vsel %vm3485_vm14, %v4277_v52, %v4273_v37  ;;  %1712 = vadd.xlane.f32.xlu1 %v1711_v44  ;;  %1709 = vadd.xlane.f32.xlu0 %v1708_v45  ;;  %v748_v37 = vmax.f32 %v268_v27, 0.0  ;;  %v270_v44 = vld [vmem:[%s11207_s0 + $0x7f8] sm:$0xff]  ;;  %v273_v27 = vld [vmem:[%s11207_s0 + $0x810] sm:$0xff] }
 0x1ee   :  { %v1509_v62 = vpop.xlane.xlu1 %1508  ;;  %v1506_v63 = vpop.xlane.xlu0 %1505  ;;  %v8766_v8 = vsel %vm3492_vm15, %v4282_v49, %v4278_v57  ;;  %v269_v49 = vld [vmem:[%s11207_s0 + $0x7f0] sm:$0xff]  ;;  %v750_v55 = vmax.f32 %v270_v44, 0.0 }
 0x1ef   :  { %11218 = vst [vmem:[#allocation7_spill] sm:$0xff] %v8766_v8  ;;  %v4291_v9 = vrot.slane %v1509_v62, %v7652_v41  ;;  %v4287_v10 = vrot.slane %v1506_v63, %v7646_v39  ;;  %v1735_v62 = vsel %vm975_vm0, %v748_v37, 0.0  ;;  %v1732_v63 = vsel %vm975_vm0, %v747_v38, 0.0 }
 0x1f0   :  { %v1741_v11 = vsel %vm975_vm0, %v750_v55, 0.0  ;;  %v753_v37 = vmax.f32 %v273_v27, 0.0 }
 0x1f1   :  { %v4292_v13 = vsel %vm3394_vm1, %v4291_v9, %v4287_v10  ;;  %1718 = vadd.xlane.f32.xlu1 %v1717_v59  ;;  %1715 = vadd.xlane.f32.xlu0 %v1714_v0  ;;  %v749_v0 = vmax.f32 %v269_v49, 0.0  ;;  %v271_v9 = vld [vmem:[%s11207_s0 + $0x800] sm:$0xff] }
 0x1f2   :  { %v1515_v15 = vpop.xlane.xlu1 %1514  ;;  %v1512_v17 = vpop.xlane.xlu0 %1511 }
 0x1f3   :  { %v4301_v24 = vrot.slane %v1515_v15, %v7649_v40  ;;  %v4296_v25 = vrot.slane %v1512_v17, %v7656_v43  ;;  %v1738_v17 = vsel %vm975_vm0, %v749_v0, 0.0  ;;  %v278_v0 = vld [vmem:[%s11207_s0 + $0x838] sm:$0xff] }
 0x1f5   :  { %v4297_v30 = vsel %vm3401_vm2, %v4296_v25, %v4292_v13  ;;  %1724 = vadd.xlane.f32.xlu1 %v1723_v18  ;;  %1721 = vadd.xlane.f32.xlu0 %v1720_v21  ;;  %v752_v18 = vmax.f32 %v272_v6, 0.0  ;;  %v751_v21 = vmax.f32 %v271_v9, 0.0  ;;  %v277_v6 = vld [vmem:[%s11207_s0 + $0x830] sm:$0xff] }
 0x1f6   :  { %v1521_v26 = vpop.xlane.xlu1 %1520  ;;  %v4302_v33 = vsel %vm3408_vm3, %v4301_v24, %v4297_v30  ;;  %v1518_v34 = vpop.xlane.xlu0 %1517  ;;  %v754_v30 = vmax.f32 %v274_v23, 0.0 }
 0x1f7   :  { %v4311_v45 = vrot.slane %v1521_v26, %v7664_v51  ;;  %v4306_v46 = vrot.slane %v1518_v34, %v7675_v58  ;;  %v1747_v34 = vsel %vm975_vm0, %v752_v18, 0.0 }
 0x1f9   :  { %v4307_v52 = vsel %vm3415_vm4, %v4306_v46, %v4302_v33  ;;  %1730 = vadd.xlane.f32.xlu1 %v1729_v31  ;;  %1727 = vadd.xlane.f32.xlu0 %v1726_v36  ;;  %v1744_v36 = vsel %vm975_vm0, %v751_v21, 0.0  ;;  %v275_v46 = vld [vmem:[%s11207_s0 + $0x820] sm:$0xff] }
 0x1fa   :  { %v1527_v56 = vpop.xlane.xlu1 %1526  ;;  %v4312_v57 = vsel %vm3422_vm5, %v4311_v45, %v4307_v52  ;;  %v1524_v59 = vpop.xlane.xlu0 %1523  ;;  %v276_v45 = vld [vmem:[%s11207_s0 + $0x828] sm:$0xff]  ;;  %v1753_v52 = vsel %vm975_vm0, %v754_v30, 0.0 }
 0x1fb   :  { %v4321_v1 = vrot.slane %v1527_v56, %v7683_v4  ;;  %v4316_v3 = vrot.slane %v1524_v59, %v7686_v5  ;;  %v1750_v59 = vsel %vm975_vm0, %v753_v37, 0.0  ;;  %v281_v37 = vld [vmem:[%s11207_s0 + $0x850] sm:$0xff] }
 0x1fd   :  { %v4317_v10 = vsel %vm3429_vm6, %v4316_v3, %v4312_v57  ;;  %1736 = vadd.xlane.f32.xlu1 %v1735_v62  ;;  %1733 = vadd.xlane.f32.xlu0 %v1732_v63  ;;  %v756_v62 = vmax.f32 %v276_v45, 0.0  ;;  %v755_v63 = vmax.f32 %v275_v46, 0.0 }
 0x1fe   :  { %v1533_v13 = vpop.xlane.xlu1 %1532  ;;  %v4322_v14 = vsel %vm11215_vm7, %v4321_v1, %v4317_v10  ;;  %v1530_v15 = vpop.xlane.xlu0 %1529  ;;  %v758_v10 = vmax.f32 %v278_v0, 0.0 }
 0x1ff   :  { %v4331_v24 = vrot.slane %v1533_v13, %v7707_v22  ;;  %v4326_v25 = vrot.slane %v1530_v15, %v7716_v29  ;;  %v1756_v15 = vsel %vm975_vm0, %v755_v63, 0.0 }
 0x200   :  { %v1765_v27 = vsel %vm975_vm0, %v758_v10, 0.0 }
 0x201   :  { %v4327_v28 = vsel %vm11214_vm8, %v4326_v25, %v4322_v14  ;;  %1742 = vadd.xlane.f32.xlu1 %v1741_v11  ;;  %1739 = vadd.xlane.f32.xlu0 %v1738_v17  ;;  %v1759_v14 = vsel %vm975_vm0, %v756_v62, 0.0  ;;  %v757_v17 = vmax.f32 %v277_v6, 0.0  ;;  %v279_v25 = vld [vmem:[%s11207_s0 + $0x840] sm:$0xff] }
 0x202   :  { %v1539_v31 = vpop.xlane.xlu1 %1538  ;;  %v4332_v26 = vsel %vm11213_vm9, %v4331_v24, %v4327_v28  ;;  %v1536_v33 = vpop.xlane.xlu0 %1535  ;;  %v280_v24 = vld [vmem:[%s11207_s0 + $0x848] sm:$0xff] }
 0x203   :  { %v4341_v38 = vrot.slane %v1539_v31, %v7724_v42  ;;  %v4336_v44 = vrot.slane %v1536_v33, %v7733_v48  ;;  %v760_v33 = vmax.f32 %v280_v24, 0.0 }
 0x205   :  { %v4337_v49 = vsel %vm11212_vm10, %v4336_v44, %v4332_v26  ;;  %1748 = vadd.xlane.f32.xlu1 %v1747_v34  ;;  %1745 = vadd.xlane.f32.xlu0 %v1744_v36  ;;  %v1762_v26 = vsel %vm975_vm0, %v757_v17, 0.0  ;;  %v759_v34 = vmax.f32 %v279_v25, 0.0  ;;  %v282_v36 = vld [vmem:[%s11207_s0 + $0x858] sm:$0xff]  ;;  %v6877_v17 = vld [vmem:[%s11208_s1 + $0x30] sm:$0xff]  }
 0x206   :  { %v1545_v55 = vpop.xlane.xlu1 %1544  ;;  %v4342_v56 = vsel %vm3464_vm11, %v4341_v38, %v4337_v49  ;;  %v1542_v57 = vpop.xlane.xlu0 %1541  ;;  %v6886_v38 = vld [vmem:[%s11208_s1 + $0x78] sm:$0xff]  }
 0x207   :  { %v4351_v1 = vrot.slane %v1545_v55, %v7744_v60  ;;  %v4346_v3 = vrot.slane %v1542_v57, %v7753_v2  ;;  %v6455_v49 = vunpack.c.h.bf16 %v6886_v38  ;;  %v762_v57 = vmax.f32 %v282_v36, 0.0  ;;  %v6884_v36 = vld [vmem:[%s11208_s1 + $0x68] sm:$0xff]  }
 0x208   :  { %v6454_v62 = vunpack.c.l.bf16 %v6886_v38 }
 0x209   :  { %v4347_v9 = vsel %vm11211_vm12, %v4346_v3, %v4342_v56  ;;  %1754 = vadd.xlane.f32.xlu1 %v1753_v52  ;;  %1751 = vadd.xlane.f32.xlu0 %v1750_v59  ;;  %v6878_v52 = vld [vmem:[%s11208_s1 + $0x38] sm:$0xff]   ;;  %v761_v59 = vmax.f32 %v281_v37, 0.0  ;;  %v1768_v3 = vsel %vm975_vm0, %v759_v34, 0.0 }
 0x20a   :  { %v1551_v11 = vpop.xlane.xlu1 %1550  ;;  %v1548_v13 = vpop.xlane.xlu0 %1547  ;;  %v4352_v18 = vsel %vm3478_vm13, %v4351_v1, %v4347_v9  ;;  %v6423_v55 = vunpack.c.h.bf16 %v6878_v52  ;;  %v1771_v1 = vsel %vm975_vm0, %v760_v33, 0.0  ;;  %6991 = vmatprep.subr.mxu0 %v6455_v49  ;;  %v6422_v6 = vunpack.c.l.bf16 %v6878_v52  ;;  %v6885_v9 = vld [vmem:[%s11208_s1 + $0x70] sm:$0xff]  }
 0x20b   :  { %v4361_v21 = vrot.slane %v1551_v11, %v7764_v19  ;;  %v4356_v23 = vrot.slane %v1548_v13, %v7775_v20  ;;  %v284_v13 = vld [vmem:[%s11207_s0 + $0x868] sm:$0xff]  ;;  %v1774_v24 = vsel %vm975_vm0, %v761_v59, 0.0  ;;  %v285_v33 = vld [vmem:[%s11207_s0 + $0x870] sm:$0xff]  ;;  %v6450_v34 = vunpack.c.l.bf16 %v6885_v9 }
 0x20c   :  { %6992 = vmatpush3.msra.mxu0 %v6423_v55  ;;  %v6447_v49 = vunpack.c.h.bf16 %v6884_v36 }
 0x20d   :  { %1760 = vadd.xlane.f32.xlu1 %v1759_v14  ;;  %1757 = vadd.xlane.f32.xlu0 %v1756_v15  ;;  %v4357_v28 = vsel %vm3485_vm14, %v4356_v23, %v4352_v18  ;;  %v283_v14 = vld [vmem:[%s11207_s0 + $0x860] sm:$0xff]  ;;  %v6451_v15 = vunpack.c.h.bf16 %v6885_v9  ;;  %v6419_v18 = vunpack.c.h.bf16 %v6877_v17  ;;  %v1777_v23 = vsel %vm975_vm0, %v762_v57, 0.0  ;;  %v288_v9 = vld [vmem:[%s11207_s0 + $0x888] sm:$0xff] }
 0x20e   :  { %v1557_v30 = vpop.xlane.xlu1 %1556  ;;  %v1554_v31 = vpop.xlane.xlu0 %1553  ;;  %v8869_v44 = vsel %vm3492_vm15, %v4361_v21, %v4357_v28  ;;  %6993 = vmatprep.subr.mxu0 %v6454_v62 }
 0x20f   :  { %11219 = vst [vmem:[#allocation8_spill] sm:$0xff] %v8869_v44  ;;  %v4370_v45 = vrot.slane %v1557_v30, %v7652_v41  ;;  %v4366_v46 = vrot.slane %v1554_v31, %v7646_v39  ;;  %v764_v30 = vmax.f32 %v284_v13, 0.0  ;;  %v763_v31 = vmax.f32 %v283_v14, 0.0  ;;  %6994 = vmatpush3.msra.mxu0 %v6422_v6  ;;  %v6883_v13 = vld [vmem:[%s11208_s1 + $0x60] sm:$0xff]  }
 0x210   :  { %6995 = vmatprep.subr.mxu0 %v6451_v15  ;;  %v6875_v15 = vld [vmem:[%s11208_s1 + $0x20] sm:$0xff]  }
 0x211   :  { %v4371_v56 = vsel %vm3394_vm1, %v4370_v45, %v4366_v46  ;;  %1766 = vadd.xlane.f32.xlu1 %v1765_v27  ;;  %1763 = vadd.xlane.f32.xlu0 %v1762_v26  ;;  %v286_v26 = vld [vmem:[%s11207_s0 + $0x878] sm:$0xff]  ;;  %v6418_v45 = vunpack.c.l.bf16 %v6877_v17  ;;  %v6876_v46 = vld [vmem:[%s11208_s1 + $0x28] sm:$0xff]  }
 0x212   :  { %v1563_v63 = vpop.xlane.xlu1 %1562  ;;  %v1560_v0 = vpop.xlane.xlu0 %1559  ;;  %6996 = vmatpush3.msra.mxu0 %v6419_v18  ;;  %v766_v55 = vmax.f32 %v286_v26, 0.0  ;;  %v6414_v14 = vunpack.c.l.bf16 %v6876_v46  ;;  %v6443_v26 = vunpack.c.h.bf16 %v6883_v13 }
 0x213   :  { %v4380_v10 = vrot.slane %v1563_v63, %v7649_v40  ;;  %v4375_v11 = vrot.slane %v1560_v0, %v7656_v43  ;;  %v1783_v63 = vsel %vm975_vm0, %v764_v30, 0.0  ;;  %v1780_v0 = vsel %vm975_vm0, %v763_v31, 0.0  ;;  %6997 = vmatprep.subr.mxu0 %v6450_v34  ;;  %v290_v30 = vld [vmem:[%s11207_s0 + $0x898] sm:$0xff]  ;;  %v289_v31 = vld [vmem:[%s11207_s0 + $0x890] sm:$0xff] }
 0x214   :  { %6998 = vmatpush3.msra.mxu0 %v6418_v45  ;;  %v1789_v18 = vsel %vm975_vm0, %v766_v55, 0.0 }
 0x215   :  { %v4376_v21 = vsel %vm3401_vm2, %v4375_v11, %v4371_v56  ;;  %1772 = vadd.xlane.f32.xlu1 %v1771_v1  ;;  %1769 = vadd.xlane.f32.xlu0 %v1768_v3  ;;  %v765_v56 = vmax.f32 %v285_v33, 0.0  ;;  %v6415_v1 = vunpack.c.h.bf16 %v6876_v46  ;;  %v6446_v11 = vunpack.c.l.bf16 %v6884_v36 }
 0x216   :  { %v1569_v25 = vpop.xlane.xlu1 %1568  ;;  %v4381_v27 = vsel %vm3408_vm3, %v4380_v10, %v4376_v21  ;;  %v1566_v28 = vpop.xlane.xlu0 %1565  ;;  %v287_v10 = vld [vmem:[%s11207_s0 + $0x880] sm:$0xff]  ;;  %6999 = vmatprep.subr.mxu0 %v6447_v49  ;;  %v6411_v36 = vunpack.c.h.bf16 %v6875_v15  ;;  %v770_v46 = vmax.f32 %v290_v30, 0.0  ;;  %v769_v49 = vmax.f32 %v289_v31, 0.0 }
 0x217   :  { %v4390_v37 = vrot.slane %v1569_v25, %v7664_v51  ;;  %v4385_v38 = vrot.slane %v1566_v28, %v7675_v58  ;;  %v1786_v21 = vsel %vm975_vm0, %v765_v56, 0.0  ;;  %v767_v28 = vmax.f32 %v287_v10, 0.0  ;;  %7000 = vmatpush3.msra.mxu0 %v6415_v1 }
 0x218   :  { %7001 = vmatprep.subr.mxu0 %v6446_v11 }
 0x219   :  { %v4386_v52 = vsel %vm3415_vm4, %v4385_v38, %v4381_v27  ;;  %1778 = vadd.xlane.f32.xlu1 %v1777_v23  ;;  %1775 = vadd.xlane.f32.xlu0 %v1774_v24  ;;  %v768_v27 = vmax.f32 %v288_v9, 0.0  ;;  %v6882_v38 = vld [vmem:[%s11208_s1 + $0x58] sm:$0xff]  }
 0x21a   :  { %v1575_v57 = vpop.xlane.xlu1 %1574  ;;  %v4391_v59 = vsel %vm3422_vm5, %v4390_v37, %v4386_v52  ;;  %v1572_v62 = vpop.xlane.xlu0 %1571  ;;  %7002 = vmatpush3.msra.mxu0 %v6414_v14  ;;  %v6442_v37 = vunpack.c.l.bf16 %v6883_v13  ;;  %v6874_v52 = vld [vmem:[%s11208_s1 + $0x18] sm:$0xff]   ;;  %v6439_v9 = vunpack.c.h.bf16 %v6882_v38  ;;  %v1801_v13 = vsel %vm975_vm0, %v770_v46, 0.0 }
 0x21b   :  { %v4400_v3 = vrot.slane %v1575_v57, %v7683_v4  ;;  %v4395_v6 = vrot.slane %v1572_v62, %v7686_v5  ;;  %v1792_v62 = vsel %vm975_vm0, %v767_v28, 0.0  ;;  %7003 = vmatprep.subr.mxu0 %v6443_v26  ;;  %v6407_v10 = vunpack.c.h.bf16 %v6874_v52 }
 0x21c   :  { %7004 = vmatpush3.msra.mxu0 %v6411_v36  ;;  %v1798_v14 = vsel %vm975_vm0, %v769_v49, 0.0  ;;  %v6438_v28 = vunpack.c.l.bf16 %v6882_v38  ;;  %v6406_v26 = vunpack.c.l.bf16 %v6874_v52 }
 0x21d   :  { %v4396_v17 = vsel %vm3429_vm6, %v4395_v6, %v4391_v59  ;;  %1784 = vadd.xlane.f32.xlu1 %v1783_v63  ;;  %1781 = vadd.xlane.f32.xlu0 %v1780_v0  ;;  %v1795_v59 = vsel %vm975_vm0, %v768_v27, 0.0  ;;  %v6410_v63 = vunpack.c.l.bf16 %v6875_v15  ;;  %v291_v6 = vld [vmem:[%s11207_s0 + $0x8a0] sm:$0xff]  ;;  %v6881_v15 = vld [vmem:[%s11208_s1 + $0x50] sm:$0xff]  }
 0x21e   :  { %v1581_v23 = vpop.xlane.xlu1 %1580  ;;  %v4401_v24 = vsel %vm11215_vm7, %v4400_v3, %v4396_v17  ;;  %v1578_v25 = vpop.xlane.xlu0 %1577  ;;  %v292_v3 = vld [vmem:[%s11207_s0 + $0x8a8] sm:$0xff]  ;;  %7005 = vmatprep.subr.mxu0 %v6442_v37  ;;  %v293_v27 = vld [vmem:[%s11207_s0 + $0x8b0] sm:$0xff] }
 0x21f   :  { %v4410_v33 = vrot.slane %v1581_v23, %v7707_v22  ;;  %v4405_v34 = vrot.slane %v1578_v25, %v7716_v29  ;;  %v772_v23 = vmax.f32 %v292_v3, 0.0  ;;  %v294_v25 = vld [vmem:[%s11207_s0 + $0x8b8] sm:$0xff]  ;;  %7006 = vmatpush3.msra.mxu0 %v6410_v63  ;;  %v295_v63 = vld [vmem:[%s11207_s0 + $0x8c0] sm:$0xff] }
 0x220   :  { %7007 = vmatprep.subr.mxu0 %v6439_v9  ;;  %v774_v37 = vmax.f32 %v294_v25, 0.0 }
 0x221   :  { %v4406_v45 = vsel %vm11214_vm8, %v4405_v34, %v4401_v24  ;;  %1790 = vadd.xlane.f32.xlu1 %v1789_v18  ;;  %1787 = vadd.xlane.f32.xlu0 %v1786_v21  ;;  %v771_v24 = vmax.f32 %v291_v6, 0.0  ;;  %v6435_v34 = vunpack.c.h.bf16 %v6881_v15  ;;  %v6872_v6 = vld [vmem:[%s11208_s1 + $0x8] sm:$0xff]  }
 0x222   :  { %v1587_v55 = vpop.xlane.xlu1 %1586  ;;  %v4411_v56 = vsel %vm11213_vm9, %v4410_v33, %v4406_v45  ;;  %v1584_v57 = vpop.xlane.xlu0 %1583  ;;  %v6873_v33 = vld [vmem:[%s11208_s1 + $0x10] sm:$0xff]   ;;  %7008 = vmatpush3.msra.mxu0 %v6407_v10  ;;  %v773_v45 = vmax.f32 %v293_v27, 0.0  ;;  %v1813_v10 = vsel %vm975_vm0, %v774_v37, 0.0 }
 0x223   :  { %v4420_v0 = vrot.slane %v1587_v55, %v7724_v42  ;;  %v4415_v1 = vrot.slane %v1584_v57, %v7733_v48  ;;  %v1807_v55 = vsel %vm975_vm0, %v772_v23, 0.0  ;;  %v1804_v52 = vsel %vm975_vm0, %v771_v24, 0.0  ;;  %7009 = vmatprep.subr.mxu0 %v6438_v28 }
 0x224   :  { %7010 = vmatpush3.msra.mxu0 %v6406_v26  ;;  %v6402_v3 = vunpack.c.l.bf16 %v6873_v33  ;;  %v6399_v28 = vunpack.c.h.bf16 %v6872_v6 }
 0x225   :  { %v4416_v11 = vsel %vm11212_vm10, %v4415_v1, %v4411_v56  ;;  %1796 = vadd.xlane.f32.xlu1 %v1795_v59  ;;  %1793 = vadd.xlane.f32.xlu0 %v1792_v62  ;;  %v6403_v56 = vunpack.c.h.bf16 %v6873_v33  ;;  %v296_v62 = vld [vmem:[%s11207_s0 + $0x8c8] sm:$0xff] }
 0x226   :  { %v1593_v17 = vpop.xlane.xlu1 %1592  ;;  %v4421_v18 = vsel %vm3464_vm11, %v4420_v0, %v4416_v11  ;;  %v1590_v21 = vpop.xlane.xlu0 %1589  ;;  %v6434_v0 = vunpack.c.l.bf16 %v6881_v15  ;;  %v6880_v1 = vld [vmem:[%s11208_s1 + $0x48] sm:$0xff]   ;;  %7011 = vmatprep.subr.mxu0 %v6435_v34  ;;  %v1810_v11 = vsel %vm975_vm0, %v773_v45, 0.0  ;;  %v776_v15 = vmax.f32 %v296_v62, 0.0 }
 0x227   :  { %v4430_v30 = vrot.slane %v1593_v17, %v7744_v60  ;;  %v4425_v31 = vrot.slane %v1590_v21, %v7753_v2  ;;  %v775_v17 = vmax.f32 %v295_v63, 0.0  ;;  %v297_v21 = vld [vmem:[%s11207_s0 + $0x8d0] sm:$0xff]  ;;  %7012 = vmatpush3.msra.mxu0 %v6403_v56  ;;  %v6431_v23 = vunpack.c.h.bf16 %v6880_v1  ;;  %v300_v56 = vld [vmem:[%s11207_s0 + $0x8e8] sm:$0xff] }
 0x228   :  { %7013 = vmatprep.subr.mxu0 %v6434_v0  ;;  %v777_v34 = vmax.f32 %v297_v21, 0.0 }
 0x229   :  { %v4426_v36 = vsel %vm11211_vm12, %v4425_v31, %v4421_v18  ;;  %1802 = vadd.xlane.f32.xlu1 %v1801_v13  ;;  %1799 = vadd.xlane.f32.xlu0 %v1798_v14  ;;  %v298_v18 = vld [vmem:[%s11207_s0 + $0x8d8] sm:$0xff]  ;;  %v6879_v31 = vld [vmem:[%s11208_s1 + $0x40] sm:$0xff]  }
 0x22a   :  { %v1599_v46 = vpop.xlane.xlu1 %1598  ;;  %v4431_v38 = vsel %vm3478_vm13, %v4430_v30, %v4426_v36  ;;  %v1596_v49 = vpop.xlane.xlu0 %1595  ;;  %7014 = vmatpush3.msra.mxu0 %v6402_v3  ;;  %v6430_v30 = vunpack.c.l.bf16 %v6880_v1  ;;  %v778_v33 = vmax.f32 %v298_v18, 0.0  ;;  %v6393_v36 = vld [vmem:[%s11208_s1] sm:$0xff]   ;;  %v1822_v1 = vsel %vm975_vm0, %v777_v34, 0.0  ;;  %v301_v18 = vld [vmem:[%s11207_s0 + $0x8f0] sm:$0xff] }
 0x22b   :  { %v4440_v57 = vrot.slane %v1599_v46, %v7764_v19  ;;  %v4435_v59 = vrot.slane %v1596_v49, %v7775_v20  ;;  %v1819_v46 = vsel %vm975_vm0, %v776_v15, 0.0  ;;  %7015 = vmatprep.subr.mxu0 %v6431_v23  ;;  %v6398_v49 = vunpack.c.l.bf16 %v6872_v6 }
 0x22c   :  { %7016 = vmatpush3.msra.mxu0 %v6399_v28  ;;  %v6395_v62 = vunpack.c.h.bf16 %v6393_v36  ;;  %v1825_v0 = vsel %vm975_vm0, %v778_v33, 0.0  ;;  %v6394_v21 = vunpack.c.l.bf16 %v6393_v36  ;;  %v781_v33 = vmax.f32 %v301_v18, 0.0 }
 0x22d   :  { %v4436_v9 = vsel %vm3485_vm14, %v4435_v59, %v4431_v38  ;;  %1808 = vadd.xlane.f32.xlu1 %v1807_v55  ;;  %1805 = vadd.xlane.f32.xlu0 %v1804_v52  ;;  %v1816_v38 = vsel %vm975_vm0, %v775_v17, 0.0  ;;  %v6427_v59 = vunpack.c.h.bf16 %v6879_v31 }
 0x22e   :  { %v1605_v13 = vpop.xlane.xlu1 %1604  ;;  %v1602_v14 = vpop.xlane.xlu0 %1601  ;;  %v9005_v24 = vsel %vm3492_vm15, %v4440_v57, %v4436_v9  ;;  %v299_v57 = vld [vmem:[%s11207_s0 + $0x8e0] sm:$0xff]  ;;  %7017 = vmatprep.subr.mxu0 %v6430_v30 }
 0x22f   :  { %11220 = vst [vmem:[#allocation9_spill] sm:$0xff] %v9005_v24  ;;  %v4449_v25 = vrot.slane %v1605_v13, %v7652_v41  ;;  %v4445_v27 = vrot.slane %v1602_v14, %v7646_v39  ;;  %v302_v13 = vld [vmem:[%s11207_s0 + $0x8f8] sm:$0xff]  ;;  %7018 = vmatpush3.msra.mxu0 %v6398_v49  ;;  %v6426_v14 = vunpack.c.l.bf16 %v6879_v31 }
 0x230   :  { %7019 = vmatprep.subr.mxu0 %v6427_v59 }
 0x231   :  { %v4450_v26 = vsel %vm3394_vm1, %v4449_v25, %v4445_v27  ;;  %1814 = vadd.xlane.f32.xlu1 %v1813_v10  ;;  %1811 = vadd.xlane.f32.xlu0 %v1810_v11  ;;  %v780_v10 = vmax.f32 %v300_v56, 0.0  ;;  %v779_v11 = vmax.f32 %v299_v57, 0.0  ;;  %v782_v25 = vmax.f32 %v302_v13, 0.0 }
 0x232   :  { %v1611_v37 = vpop.xlane.xlu1 %1610  ;;  %v1608_v45 = vpop.xlane.xlu0 %1607  ;;  %7020 = vmatpush3.msra.mxu0 %v6395_v62  ;;  %v1834_v56 = vsel %vm975_vm0, %v781_v33, 0.0  ;;  %v306_v62 = vld [vmem:[%s11207_s0 + $0x918] sm:$0xff] }
 0x233   :  { %v4459_v55 = vrot.slane %v1611_v37, %v7649_v40  ;;  %v4454_v52 = vrot.slane %v1608_v45, %v7656_v43  ;;  %v1831_v31 = vsel %vm975_vm0, %v780_v10, 0.0  ;;  %7021 = vmatprep.subr.mxu0 %v6426_v14  ;;  %v304_v37 = vld [vmem:[%s11207_s0 + $0x908] sm:$0xff]  ;;  %v303_v45 = vld [vmem:[%s11207_s0 + $0x900] sm:$0xff] }
 0x234   :  { %7022 = vmatpush3.msra.mxu0 %v6394_v21  ;;  %v784_v57 = vmax.f32 %v304_v37, 0.0  ;;  %v783_v59 = vmax.f32 %v303_v45, 0.0  ;;  %v308_v21 = vld [vmem:[%s11207_s0 + $0x928] sm:$0xff] }
 0x235   :  { %v4455_v63 = vsel %vm3401_vm2, %v4454_v52, %v4450_v26  ;;  %1820 = vadd.xlane.f32.xlu1 %v1819_v46  ;;  %1817 = vadd.xlane.f32.xlu0 %v1816_v38  ;;  %v1828_v26 = vsel %vm975_vm0, %v779_v11, 0.0  ;;  %v1837_v38 = vsel %vm975_vm0, %v782_v25, 0.0  ;;  %v788_v33 = vmax.f32 %v308_v21, 0.0 }
 0x236   :  { %v1617_v3 = vpop.xlane.xlu1 %1616  ;;  %v4460_v6 = vsel %vm3408_vm3, %v4459_v55, %v4455_v63  ;;  %v1614_v9 = vpop.xlane.xlu0 %1613  ;;  %v1843_v13 = vsel %vm975_vm0, %v784_v57, 0.0  ;;  %v1840_v14 = vsel %vm975_vm0, %v783_v59, 0.0 }
 0x237   :  { %v4469_v15 = vrot.slane %v1617_v3, %v7664_v51  ;;  %v4464_v17 = vrot.slane %v1614_v9, %v7675_v58 }
 0x239   :  { %v4465_v23 = vsel %vm3415_vm4, %v4464_v17, %v4460_v6  ;;  %1826 = vadd.xlane.f32.xlu1 %v1825_v0  ;;  %1823 = vadd.xlane.f32.xlu0 %v1822_v1  ;;  %v305_v1 = vld [vmem:[%s11207_s0 + $0x910] sm:$0xff]  ;;  %v786_v6 = vmax.f32 %v306_v62, 0.0 }
 0x23a   :  { %v1623_v27 = vpop.xlane.xlu1 %1622  ;;  %v4470_v28 = vsel %vm3422_vm5, %v4469_v15, %v4465_v23  ;;  %v1620_v30 = vpop.xlane.xlu0 %1619  ;;  %v785_v15 = vmax.f32 %v305_v1, 0.0  ;;  %v307_v23 = vld [vmem:[%s11207_s0 + $0x920] sm:$0xff]  ;;  %v312_v1 = vld [vmem:[%s11207_s0 + $0x948] sm:$0xff] }
 0x23b   :  { %v4479_v34 = vrot.slane %v1623_v27, %v7683_v4  ;;  %v4474_v36 = vrot.slane %v1620_v30, %v7686_v5  ;;  %v1849_v27 = vsel %vm975_vm0, %v786_v6, 0.0 }
 0x23d   :  { %v4475_v46 = vsel %vm3429_vm6, %v4474_v36, %v4470_v28  ;;  %1832 = vadd.xlane.f32.xlu1 %v1831_v31  ;;  %1829 = vadd.xlane.f32.xlu0 %v1828_v26  ;;  %v1846_v26 = vsel %vm975_vm0, %v785_v15, 0.0  ;;  %v310_v36 = vld [vmem:[%s11207_s0 + $0x938] sm:$0xff] }
 0x23e   :  { %v1629_v49 = vpop.xlane.xlu1 %1628  ;;  %v4480_v55 = vsel %vm11215_vm7, %v4479_v34, %v4475_v46  ;;  %v1626_v52 = vpop.xlane.xlu0 %1625  ;;  %v787_v34 = vmax.f32 %v307_v23, 0.0  ;;  %v309_v46 = vld [vmem:[%s11207_s0 + $0x930] sm:$0xff] }
 0x23f   :  { %v4489_v63 = vrot.slane %v1629_v49, %v7707_v22  ;;  %v4484_v0 = vrot.slane %v1626_v52, %v7716_v29  ;;  %v790_v49 = vmax.f32 %v310_v36, 0.0  ;;  %v789_v59 = vmax.f32 %v309_v46, 0.0 }
 0x240   :  { %v1852_v57 = vsel %vm975_vm0, %v787_v34, 0.0 }
 0x241   :  { %v4485_v3 = vsel %vm11214_vm8, %v4484_v0, %v4480_v55  ;;  %1838 = vadd.xlane.f32.xlu1 %v1837_v38  ;;  %1835 = vadd.xlane.f32.xlu0 %v1834_v56  ;;  %v1855_v56 = vsel %vm975_vm0, %v788_v33, 0.0  ;;  %v1861_v6 = vsel %vm975_vm0, %v790_v49, 0.0 }
 0x242   :  { %v1635_v9 = vpop.xlane.xlu1 %1634  ;;  %v4490_v10 = vsel %vm11213_vm9, %v4489_v63, %v4485_v3  ;;  %v1632_v11 = vpop.xlane.xlu0 %1631  ;;  %v311_v3 = vld [vmem:[%s11207_s0 + $0x940] sm:$0xff] }
 0x243   :  { %v4499_v17 = vrot.slane %v1635_v9, %v7724_v42  ;;  %v4494_v18 = vrot.slane %v1632_v11, %v7733_v48  ;;  %v791_v15 = vmax.f32 %v311_v3, 0.0 }
 0x245   :  { %v4495_v25 = vsel %vm11212_vm10, %v4494_v18, %v4490_v10  ;;  %1844 = vadd.xlane.f32.xlu1 %v1843_v13  ;;  %1841 = vadd.xlane.f32.xlu0 %v1840_v14  ;;  %v1858_v13 = vsel %vm975_vm0, %v789_v59, 0.0  ;;  %v792_v14 = vmax.f32 %v312_v1, 0.0  ;;  %v313_v18 = vld [vmem:[%s11207_s0 + $0x950] sm:$0xff] }
 0x246   :  { %v1641_v28 = vpop.xlane.xlu1 %1640  ;;  %v4500_v30 = vsel %vm3464_vm11, %v4499_v17, %v4495_v25  ;;  %v1638_v31 = vpop.xlane.xlu0 %1637  ;;  %v314_v17 = vld [vmem:[%s11207_s0 + $0x958] sm:$0xff]  ;;  %v793_v33 = vmax.f32 %v313_v18, 0.0  ;;  %v6901_v59 = vld [vmem:[%s11208_s1 + $0xf0] sm:$0xff]  }
 0x247   :  { %v4509_v37 = vrot.slane %v1641_v28, %v7744_v60  ;;  %v4504_v45 = vrot.slane %v1638_v31, %v7753_v2 }
 0x248   :  { %v1870_v3 = vsel %vm975_vm0, %v793_v33, 0.0 }
 0x249   :  { %v4505_v38 = vsel %vm11211_vm12, %v4504_v45, %v4500_v30  ;;  %1850 = vadd.xlane.f32.xlu1 %v1849_v27  ;;  %1847 = vadd.xlane.f32.xlu0 %v1846_v26  ;;  %v6902_v27 = vld [vmem:[%s11208_s1 + $0xf8] sm:$0xff]   ;;  %v794_v26 = vmax.f32 %v314_v17, 0.0  ;;  %v1864_v45 = vsel %vm975_vm0, %v791_v15, 0.0  ;;  %v317_v15 = vld [vmem:[%s11207_s0 + $0x970] sm:$0xff] }
 0x24a   :  { %v1647_v55 = vpop.xlane.xlu1 %1646  ;;  %v1644_v52 = vpop.xlane.xlu0 %1643  ;;  %v4510_v62 = vsel %vm3478_vm13, %v4509_v37, %v4505_v38  ;;  %v6519_v28 = vunpack.c.h.bf16 %v6902_v27  ;;  %v6894_v30 = vld [vmem:[%s11208_s1 + $0xb8] sm:$0xff]   ;;  %v1867_v37 = vsel %vm975_vm0, %v792_v14, 0.0  ;;  %v6518_v46 = vunpack.c.l.bf16 %v6902_v27  ;;  %v6900_v27 = vld [vmem:[%s11208_s1 + $0xe8] sm:$0xff]  }
 0x24b   :  { %v4519_v63 = vrot.slane %v1647_v55, %v7764_v19  ;;  %v4514_v0 = vrot.slane %v1644_v52, %v7775_v20  ;;  %v6487_v38 = vunpack.c.h.bf16 %v6894_v30  ;;  %v316_v52 = vld [vmem:[%s11207_s0 + $0x968] sm:$0xff]  ;;  %v1873_v1 = vsel %vm975_vm0, %v794_v26, 0.0  ;;  %v318_v14 = vld [vmem:[%s11207_s0 + $0x978] sm:$0xff] }
 0x24c   :  { %7026 = vmatprep.subr.mxu1 %v6519_v28  ;;  %v798_v26 = vmax.f32 %v318_v14, 0.0  ;;  %v797_v33 = vmax.f32 %v317_v15, 0.0  ;;  %v320_v14 = vld [vmem:[%s11207_s0 + $0x988] sm:$0xff]  ;;  %v319_v15 = vld [vmem:[%s11207_s0 + $0x980] sm:$0xff] }
 0x24d   :  { %1856 = vadd.xlane.f32.xlu1 %v1855_v56  ;;  %1853 = vadd.xlane.f32.xlu0 %v1852_v57  ;;  %v4515_v9 = vsel %vm3485_vm14, %v4514_v0, %v4510_v62  ;;  %v315_v56 = vld [vmem:[%s11207_s0 + $0x960] sm:$0xff]  ;;  %v6486_v57 = vunpack.c.l.bf16 %v6894_v30  ;;  %v6515_v62 = vunpack.c.h.bf16 %v6901_v59  ;;  %v6892_v30 = vld [vmem:[%s11208_s1 + $0xa8] sm:$0xff]  }
 0x24e   :  { %v1653_v10 = vpop.xlane.xlu1 %1652  ;;  %v1650_v11 = vpop.xlane.xlu0 %1649  ;;  %v9108_v21 = vsel %vm3492_vm15, %v4519_v63, %v4515_v9  ;;  %7027 = vmatpush3.msra.mxu1 %v6487_v38  ;;  %v6893_v63 = vld [vmem:[%s11208_s1 + $0xb0] sm:$0xff]   ;;  %v6511_v38 = vunpack.c.h.bf16 %v6900_v27 }
 0x24f   :  { %11221 = vst [vmem:[#allocation10_spill] sm:$0xff] %v9108_v21  ;;  %v4528_v23 = vrot.slane %v1653_v10, %v7652_v41  ;;  %v4524_v25 = vrot.slane %v1650_v11, %v7646_v39  ;;  %v796_v11 = vmax.f32 %v316_v52, 0.0  ;;  %7028 = vmatprep.subr.mxu1 %v6518_v46  ;;  %v6483_v17 = vunpack.c.h.bf16 %v6893_v63  ;;  %v336_v52 = vld [vmem:[%s11207_s0 + $0xa08] sm:$0xff] }
 0x250   :  { %7029 = vmatpush3.msra.mxu1 %v6486_v57  ;;  %v6482_v28 = vunpack.c.l.bf16 %v6893_v63  ;;  %v6479_v57 = vunpack.c.h.bf16 %v6892_v30 }
 0x251   :  { %v4529_v31 = vsel %vm3394_vm1, %v4528_v23, %v4524_v25  ;;  %1862 = vadd.xlane.f32.xlu1 %v1861_v6  ;;  %1859 = vadd.xlane.f32.xlu0 %v1858_v13  ;;  %v795_v13 = vmax.f32 %v315_v56, 0.0  ;;  %v6514_v25 = vunpack.c.l.bf16 %v6901_v59  ;;  %v335_v56 = vld [vmem:[%s11207_s0 + $0xa00] sm:$0xff]  ;;  %v6510_v59 = vunpack.c.l.bf16 %v6900_v27 }
 0x252   :  { %v1659_v34 = vpop.xlane.xlu1 %1658  ;;  %v1656_v36 = vpop.xlane.xlu0 %1655  ;;  %7030 = vmatprep.subr.mxu1 %v6515_v62  ;;  %v6899_v62 = vld [vmem:[%s11208_s1 + $0xe0] sm:$0xff]  }
 0x253   :  { %v4538_v49 = vrot.slane %v1659_v34, %v7649_v40  ;;  %v4533_v55 = vrot.slane %v1656_v36, %v7656_v43  ;;  %v1876_v46 = vsel %vm975_vm0, %v795_v13, 0.0  ;;  %7031 = vmatpush3.msra.mxu1 %v6483_v17  ;;  %v815_v13 = vmax.f32 %v335_v56, 0.0 }
 0x254   :  { %7032 = vmatprep.subr.mxu1 %v6514_v25  ;;  %v6478_v17 = vunpack.c.l.bf16 %v6892_v30  ;;  %v6507_v25 = vunpack.c.h.bf16 %v6899_v62 }
 0x255   :  { %v4534_v0 = vsel %vm3401_vm2, %v4533_v55, %v4529_v31  ;;  %1868 = vadd.xlane.f32.xlu1 %v1867_v37  ;;  %1865 = vadd.xlane.f32.xlu0 %v1864_v45  ;;  %v1879_v45 = vsel %vm975_vm0, %v796_v11, 0.0  ;;  %v816_v11 = vmax.f32 %v336_v52, 0.0  ;;  %v337_v52 = vld [vmem:[%s11207_s0 + $0xa10] sm:$0xff] }
 0x256   :  { %v1665_v6 = vpop.xlane.xlu1 %1664  ;;  %v4539_v9 = vsel %vm3408_vm3, %v4538_v49, %v4534_v0  ;;  %v1662_v10 = vpop.xlane.xlu0 %1661  ;;  %7033 = vmatpush3.msra.mxu1 %v6482_v28  ;;  %v1885_v0 = vsel %vm975_vm0, %v798_v26, 0.0  ;;  %v799_v26 = vmax.f32 %v319_v15, 0.0 }
 0x257   :  { %v4548_v18 = vrot.slane %v1665_v6, %v7664_v51  ;;  %v4543_v23 = vrot.slane %v1662_v10, %v7675_v58  ;;  %7034 = vmatprep.subr.mxu1 %v6511_v38 }
 0x258   :  { %7035 = vmatpush3.msra.mxu1 %v6479_v57  ;;  %v6890_v57 = vld [vmem:[%s11208_s1 + $0x98] sm:$0xff]  }
 0x259   :  { %v4544_v31 = vsel %vm3415_vm4, %v4543_v23, %v4539_v9  ;;  %1874 = vadd.xlane.f32.xlu1 %v1873_v1  ;;  %1871 = vadd.xlane.f32.xlu0 %v1870_v3  ;;  %v1882_v1 = vsel %vm975_vm0, %v797_v33, 0.0  ;;  %v6891_v3 = vld [vmem:[%s11208_s1 + $0xa0] sm:$0xff]   ;;  %v6898_v33 = vld [vmem:[%s11208_s1 + $0xd8] sm:$0xff]  }
 0x25a   :  { %v1671_v34 = vpop.xlane.xlu1 %1670  ;;  %v4549_v36 = vsel %vm3422_vm5, %v4548_v18, %v4544_v31  ;;  %v1668_v37 = vpop.xlane.xlu0 %1667  ;;  %7036 = vmatprep.subr.mxu1 %v6510_v59  ;;  %v6475_v27 = vunpack.c.h.bf16 %v6891_v3  ;;  %v800_v31 = vmax.f32 %v320_v14, 0.0  ;;  %v6474_v56 = vunpack.c.l.bf16 %v6891_v3 }
 0x25b   :  { %v4558_v49 = vrot.slane %v1671_v34, %v7683_v4  ;;  %v4553_v55 = vrot.slane %v1668_v37, %v7686_v5  ;;  %v1939_v37 = vsel %vm975_vm0, %v816_v11, 0.0  ;;  %7037 = vmatpush3.msra.mxu1 %v6478_v17  ;;  %v6503_v59 = vunpack.c.h.bf16 %v6898_v33  ;;  %v322_v11 = vld [vmem:[%s11207_s0 + $0x998] sm:$0xff] }
 0x25c   :  { %7038 = vmatprep.subr.mxu1 %v6507_v25  ;;  %v817_v3 = vmax.f32 %v337_v52, 0.0  ;;  %v6471_v14 = vunpack.c.h.bf16 %v6890_v57  ;;  %v6470_v25 = vunpack.c.l.bf16 %v6890_v57  ;;  %v6896_v57 = vld [vmem:[%s11208_s1 + $0xc8] sm:$0xff]  }
 0x25d   :  { %v4554_v63 = vsel %vm3429_vm6, %v4553_v55, %v4549_v36  ;;  %1880 = vadd.xlane.f32.xlu1 %v1879_v45  ;;  %1877 = vadd.xlane.f32.xlu0 %v1876_v46  ;;  %v1936_v45 = vsel %vm975_vm0, %v815_v13, 0.0  ;;  %v6506_v46 = vunpack.c.l.bf16 %v6899_v62  ;;  %v321_v55 = vld [vmem:[%s11207_s0 + $0x990] sm:$0xff]  ;;  %v338_v13 = vld [vmem:[%s11207_s0 + $0xa18] sm:$0xff] }
 0x25e   :  { %v1677_v6 = vpop.xlane.xlu1 %1676  ;;  %v4559_v9 = vsel %vm11215_vm7, %v4558_v49, %v4554_v63  ;;  %v1674_v10 = vpop.xlane.xlu0 %1673  ;;  %7039 = vmatpush3.msra.mxu1 %v6475_v27  ;;  %v1891_v63 = vsel %vm975_vm0, %v800_v31, 0.0  ;;  %v6889_v27 = vld [vmem:[%s11208_s1 + $0x90] sm:$0xff]   ;;  %v802_v31 = vmax.f32 %v322_v11, 0.0 }
 0x25f   :  { %v4568_v18 = vrot.slane %v1677_v6, %v7707_v22  ;;  %v4563_v23 = vrot.slane %v1674_v10, %v7716_v29  ;;  %v801_v10 = vmax.f32 %v321_v55, 0.0  ;;  %7040 = vmatprep.subr.mxu1 %v6506_v46  ;;  %v339_v55 = vld [vmem:[%s11207_s0 + $0xa20] sm:$0xff]  ;;  %v6467_v52 = vunpack.c.h.bf16 %v6889_v27 }
 0x260   :  { %7041 = vmatpush3.msra.mxu1 %v6474_v56  ;;  %v6466_v11 = vunpack.c.l.bf16 %v6889_v27 }
 0x261   :  { %v4564_v28 = vsel %vm11214_vm8, %v4563_v23, %v4559_v9  ;;  %1886 = vadd.xlane.f32.xlu1 %v1885_v0  ;;  %1883 = vadd.xlane.f32.xlu0 %v1882_v1  ;;  %v1888_v0 = vsel %vm975_vm0, %v799_v26, 0.0  ;;  %v6897_v23 = vld [vmem:[%s11208_s1 + $0xd0] sm:$0xff]   ;;  %v818_v26 = vmax.f32 %v338_v13, 0.0 }
 0x262   :  { %v1683_v34 = vpop.xlane.xlu1 %1682  ;;  %v4569_v30 = vsel %vm11213_vm9, %v4568_v18, %v4564_v28  ;;  %v1680_v36 = vpop.xlane.xlu0 %1679  ;;  %v6502_v18 = vunpack.c.l.bf16 %v6898_v33  ;;  %7042 = vmatprep.subr.mxu1 %v6503_v59  ;;  %v6498_v56 = vunpack.c.l.bf16 %v6897_v23 }
 0x263   :  { %v4578_v38 = vrot.slane %v1683_v34, %v7724_v42  ;;  %v4573_v49 = vrot.slane %v1680_v36, %v7733_v48  ;;  %v1894_v36 = vsel %vm975_vm0, %v801_v10, 0.0  ;;  %7043 = vmatpush3.msra.mxu1 %v6471_v14  ;;  %v819_v10 = vmax.f32 %v339_v55, 0.0  ;;  %v340_v14 = vld [vmem:[%s11207_s0 + $0xa28] sm:$0xff] }
 0x264   :  { %7044 = vmatprep.subr.mxu1 %v6502_v18 }
 0x265   :  { %v4574_v62 = vsel %vm11212_vm10, %v4573_v49, %v4569_v30  ;;  %1940 = vadd.xlane.f32.xlu1 %v1939_v37  ;;  %1937 = vadd.xlane.f32.xlu0 %v1936_v45  ;;  %v1942_v37 = vsel %vm975_vm0, %v817_v3, 0.0  ;;  %v6499_v45 = vunpack.c.h.bf16 %v6897_v23  ;;  %v323_v49 = vld [vmem:[%s11207_s0 + $0x9a0] sm:$0xff]  ;;  %v324_v3 = vld [vmem:[%s11207_s0 + $0x9a8] sm:$0xff] }
 0x266   :  { %v1689_v1 = vpop.xlane.xlu1 %1688  ;;  %v4579_v6 = vsel %vm3464_vm11, %v4578_v38, %v4574_v62  ;;  %v1686_v9 = vpop.xlane.xlu0 %1685  ;;  %7045 = vmatpush3.msra.mxu1 %v6470_v25  ;;  %v1897_v62 = vsel %vm975_vm0, %v802_v31, 0.0  ;;  %v804_v18 = vmax.f32 %v324_v3, 0.0  ;;  %v6895_v23 = vld [vmem:[%s11208_s1 + $0xc0] sm:$0xff]   ;;  %v1948_v31 = vsel %vm975_vm0, %v819_v10, 0.0 }
 0x267   :  { %v4588_v15 = vrot.slane %v1689_v1, %v7744_v60  ;;  %v4583_v17 = vrot.slane %v1686_v9, %v7753_v2  ;;  %v803_v9 = vmax.f32 %v323_v49, 0.0  ;;  %7046 = vmatprep.subr.mxu1 %v6499_v45  ;;  %v6491_v45 = vunpack.c.h.bf16 %v6895_v23 }
 0x268   :  { %7047 = vmatpush3.msra.mxu1 %v6467_v52 }
 0x269   :  { %v4584_v28 = vsel %vm11211_vm12, %v4583_v17, %v4579_v6  ;;  %1892 = vadd.xlane.f32.xlu1 %v1891_v63  ;;  %1889 = vadd.xlane.f32.xlu0 %v1888_v0  ;;  %v1945_v63 = vsel %vm975_vm0, %v818_v26, 0.0  ;;  %v6888_v0 = vld [vmem:[%s11208_s1 + $0x88] sm:$0xff]   ;;  %v820_v26 = vmax.f32 %v340_v14, 0.0 }
 0x26a   :  { %v1695_v34 = vpop.xlane.xlu1 %1694  ;;  %v4589_v30 = vsel %vm3478_vm13, %v4588_v15, %v4584_v28  ;;  %v1692_v33 = vpop.xlane.xlu0 %1691  ;;  %v6495_v15 = vunpack.c.h.bf16 %v6896_v57  ;;  %7048 = vmatprep.subr.mxu1 %v6498_v56  ;;  %v6463_v17 = vunpack.c.h.bf16 %v6888_v0  ;;  %v1900_v28 = vsel %vm975_vm0, %v803_v9, 0.0 }
 0x26b   :  { %v4598_v46 = vrot.slane %v1695_v34, %v7764_v19  ;;  %v4593_v38 = vrot.slane %v1692_v33, %v7775_v20  ;;  %7049 = vmatpush3.msra.mxu1 %v6466_v11  ;;  %v6494_v34 = vunpack.c.l.bf16 %v6896_v57  ;;  %v341_v33 = vld [vmem:[%s11207_s0 + $0xa30] sm:$0xff]  ;;  %v1951_v55 = vsel %vm975_vm0, %v820_v26, 0.0 }
 0x26c   :  { %7050 = vmatprep.subr.mxu1 %v6495_v15  ;;  %v821_v56 = vmax.f32 %v341_v33, 0.0  ;;  %v351_v33 = vld [vmem:[%s11207_s0 + $0xa80] sm:$0xff] }
 0x26d   :  { %v4594_v59 = vsel %vm3485_vm14, %v4593_v38, %v4589_v30  ;;  %1895 = vadd.xlane.f32.xlu1 %v1894_v36  ;;  %1943 = vadd.xlane.f32.xlu0 %v1942_v37  ;;  %v325_v30 = vld [vmem:[%s11207_s0 + $0x9b0] sm:$0xff]  ;;  %v6462_v36 = vunpack.c.l.bf16 %v6888_v0  ;;  %v6887_v37 = vld [vmem:[%s11208_s1 + $0x80] sm:$0xff]  }
 0x26e   :  { %v9240_v1 = vpop.xlane.xlu1 %1700  ;;  %v9242_v6 = vpop.xlane.xlu0 %1697  ;;  %v9248_v13 = vsel %vm3492_vm15, %v4598_v46, %v4594_v59  ;;  %7051 = vmatpush3.msra.mxu1 %v6463_v17  ;;  %v1903_v46 = vsel %vm975_vm0, %v804_v18, 0.0  ;;  %v805_v52 = vmax.f32 %v325_v30, 0.0  ;;  %v6459_v57 = vunpack.c.h.bf16 %v6887_v37  ;;  %v367_v59 = vld [vmem:[%s11207_s0 + $0xb00] sm:$0xff]  ;;  %v326_v17 = vld [vmem:[%s11207_s0 + $0x9b8] sm:$0xff]  ;;  %v368_v18 = vld [vmem:[%s11207_s0 + $0xb08] sm:$0xff] }
 0x26f   :  { %11222 = vst [vmem:[#allocation11_spill] sm:$0xff] %v9248_v13  ;;  %7052 = vmatprep.subr.mxu1 %v6494_v34  ;;  %v6458_v0 = vunpack.c.l.bf16 %v6887_v37  ;;  %v1954_v11 = vsel %vm975_vm0, %v821_v56, 0.0  ;;  %v847_v14 = vmax.f32 %v367_v59, 0.0  ;;  %v806_v34 = vmax.f32 %v326_v17, 0.0  ;;  %v352_v59 = vld [vmem:[%s11207_s0 + $0xa88] sm:$0xff]  ;;  %v327_v17 = vld [vmem:[%s11207_s0 + $0x9c0] sm:$0xff] }
 0x270   :  { %7053 = vmatpush3.msra.mxu1 %v6462_v36  ;;  %v1906_v3 = vsel %vm975_vm0, %v805_v52, 0.0  ;;  %v848_v30 = vmax.f32 %v368_v18, 0.0  ;;  %v343_v36 = vld [vmem:[%s11207_s0 + $0xa40] sm:$0xff]  ;;  %v831_v52 = vmax.f32 %v351_v33, 0.0 }
 0x271   :  { %1898 = vadd.xlane.f32.xlu1 %v1897_v62  ;;  %1946 = vadd.xlane.f32.xlu0 %v1945_v63  ;;  %v342_v62 = vld [vmem:[%s11207_s0 + $0xa38] sm:$0xff]  ;;  %v6490_v63 = vunpack.c.l.bf16 %v6895_v23  ;;  %v823_v56 = vmax.f32 %v343_v36, 0.0 }
 0x272   :  { %v9256_v25 = vpop.xlane.xlu1 %1706  ;;  %v9258_v27 = vpop.xlane.xlu0 %1703  ;;  %7054 = vmatprep.subr.mxu1 %v6491_v45  ;;  %v822_v15 = vmax.f32 %v342_v62, 0.0  ;;  %v370_v36 = vld [vmem:[%s11207_s0 + $0xb18] sm:$0xff] }
 0x273   :  { %7055 = vmatpush3.msra.mxu1 %v6459_v57  ;;  %v369_v57 = vld [vmem:[%s11207_s0 + $0xb10] sm:$0xff] }
 0x274   :  { %7056 = vmatprep.subr.mxu1 %v6490_v63  ;;  %v1957_v26 = vsel %vm975_vm0, %v822_v15, 0.0  ;;  %v344_v15 = vld [vmem:[%s11207_s0 + $0xa48] sm:$0xff] }
 0x275   :  { %1901 = vadd.xlane.f32.xlu1 %v1900_v28  ;;  %1949 = vadd.xlane.f32.xlu0 %v1948_v31  ;;  %v2032_v31 = vsel %vm975_vm0, %v847_v14, 0.0  ;;  %v832_v14 = vmax.f32 %v352_v59, 0.0  ;;  %v824_v18 = vmax.f32 %v344_v15, 0.0  ;;  %v328_v15 = vld [vmem:[%s11207_s0 + $0x9c8] sm:$0xff] }
 0x276   :  { %v9272_v38 = vpop.xlane.xlu1 %1712  ;;  %v9274_v49 = vpop.xlane.xlu0 %1709  ;;  %7057 = vmatpush3.msra.mxu1 %v6458_v0  ;;  %v1984_v0 = vsel %vm975_vm0, %v831_v52, 0.0 }
 0x277   :  { %v1987_v33 = vsel %vm975_vm0, %v832_v14, 0.0  ;;  %v345_v14 = vld [vmem:[%s11207_s0 + $0xa50] sm:$0xff] }
 0x279   :  { %1904 = vadd.xlane.f32.xlu1 %v1903_v46  ;;  %1952 = vadd.xlane.f32.xlu0 %v1951_v55  ;;  %v1909_v46 = vsel %vm975_vm0, %v806_v34, 0.0  ;;  %v2035_v55 = vsel %vm975_vm0, %v848_v30, 0.0 }
 0x27a   :  { %v9283_v9 = vpop.xlane.xlu1 %1718  ;;  %v9285_v10 = vpop.xlane.xlu0 %1715 }
 0x27d   :  { %1907 = vadd.xlane.f32.xlu1 %v1906_v3  ;;  %1955 = vadd.xlane.f32.xlu0 %v1954_v11  ;;  %v1960_v3 = vsel %vm975_vm0, %v823_v56, 0.0  ;;  %v849_v11 = vmax.f32 %v369_v57, 0.0  ;;  %v4607_v56 = vrot.slane %v9240_v1, %v7652_v41  ;;  %v4603_v57 = vrot.slane %v9242_v6, %v7646_v39 }
 0x27e   :  { %v9295_v23 = vpop.xlane.xlu1 %1724  ;;  %v9297_v28 = vpop.xlane.xlu0 %1721  ;;  %v825_v6 = vmax.f32 %v345_v14, 0.0 }
 0x27f   :  { %v2038_v30 = vsel %vm975_vm0, %v849_v11, 0.0 }
 0x281   :  { %2033 = vadd.xlane.f32.xlu1 %v2032_v31  ;;  %1958 = vadd.xlane.f32.xlu0 %v1957_v26  ;;  %v807_v31 = vmax.f32 %v327_v17, 0.0  ;;  %v4612_v17 = vrot.slane %v9258_v27, %v7656_v43 }
 0x282   :  { %v9307_v37 = vpop.xlane.xlu1 %1730  ;;  %v9309_v45 = vpop.xlane.xlu0 %1727 }
 0x283   :  { %v1912_v52 = vsel %vm975_vm0, %v807_v31, 0.0  ;;  %v808_v31 = vmax.f32 %v328_v15, 0.0 }
 0x285   :  { %1910 = vadd.xlane.f32.xlu1 %v1909_v46  ;;  %2036 = vadd.xlane.f32.xlu0 %v2035_v55  ;;  %v353_v46 = vld [vmem:[%s11207_s0 + $0xa90] sm:$0xff]  ;;  %v1963_v55 = vsel %vm975_vm0, %v824_v18, 0.0 }
 0x286   :  { %v9319_v62 = vpop.xlane.xlu1 %1736  ;;  %v9321_v63 = vpop.xlane.xlu0 %1733  ;;  %v833_v11 = vmax.f32 %v353_v46, 0.0 }
 0x288   :  { %v1990_v24 = vsel %vm975_vm0, %v833_v11, 0.0  ;;  %v4627_v11 = vrot.slane %v9272_v38, %v7664_v51 }
 0x289   :  { %1985 = vadd.xlane.f32.xlu1 %v1984_v0  ;;  %1961 = vadd.xlane.f32.xlu0 %v1960_v3  ;;  %v850_v3 = vmax.f32 %v370_v36, 0.0 }
 0x28a   :  { %v9331_v26 = vpop.xlane.xlu1 %1742  ;;  %v9333_v34 = vpop.xlane.xlu0 %1739 }
 0x28b   :  { %v2041_v13 = vsel %vm975_vm0, %v850_v3, 0.0  ;;  %v1915_v3 = vsel %vm975_vm0, %v808_v31, 0.0 }
 0x28d   :  { %2039 = vadd.xlane.f32.xlu1 %v2038_v30  ;;  %1988 = vadd.xlane.f32.xlu0 %v1987_v33  ;;  %v4608_v30 = vsel %vm3394_vm1, %v4607_v56, %v4603_v57  ;;  %v4617_v33 = vrot.slane %v9256_v25, %v7649_v40  ;;  %v354_v25 = vld [vmem:[%s11207_s0 + $0xa98] sm:$0xff] }
 0x28e   :  { %v1749_v59 = vpop.xlane.xlu1 %1748  ;;  %v1746_v0 = vpop.xlane.xlu0 %1745  ;;  %v4613_v27 = vsel %vm3401_vm2, %v4612_v17, %v4608_v30 }
 0x28f   :  { %v4686_v1 = vrot.slane %v1749_v59, %v7652_v41  ;;  %v4682_v18 = vrot.slane %v1746_v0, %v7646_v39  ;;  %v4622_v59 = vrot.slane %v9274_v49, %v7675_v58  ;;  %v1966_v49 = vsel %vm975_vm0, %v825_v6, 0.0 }
 0x290   :  { %v4618_v14 = vsel %vm3408_vm3, %v4617_v33, %v4613_v27 }
 0x291   :  { %1964 = vadd.xlane.f32.xlu1 %v1963_v55  ;;  %1913 = vadd.xlane.f32.xlu0 %v1912_v52  ;;  %v371_v52 = vld [vmem:[%s11207_s0 + $0xb20] sm:$0xff]  ;;  %v4687_v56 = vsel %vm3394_vm1, %v4686_v1, %v4682_v18  ;;  %v346_v1 = vld [vmem:[%s11207_s0 + $0xa58] sm:$0xff]  ;;  %v4632_v18 = vrot.slane %v9285_v10, %v7686_v5 }
 0x292   :  { %v1755_v36 = vpop.xlane.xlu1 %1754  ;;  %v1752_v46 = vpop.xlane.xlu0 %1751  ;;  %v851_v30 = vmax.f32 %v371_v52, 0.0 }
 0x293   :  { %v4691_v55 = vrot.slane %v1752_v46, %v7656_v43  ;;  %v4696_v57 = vrot.slane %v1755_v36, %v7649_v40  ;;  %v834_v46 = vmax.f32 %v354_v25, 0.0  ;;  %v826_v36 = vmax.f32 %v346_v1, 0.0 }
 0x294   :  { %v2044_v10 = vsel %vm975_vm0, %v851_v30, 0.0  ;;  %v4647_v30 = vrot.slane %v9295_v23, %v7707_v22 }
 0x295   :  { %v4692_v0 = vsel %vm3401_vm2, %v4691_v55, %v4687_v56  ;;  %2042 = vadd.xlane.f32.xlu1 %v2041_v13  ;;  %1991 = vadd.xlane.f32.xlu0 %v1990_v24  ;;  %v329_v24 = vld [vmem:[%s11207_s0 + $0x9d0] sm:$0xff]  ;;  %v4623_v13 = vsel %vm3415_vm4, %v4622_v59, %v4618_v14  ;;  %v4637_v55 = vrot.slane %v9283_v9, %v7683_v4  ;;  %v1993_v56 = vsel %vm975_vm0, %v834_v46, 0.0  ;;  %v355_v9 = vld [vmem:[%s11207_s0 + $0xaa0] sm:$0xff] }
 0x296   :  { %v1761_v15 = vpop.xlane.xlu1 %1760  ;;  %v1758_v17 = vpop.xlane.xlu0 %1757  ;;  %v4697_v31 = vsel %vm3408_vm3, %v4696_v57, %v4692_v0  ;;  %v809_v27 = vmax.f32 %v329_v24, 0.0  ;;  %v4628_v59 = vsel %vm3422_vm5, %v4627_v11, %v4623_v13  ;;  %v4642_v57 = vrot.slane %v9297_v28, %v7716_v29 }
 0x297   :  { %v4701_v38 = vrot.slane %v1758_v17, %v7675_v58  ;;  %v4706_v6 = vrot.slane %v1761_v15, %v7664_v51  ;;  %v4633_v14 = vsel %vm3429_vm6, %v4632_v18, %v4628_v59  ;;  %v1969_v28 = vsel %vm975_vm0, %v826_v36, 0.0 }
 0x298   :  { %v1918_v17 = vsel %vm975_vm0, %v809_v27, 0.0  ;;  %v4638_v46 = vsel %vm11215_vm7, %v4637_v55, %v4633_v14  ;;  %v835_v18 = vmax.f32 %v355_v9, 0.0 }
 0x299   :  { %v4702_v33 = vsel %vm3415_vm4, %v4701_v38, %v4697_v31  ;;  %1967 = vadd.xlane.f32.xlu1 %v1966_v49  ;;  %1916 = vadd.xlane.f32.xlu0 %v1915_v3  ;;  %v372_v49 = vld [vmem:[%s11207_s0 + $0xb28] sm:$0xff]  ;;  %v347_v38 = vld [vmem:[%s11207_s0 + $0xa60] sm:$0xff]  ;;  %v4643_v31 = vsel %vm11214_vm8, %v4642_v57, %v4638_v46 }
 0x29a   :  { %v1767_v52 = vpop.xlane.xlu1 %1766  ;;  %v1764_v25 = vpop.xlane.xlu0 %1763  ;;  %v4707_v11 = vsel %vm3422_vm5, %v4706_v6, %v4702_v33  ;;  %v852_v13 = vmax.f32 %v372_v49, 0.0  ;;  %v330_v6 = vld [vmem:[%s11207_s0 + $0x9d8] sm:$0xff]  ;;  %v4652_v33 = vrot.slane %v9309_v45, %v7733_v48  ;;  %v827_v59 = vmax.f32 %v347_v38, 0.0  ;;  %v348_v38 = vld [vmem:[%s11207_s0 + $0xa68] sm:$0xff] }
 0x29b   :  { %v4711_v0 = vrot.slane %v1764_v25, %v7686_v5  ;;  %v4716_v3 = vrot.slane %v1767_v52, %v7683_v4  ;;  %v810_v52 = vmax.f32 %v330_v6, 0.0  ;;  %v4657_v25 = vrot.slane %v9307_v37, %v7724_v42  ;;  %v356_v37 = vld [vmem:[%s11207_s0 + $0xaa8] sm:$0xff]  ;;  %v331_v6 = vld [vmem:[%s11207_s0 + $0x9e0] sm:$0xff] }
 0x29c   :  { %v2047_v45 = vsel %vm975_vm0, %v852_v13, 0.0  ;;  %v1996_v57 = vsel %vm975_vm0, %v835_v18, 0.0  ;;  %v4662_v49 = vrot.slane %v9321_v63, %v7753_v2  ;;  %v1972_v63 = vsel %vm975_vm0, %v827_v59, 0.0 }
 0x29d   :  { %v4712_v15 = vsel %vm3429_vm6, %v4711_v0, %v4707_v11  ;;  %2045 = vadd.xlane.f32.xlu1 %v2044_v10  ;;  %1994 = vadd.xlane.f32.xlu0 %v1993_v56  ;;  %v4648_v10 = vsel %vm11213_vm9, %v4647_v30, %v4643_v31  ;;  %v4667_v30 = vrot.slane %v9319_v62, %v7744_v60  ;;  %v836_v18 = vmax.f32 %v356_v37, 0.0 }
 0x29e   :  { %v1773_v1 = vpop.xlane.xlu1 %1772  ;;  %v1770_v24 = vpop.xlane.xlu0 %1769  ;;  %v4717_v27 = vsel %vm11215_vm7, %v4716_v3, %v4712_v15  ;;  %v4653_v0 = vsel %vm11212_vm10, %v4652_v33, %v4648_v10  ;;  %v373_v3 = vld [vmem:[%s11207_s0 + $0xb30] sm:$0xff]  ;;  %v4672_v33 = vrot.slane %v9333_v34, %v7775_v20  ;;  %v811_v59 = vmax.f32 %v331_v6, 0.0 }
 0x29f   :  { %v4721_v23 = vrot.slane %v1770_v24, %v7716_v29  ;;  %v4726_v36 = vrot.slane %v1773_v1, %v7707_v22  ;;  %v4658_v46 = vsel %vm3464_vm11, %v4657_v25, %v4653_v0  ;;  %v853_v13 = vmax.f32 %v373_v3, 0.0 }
 0x2a0   :  { %v4663_v31 = vsel %vm11211_vm12, %v4662_v49, %v4658_v46  ;;  %v1999_v34 = vsel %vm975_vm0, %v836_v18, 0.0  ;;  %v374_v49 = vld [vmem:[%s11207_s0 + $0xb38] sm:$0xff] }
 0x2a1   :  { %v4722_v55 = vsel %vm11214_vm8, %v4721_v23, %v4717_v27  ;;  %1970 = vadd.xlane.f32.xlu1 %v1969_v28  ;;  %1919 = vadd.xlane.f32.xlu0 %v1918_v17  ;;  %v1921_v17 = vsel %vm975_vm0, %v810_v52, 0.0  ;;  %v4677_v52 = vrot.slane %v9331_v26, %v7764_v19  ;;  %v357_v26 = vld [vmem:[%s11207_s0 + $0xab0] sm:$0xff] }
 0x2a2   :  { %v1779_v56 = vpop.xlane.xlu1 %1778  ;;  %v1776_v14 = vpop.xlane.xlu0 %1775  ;;  %v4727_v15 = vsel %vm11213_vm9, %v4726_v36, %v4722_v55  ;;  %v828_v55 = vmax.f32 %v348_v38, 0.0  ;;  %v837_v46 = vmax.f32 %v357_v26, 0.0 }
 0x2a3   :  { %v4731_v9 = vrot.slane %v1776_v14, %v7733_v48  ;;  %v4736_v11 = vrot.slane %v1779_v56, %v7724_v42  ;;  %v2050_v56 = vsel %vm975_vm0, %v853_v13, 0.0  ;;  %v4668_v14 = vsel %vm3478_vm13, %v4667_v30, %v4663_v31  ;;  %v332_v13 = vld [vmem:[%s11207_s0 + $0x9e8] sm:$0xff] }
 0x2a4   :  { %v4673_v0 = vsel %vm3485_vm14, %v4672_v33, %v4668_v14  ;;  %v1975_v37 = vsel %vm975_vm0, %v828_v55, 0.0  ;;  %v854_v30 = vmax.f32 %v374_v49, 0.0  ;;  %v6910_v14 = vld [vmem:[%s11208_s1 + $0x138] sm:$0xff]  }
 0x2a5   :  { %v4732_v28 = vsel %vm11212_vm10, %v4731_v9, %v4727_v15  ;;  %2048 = vadd.xlane.f32.xlu1 %v2047_v45  ;;  %1997 = vadd.xlane.f32.xlu0 %v1996_v57  ;;  %v6550_v26 = vunpack.c.l.bf16 %v6910_v14 }
 0x2a6   :  { %v1785_v1 = vpop.xlane.xlu1 %1784  ;;  %v1782_v24 = vpop.xlane.xlu0 %1781  ;;  %v4737_v36 = vsel %vm3464_vm11, %v4736_v11, %v4732_v28  ;;  %v1924_v11 = vsel %vm975_vm0, %v811_v59, 0.0  ;;  %v2053_v33 = vsel %vm975_vm0, %v854_v30, 0.0 }
 0x2a7   :  { %v4741_v62 = vrot.slane %v1782_v24, %v7753_v2  ;;  %v4746_v23 = vrot.slane %v1785_v1, %v7744_v60  ;;  %v349_v1 = vld [vmem:[%s11207_s0 + $0xa70] sm:$0xff] }
 0x2a8   :  { %v829_v38 = vmax.f32 %v349_v1, 0.0  ;;  %v376_v1 = vld [vmem:[%s11207_s0 + $0xb48] sm:$0xff] }
 0x2a9   :  { %v4742_v27 = vsel %vm11211_vm12, %v4741_v62, %v4737_v36  ;;  %1973 = vadd.xlane.f32.xlu1 %v1972_v63  ;;  %1922 = vadd.xlane.f32.xlu0 %v1921_v17  ;;  %vm5785_vm12 = vcmask 1041409   ;;  %v4678_v17 = vsel %vm3492_vm15, %v4677_v52, %v4673_v0  ;;  %v812_v62 = vmax.f32 %v332_v13, 0.0  ;;  %v358_v36 = vld [vmem:[%s11207_s0 + $0xab8] sm:$0xff] }
 0x2aa   :  { %v1791_v25 = vpop.xlane.xlu1 %1790  ;;  %v1788_v10 = vpop.xlane.xlu0 %1787  ;;  %v4747_v9 = vsel %vm3478_vm13, %v4746_v23, %v4742_v27  ;;  %v5786_v18 = vsel %vm5785_vm12, %v4678_v17, %v7793_v47  ;;  %v375_v23 = vld [vmem:[%s11207_s0 + $0xb40] sm:$0xff]  ;;  %v1978_v47 = vsel %vm975_vm0, %v829_v38, 0.0  ;;  %v6918_v27 = vld [vmem:[%s11208_s1 + $0x178] sm:$0xff]  }
 0x2ab   :  { %v4756_v45 = vrot.slane %v1791_v25, %v7764_v19  ;;  %v4751_v57 = vrot.slane %v1788_v10, %v7775_v20  ;;  %v1927_v52 = vsel %vm975_vm0, %v812_v62, 0.0  ;;  %v855_v25 = vmax.f32 %v375_v23, 0.0 }
 0x2ac   :  { %v838_v10 = vmax.f32 %v358_v36, 0.0  ;;  %v6582_v0 = vunpack.c.l.bf16 %v6918_v27  ;;  %v856_v36 = vmax.f32 %v376_v1, 0.0 }
 0x2ad   :  { %2051 = vadd.xlane.f32.xlu1 %v2050_v56  ;;  %2000 = vadd.xlane.f32.xlu0 %v1999_v34  ;;  %v4752_v3 = vsel %vm3485_vm14, %v4751_v57, %v4747_v9  ;;  %v350_v56 = vld [vmem:[%s11207_s0 + $0xa78] sm:$0xff]  ;;  %v6583_v34 = vunpack.c.h.bf16 %v6918_v27  ;;  %v6551_v57 = vunpack.c.h.bf16 %v6910_v14  ;;  %v6917_v9 = vld [vmem:[%s11208_s1 + $0x170] sm:$0xff]   ;;  %v360_v27 = vld [vmem:[%s11207_s0 + $0xac8] sm:$0xff] }
 0x2ae   :  { %v9485_v15 = vpop.xlane.xlu1 %1796  ;;  %v9487_v28 = vpop.xlane.xlu0 %1793  ;;  %v4757_v63 = vsel %vm3492_vm15, %v4756_v45, %v4752_v3  ;;  %v333_v45 = vld [vmem:[%s11207_s0 + $0x9f0] sm:$0xff]  ;;  %v830_v49 = vmax.f32 %v350_v56, 0.0  ;;  %v6579_v30 = vunpack.c.h.bf16 %v6917_v9  ;;  %v840_v14 = vmax.f32 %v360_v27, 0.0 }
 0x2af   :  { %v5787_v24 = vsel %vm5785_vm12, %v4757_v63, %v7893_v50  ;;  %v2002_v50 = vsel %vm975_vm0, %v837_v46, 0.0  ;;  %7061 = vmatprep.subr.mxu0 %v6583_v34  ;;  %v2005_v63 = vsel %vm975_vm0, %v838_v10, 0.0  ;;  %v813_v17 = vmax.f32 %v333_v45, 0.0  ;;  %v6909_v46 = vld [vmem:[%s11208_s1 + $0x130] sm:$0xff]   ;;  %v334_v10 = vld [vmem:[%s11207_s0 + $0x9f8] sm:$0xff]  ;;  %v6915_v45 = vld [vmem:[%s11208_s1 + $0x160] sm:$0xff]  }
 0x2b0   :  { %5880 = vmatprep.mubr.f32.mxu0 %v5787_v24  ;;  %v359_v24 = vld [vmem:[%s11207_s0 + $0xac0] sm:$0xff]  ;;  %v6547_v13 = vunpack.c.h.bf16 %v6909_v46  ;;  %v1981_v38 = vsel %vm975_vm0, %v830_v49, 0.0  ;;  %v2059_v49 = vsel %vm975_vm0, %v856_v36, 0.0  ;;  %v6571_v1 = vunpack.c.h.bf16 %v6915_v45  ;;  %v362_v36 = vld [vmem:[%s11207_s0 + $0xad8] sm:$0xff] }
 0x2b1   :  { %1976 = vadd.xlane.f32.xlu1 %v1975_v37  ;;  %1925 = vadd.xlane.f32.xlu0 %v1924_v11  ;;  %v2056_v11 = vsel %vm975_vm0, %v855_v25, 0.0  ;;  %v1930_v23 = vsel %vm975_vm0, %v813_v17, 0.0  ;;  %v6908_v25 = vld [vmem:[%s11208_s1 + $0x128] sm:$0xff]   ;;  %v377_v17 = vld [vmem:[%s11207_s0 + $0xb50] sm:$0xff] }
 0x2b2   :  { %5881 = vmatmul.mubr.f32.vlgmr.msra.gmra.mxu0 %v5786_v18  ;;  %v9501_v6 = vpop.xlane.xlu1 %1802  ;;  %v9503_v31 = vpop.xlane.xlu0 %1799  ;;  %v6578_v18 = vunpack.c.l.bf16 %v6917_v9  ;;  %v6543_v34 = vunpack.c.h.bf16 %v6908_v25  ;;  %v814_v9 = vmax.f32 %v334_v10, 0.0 }
 0x2b3   :  { %7062 = vmatpush3.msra.mxu0 %v6551_v57 }
 0x2b4   :  { %7063 = vmatprep.subr.mxu0 %v6582_v0 }
 0x2b5   :  { %2054 = vadd.xlane.f32.xlu1 %v2053_v33  ;;  %2003 = vadd.xlane.f32.xlu0 %v2002_v50  ;;  %v6916_v33 = vld [vmem:[%s11208_s1 + $0x168] sm:$0xff]  }
 0x2b6   :  { %v9517_v55 = vpop.xlane.xlu1 %1808  ;;  %v9519_v59 = vpop.xlane.xlu0 %1805  ;;  %7064 = vmatpush3.msra.mxu0 %v6550_v26  ;;  %v6575_v56 = vunpack.c.h.bf16 %v6916_v33 }
 0x2b7   :  { %7065 = vmatprep.subr.mxu0 %v6579_v30  ;;  %v6542_v30 = vunpack.c.l.bf16 %v6908_v25  ;;  %v6914_v25 = vld [vmem:[%s11208_s1 + $0x158] sm:$0xff]  }
 0x2b8   :  { %7066 = vmatpush3.msra.mxu0 %v6547_v13 }
 0x2b9   :  { %1979 = vadd.xlane.f32.xlu1 %v1978_v47  ;;  %1928 = vadd.xlane.f32.xlu0 %v1927_v52  ;;  %v839_v47 = vmax.f32 %v359_v24, 0.0  ;;  %v6546_v52 = vunpack.c.l.bf16 %v6909_v46  ;;  %v6907_v46 = vld [vmem:[%s11208_s1 + $0x120] sm:$0xff]   ;;  %v2011_v24 = vsel %vm975_vm0, %v840_v14, 0.0 }
 0x2ba   :  { %v9534_v3 = vpop.xlane.xlu1 %1814  ;;  %v9536_v37 = vpop.xlane.xlu0 %1811  ;;  %7067 = vmatprep.subr.mxu0 %v6578_v18  ;;  %v6539_v27 = vunpack.c.h.bf16 %v6907_v46  ;;  %v6538_v10 = vunpack.c.l.bf16 %v6907_v46  ;;  %v6566_v46 = vunpack.c.l.bf16 %v6914_v25 }
 0x2bb   :  { %v2008_v26 = vsel %vm975_vm0, %v839_v47, 0.0  ;;  %7068 = vmatpush3.msra.mxu0 %v6546_v52  ;;  %v378_v47 = vld [vmem:[%s11207_s0 + $0xb58] sm:$0xff]  ;;  %v6570_v52 = vunpack.c.l.bf16 %v6915_v45 }
 0x2bc   :  { %7069 = vmatprep.subr.mxu0 %v6575_v56  ;;  %v6906_v56 = vld [vmem:[%s11208_s1 + $0x118] sm:$0xff]   ;;  %v858_v14 = vmax.f32 %v378_v47, 0.0  ;;  %v4761_v47 = vrot.slane %v9487_v28, %v7646_v39  ;;  %v4770_v28 = vrot.slane %v9503_v31, %v7656_v43  ;;  %v9653_v31 = vld [vmem:[%s11208_s1 + $0x148] sm:$0xff]  }
 0x2bd   :  { %2057 = vadd.xlane.f32.xlu1 %v2056_v11  ;;  %2006 = vadd.xlane.f32.xlu0 %v2005_v63  ;;  %v6574_v11 = vunpack.c.l.bf16 %v6916_v33  ;;  %v361_v63 = vld [vmem:[%s11207_s0 + $0xad0] sm:$0xff] }
 0x2be   :  { %v9553_v50 = vpop.xlane.xlu1 %1820  ;;  %v9555_v62 = vpop.xlane.xlu0 %1817  ;;  %7070 = vmatpush3.msra.mxu0 %v6543_v34  ;;  %v841_v33 = vmax.f32 %v361_v63, 0.0  ;;  %v842_v34 = vmax.f32 %v362_v36, 0.0  ;;  %v6567_v63 = vunpack.c.h.bf16 %v6914_v25  ;;  %v4765_v36 = vrot.slane %v9485_v15, %v7652_v41  ;;  %v9640_v15 = vld [vmem:[%s11208_s1 + $0x1f8] sm:$0xff]  }
 0x2bf   :  { %7071 = vmatprep.subr.mxu0 %v6574_v11  ;;  %v363_v11 = vld [vmem:[%s11207_s0 + $0xae0] sm:$0xff] }
 0x2c0   :  { %7072 = vmatpush3.msra.mxu0 %v6542_v30  ;;  %v2014_v45 = vsel %vm975_vm0, %v841_v33, 0.0  ;;  %v6535_v30 = vunpack.c.h.bf16 %v6906_v56  ;;  %v843_v33 = vmax.f32 %v363_v11, 0.0 }
 0x2c1   :  { %1982 = vadd.xlane.f32.xlu1 %v1981_v38  ;;  %1931 = vadd.xlane.f32.xlu0 %v1930_v23  ;;  %v1933_v38 = vsel %vm975_vm0, %v814_v9, 0.0  ;;  %v857_v23 = vmax.f32 %v377_v17, 0.0  ;;  %v379_v17 = vld [vmem:[%s11207_s0 + $0xb60] sm:$0xff] }
 0x2c2   :  { %v9570_v57 = vpop.xlane.xlu1 %1826  ;;  %v9572_v0 = vpop.xlane.xlu0 %1823  ;;  %7073 = vmatprep.subr.mxu0 %v6571_v1  ;;  %v9618_v1 = vld [vmem:[%s11208_s1 + $0x150] sm:$0xff]   ;;  %v859_v25 = vmax.f32 %v379_v17, 0.0 }
 0x2c3   :  { %v2062_v9 = vsel %vm975_vm0, %v857_v23, 0.0  ;;  %7074 = vmatpush3.msra.mxu0 %v6539_v27  ;;  %v9625_v23 = vld [vmem:[%s11208_s1 + $0x110] sm:$0xff]  }
 0x2c4   :  { %7075 = vmatprep.subr.mxu0 %v6570_v52  ;;  %v6531_v17 = vunpack.c.h.bf16 %v9625_v23  ;;  %v2068_v8 = vsel %vm975_vm0, %v859_v25, 0.0  ;;  %v6530_v25 = vunpack.c.l.bf16 %v9625_v23 }
 0x2c5   :  { %2060 = vadd.xlane.f32.xlu1 %v2059_v49  ;;  %2009 = vadd.xlane.f32.xlu0 %v2008_v26 }
 0x2c6   :  { %v9586_v13 = vpop.xlane.xlu1 %1832  ;;  %v9588_v18 = vpop.xlane.xlu0 %1829  ;;  %7076 = vmatpush3.msra.mxu0 %v6538_v10  ;;  %v364_v10 = vld [vmem:[%s11207_s0 + $0xae8] sm:$0xff] }
 0x2c7   :  { %7077 = vmatprep.subr.mxu0 %v6567_v63  ;;  %v2020_v63 = vsel %vm975_vm0, %v843_v33, 0.0  ;;  %v844_v21 = vmax.f32 %v364_v10, 0.0  ;;  %v6904_v10 = vld [vmem:[%s11208_s1 + $0x108] sm:$0xff]  }
 0x2c8   :  { %7078 = vmatpush3.msra.mxu0 %v6535_v30  ;;  %v4766_v30 = vsel %vm3394_vm1, %v4765_v36, %v4761_v47  ;;  %v4780_v36 = vrot.slane %v9519_v59, %v7675_v58  ;;  %v6559_v59 = vunpack.c.h.bf16 %v9653_v31 }
 0x2c9   :  { %2012 = vadd.xlane.f32.xlu1 %v2011_v24  ;;  %1934 = vadd.xlane.f32.xlu0 %v1933_v38  ;;  %v2017_v24 = vsel %vm975_vm0, %v842_v34, 0.0  ;;  %v2065_v38 = vsel %vm975_vm0, %v858_v14, 0.0  ;;  %v380_v34 = vld [vmem:[%s11207_s0 + $0xb68] sm:$0xff]  ;;  %v6534_v14 = vunpack.c.l.bf16 %v6906_v56  ;;  %v6647_v56 = vunpack.c.h.bf16 %v9640_v15 }
 0x2ca   :  { %v9603_v49 = vpop.xlane.xlu1 %1838  ;;  %v9605_v26 = vpop.xlane.xlu0 %1835  ;;  %7079 = vmatprep.subr.mxu0 %v6566_v46  ;;  %v860_v44 = vmax.f32 %v380_v34, 0.0  ;;  %v4775_v46 = vrot.slane %v9501_v6, %v7649_v40  ;;  %v4771_v33 = vsel %vm3401_vm2, %v4770_v28, %v4766_v30  ;;  %v381_v6 = vld [vmem:[%s11207_s0 + $0xb70] sm:$0xff]  ;;  %v2023_v28 = vsel %vm975_vm0, %v844_v21, 0.0 }
 0x2cb   :  { %7080 = vmatpush3.msra.mxu0 %v6534_v14  ;;  %7096 = vmatprep.subr.mxu1 %v6647_v56  ;;  %v4785_v56 = vrot.slane %v9517_v55, %v7664_v51  ;;  %v6527_v21 = vunpack.c.h.bf16 %v6904_v10  ;;  %v4790_v55 = vrot.slane %v9536_v37, %v7686_v5 }
 0x2cc   :  { %v4776_v30 = vsel %vm3408_vm3, %v4775_v46, %v4771_v33  ;;  %v6558_v46 = vunpack.c.l.bf16 %v9653_v31 }
 0x2cd   :  { %2015 = vadd.xlane.f32.xlu1 %v2014_v45  ;;  %2063 = vadd.xlane.f32.xlu0 %v2062_v9  ;;  %v6563_v45 = vunpack.c.h.bf16 %v9618_v1 }
 0x2ce   :  { %v1845_v27 = vpop.xlane.xlu1 %1844  ;;  %v1842_v52 = vpop.xlane.xlu0 %1841 }
 0x2cf   :  { %v4844_v9 = vrot.slane %v1845_v27, %v7652_v41  ;;  %v4840_v11 = vrot.slane %v1842_v52, %v7646_v39  ;;  %7081 = vmatprep.subr.mxu0 %v6563_v45  ;;  %v2071_v45 = vsel %vm975_vm0, %v860_v44, 0.0  ;;  %v4781_v44 = vsel %vm3415_vm4, %v4780_v36, %v4776_v30  ;;  %v6903_v36 = vld [vmem:[%s11208_s1 + $0x100] sm:$0xff]  }
 0x2d0   :  { %7082 = vmatpush3.msra.mxu0 %v6531_v17  ;;  %v366_v17 = vld [vmem:[%s11207_s0 + $0xaf8] sm:$0xff] }
 0x2d1   :  { %2018 = vadd.xlane.f32.xlu1 %v2017_v24  ;;  %2066 = vadd.xlane.f32.xlu0 %v2065_v38  ;;  %v365_v24 = vld [vmem:[%s11207_s0 + $0xaf0] sm:$0xff]  ;;  %v6562_v38 = vunpack.c.l.bf16 %v9618_v1  ;;  %v4845_v1 = vsel %vm3394_vm1, %v4844_v9, %v4840_v11 }
 0x2d2   :  { %v1851_v27 = vpop.xlane.xlu1 %1850  ;;  %v1848_v52 = vpop.xlane.xlu0 %1847  ;;  %v845_v23 = vmax.f32 %v365_v24, 0.0 }
 0x2d3   :  { %v4849_v47 = vrot.slane %v1848_v52, %v7656_v43  ;;  %v4854_v34 = vrot.slane %v1851_v27, %v7649_v40  ;;  %v861_v27 = vmax.f32 %v381_v6, 0.0  ;;  %7083 = vmatprep.subr.mxu0 %v6562_v38  ;;  %v6911_v52 = vld [vmem:[%s11208_s1 + $0x140] sm:$0xff]   ;;  %v6526_v38 = vunpack.c.l.bf16 %v6904_v10 }
 0x2d4   :  { %7084 = vmatpush3.msra.mxu0 %v6530_v25  ;;  %v2026_v31 = vsel %vm975_vm0, %v845_v23, 0.0  ;;  %v4795_v25 = vrot.slane %v9534_v3, %v7683_v4  ;;  %v4800_v23 = vrot.slane %v9555_v62, %v7716_v29  ;;  %v399_v3 = vld [vmem:[%s11207_s0 + $0xc00] sm:$0xff] }
 0x2d5   :  { %v4850_v14 = vsel %vm3401_vm2, %v4849_v47, %v4845_v1  ;;  %2021 = vadd.xlane.f32.xlu1 %v2020_v63  ;;  %2069 = vadd.xlane.f32.xlu0 %v2068_v8  ;;  %v382_v8 = vld [vmem:[%s11207_s0 + $0xb78] sm:$0xff]  ;;  %v846_v47 = vmax.f32 %v366_v17, 0.0  ;;  %v4786_v1 = vsel %vm3422_vm5, %v4785_v56, %v4781_v44  ;;  %v2074_v10 = vsel %vm975_vm0, %v861_v27, 0.0 }
 0x2d6   :  { %v1857_v9 = vpop.xlane.xlu1 %1856  ;;  %v1854_v11 = vpop.xlane.xlu0 %1853  ;;  %v4855_v33 = vsel %vm3408_vm3, %v4854_v34, %v4850_v14  ;;  %7085 = vmatprep.subr.mxu0 %v6559_v59  ;;  %v862_v6 = vmax.f32 %v382_v8, 0.0  ;;  %v400_v14 = vld [vmem:[%s11207_s0 + $0xc08] sm:$0xff]  ;;  %v6523_v56 = vunpack.c.h.bf16 %v6903_v36  ;;  %v6554_v27 = vunpack.c.l.bf16 %v6911_v52 }
 0x2d7   :  { %v4859_v63 = vrot.slane %v1854_v11, %v7675_v58  ;;  %v4864_v24 = vrot.slane %v1857_v9, %v7664_v51  ;;  %7086 = vmatpush3.msra.mxu0 %v6527_v21  ;;  %v2029_v62 = vsel %vm975_vm0, %v846_v47, 0.0  ;;  %v880_v21 = vmax.f32 %v400_v14, 0.0 }
 0x2d8   :  { %7087 = vmatprep.subr.mxu0 %v6558_v46  ;;  %v2077_v8 = vsel %vm975_vm0, %v862_v6, 0.0  ;;  %v4805_v44 = vrot.slane %v9553_v50, %v7707_v22  ;;  %v4810_v50 = vrot.slane %v9572_v0, %v7733_v48 }
 0x2d9   :  { %v4860_v37 = vsel %vm3415_vm4, %v4859_v63, %v4855_v33  ;;  %2024 = vadd.xlane.f32.xlu1 %v2023_v28  ;;  %2072 = vadd.xlane.f32.xlu0 %v2071_v45  ;;  %v6555_v28 = vunpack.c.h.bf16 %v6911_v52  ;;  %v4791_v45 = vsel %vm3429_vm6, %v4790_v55, %v4786_v1  ;;  %v879_v33 = vmax.f32 %v399_v3, 0.0  ;;  %v384_v52 = vld [vmem:[%s11207_s0 + $0xb88] sm:$0xff]  ;;  %v401_v3 = vld [vmem:[%s11207_s0 + $0xc10] sm:$0xff] }
 0x2da   :  { %v1863_v34 = vpop.xlane.xlu1 %1862  ;;  %v1860_v59 = vpop.xlane.xlu0 %1859  ;;  %v4865_v11 = vsel %vm3422_vm5, %v4864_v24, %v4860_v37  ;;  %7088 = vmatpush3.msra.mxu0 %v6526_v38  ;;  %v4796_v55 = vsel %vm11215_vm7, %v4795_v25, %v4791_v45  ;;  %v383_v24 = vld [vmem:[%s11207_s0 + $0xb80] sm:$0xff]  ;;  %v6522_v38 = vunpack.c.l.bf16 %v6903_v36  ;;  %v864_v1 = vmax.f32 %v384_v52, 0.0 }
 0x2db   :  { %v4869_v30 = vrot.slane %v1860_v59, %v7686_v5  ;;  %v4874_v9 = vrot.slane %v1863_v34, %v7683_v4  ;;  %7089 = vmatprep.subr.mxu0 %v6555_v28  ;;  %v4801_v37 = vsel %vm11214_vm8, %v4800_v23, %v4796_v55  ;;  %v863_v34 = vmax.f32 %v383_v24, 0.0 }
 0x2dc   :  { %7090 = vmatpush3.msra.mxu0 %v6523_v56  ;;  %v4815_v36 = vrot.slane %v9570_v57, %v7724_v42  ;;  %v4806_v59 = vsel %vm11213_vm9, %v4805_v44, %v4801_v37  ;;  %v2131_v14 = vsel %vm975_vm0, %v880_v21, 0.0  ;;  %v2128_v28 = vsel %vm975_vm0, %v879_v33, 0.0  ;;  %v385_v57 = vld [vmem:[%s11207_s0 + $0xb90] sm:$0xff] }
 0x2dd   :  { %v4870_v17 = vsel %vm3429_vm6, %v4869_v30, %v4865_v11  ;;  %2027 = vadd.xlane.f32.xlu1 %v2026_v31  ;;  %2075 = vadd.xlane.f32.xlu0 %v2074_v10  ;;  %v4811_v45 = vsel %vm11212_vm10, %v4810_v50, %v4806_v59  ;;  %v4820_v23 = vrot.slane %v9588_v18, %v7753_v2  ;;  %v2083_v18 = vsel %vm975_vm0, %v864_v1, 0.0 }
 0x2de   :  { %v1869_v63 = vpop.xlane.xlu1 %1868  ;;  %v1866_v46 = vpop.xlane.xlu0 %1865  ;;  %v4875_v6 = vsel %vm11215_vm7, %v4874_v9, %v4870_v17  ;;  %7091 = vmatprep.subr.mxu0 %v6554_v27  ;;  %v2080_v27 = vsel %vm975_vm0, %v863_v34, 0.0  ;;  %v4825_v17 = vrot.slane %v9586_v13, %v7744_v60  ;;  %v865_v44 = vmax.f32 %v385_v57, 0.0 }
 0x2df   :  { %v4879_v31 = vrot.slane %v1866_v46, %v7716_v29  ;;  %v4884_v47 = vrot.slane %v1869_v63, %v7707_v22  ;;  %7092 = vmatpush3.msra.mxu0 %v6522_v38  ;;  %v881_v55 = vmax.f32 %v401_v3, 0.0  ;;  %v386_v63 = vld [vmem:[%s11207_s0 + $0xb98] sm:$0xff]  ;;  %v4830_v52 = vrot.slane %v9605_v26, %v7775_v20 }
 0x2e0   :  { %v402_v46 = vld [vmem:[%s11207_s0 + $0xc18] sm:$0xff]  ;;  %v866_v50 = vmax.f32 %v386_v63, 0.0  ;;  %v2086_v1 = vsel %vm975_vm0, %v865_v44, 0.0  ;;  %v6933_v63 = vld [vmem:[%s11208_s1 + $0x1f0] sm:$0xff]  }
 0x2e1   :  { %v4880_v25 = vsel %vm11214_vm8, %v4879_v31, %v4875_v6  ;;  %2030 = vadd.xlane.f32.xlu1 %v2029_v62  ;;  %2078 = vadd.xlane.f32.xlu0 %v2077_v8  ;;  %v4816_v62 = vsel %vm3464_vm11, %v4815_v36, %v4811_v45  ;;  %v882_v31 = vmax.f32 %v402_v46, 0.0  ;;  %v2134_v26 = vsel %vm975_vm0, %v881_v55, 0.0 }
 0x2e2   :  { %v1875_v0 = vpop.xlane.xlu1 %1874  ;;  %v1872_v10 = vpop.xlane.xlu0 %1871  ;;  %v4885_v9 = vsel %vm11213_vm9, %v4884_v47, %v4880_v25  ;;  %v4835_v47 = vrot.slane %v9603_v49, %v7764_v19  ;;  %v403_v49 = vld [vmem:[%s11207_s0 + $0xc20] sm:$0xff]  ;;  %v6646_v55 = vunpack.c.l.bf16 %v9640_v15 }
 0x2e3   :  { %v4889_v30 = vrot.slane %v1872_v10, %v7733_v48  ;;  %v4894_v56 = vrot.slane %v1875_v0, %v7724_v42  ;;  %v387_v10 = vld [vmem:[%s11207_s0 + $0xba0] sm:$0xff] }
 0x2e5   :  { %v4890_v11 = vsel %vm11212_vm10, %v4889_v30, %v4885_v9  ;;  %2132 = vadd.xlane.f32.xlu1 %v2131_v14  ;;  %2129 = vadd.xlane.f32.xlu0 %v2128_v28  ;;  %vm11223_vm10 = vcmask 851712   ;;  %v6926_v28 = vld [vmem:[%s11208_s1 + $0x1b8] sm:$0xff]   ;;  %v2137_v30 = vsel %vm975_vm0, %v882_v31, 0.0 }
 0x2e6   :  { %v1881_v8 = vpop.xlane.xlu1 %1880  ;;  %v1878_v21 = vpop.xlane.xlu0 %1877  ;;  %v4821_v33 = vsel %vm11223_vm10, %v4820_v23, %v4816_v62  ;;  %v4895_v38 = vsel %vm3464_vm11, %v4894_v56, %v4890_v11  ;;  %vm11224_vm9 = vmmov %vm11223_vm10  ;;  %v2089_v23 = vsel %vm975_vm0, %v866_v50, 0.0  ;;  %v867_v11 = vmax.f32 %v387_v10, 0.0 }
 0x2e7   :  { %v4899_v13 = vrot.slane %v1878_v21, %v7753_v2  ;;  %v4904_v24 = vrot.slane %v1881_v8, %v7744_v60  ;;  %v4826_v34 = vsel %vm3478_vm13, %v4825_v17, %v4821_v33  ;;  %v404_v21 = vld [vmem:[%s11207_s0 + $0xc28] sm:$0xff]  ;;  %v6615_v44 = vunpack.c.h.bf16 %v6926_v28 }
 0x2e8   :  { %v4831_v0 = vsel %vm3485_vm14, %v4830_v52, %v4826_v34  ;;  %v6925_v52 = vld [vmem:[%s11208_s1 + $0x1b0] sm:$0xff]   ;;  %v2092_v15 = vsel %vm975_vm0, %v867_v11, 0.0  ;;  %v6614_v50 = vunpack.c.l.bf16 %v6926_v28  ;;  %v431_v28 = vld [vmem:[%s11207_s0 + $0xd00] sm:$0xff]  ;;  %vm11226_vm10 = vcmask 720512  }
 0x2e9   :  { %v4900_v37 = vsel %vm11224_vm9, %v4899_v13, %v4895_v38  ;;  %2084 = vadd.xlane.f32.xlu1 %v2083_v18  ;;  %2081 = vadd.xlane.f32.xlu0 %v2080_v27  ;;  %v4836_v9 = vsel %vm3492_vm15, %v4835_v47, %v4831_v0  ;;  %v883_v18 = vmax.f32 %v403_v49, 0.0  ;;  %v388_v27 = vld [vmem:[%s11207_s0 + $0xba8] sm:$0xff]  ;;  %vm11225_vm9 = vcmask 654912  }
 0x2ea   :  { %v1887_v6 = vpop.xlane.xlu1 %1886  ;;  %v1884_v25 = vpop.xlane.xlu0 %1883  ;;  %v4905_v14 = vsel %vm3478_vm13, %v4904_v24, %v4900_v37  ;;  %v5788_v33 = vsel %vm5785_vm12, %v4836_v9, %v7990_v54  ;;  %v884_v37 = vmax.f32 %v404_v21, 0.0  ;;  %v389_v54 = vld [vmem:[%s11207_s0 + $0xbb0] sm:$0xff] }
 0x2eb   :  { %v4914_v36 = vrot.slane %v1887_v6, %v7764_v19  ;;  %v4909_v59 = vrot.slane %v1884_v25, %v7775_v20  ;;  %v2140_v38 = vsel %vm975_vm0, %v883_v18, 0.0  ;;  %v405_v6 = vld [vmem:[%s11207_s0 + $0xc30] sm:$0xff]  ;;  %v6643_v25 = vunpack.c.h.bf16 %v6933_v63 }
 0x2ec   :  { %v2143_v10 = vsel %vm975_vm0, %v884_v37, 0.0  ;;  %v869_v49 = vmax.f32 %v389_v54, 0.0 }
 0x2ed   :  { %2087 = vadd.xlane.f32.xlu1 %v2086_v1  ;;  %2135 = vadd.xlane.f32.xlu0 %v2134_v26  ;;  %v4910_v45 = vsel %vm3485_vm14, %v4909_v59, %v4905_v14  ;;  %v6611_v1 = vunpack.c.h.bf16 %v6925_v52  ;;  %v885_v14 = vmax.f32 %v405_v6, 0.0 }
 0x2ee   :  { %v1941_v57 = vpop.xlane.xlu1 %1940  ;;  %v1938_v3 = vpop.xlane.xlu0 %1937  ;;  %v4915_v56 = vsel %vm3492_vm15, %v4914_v36, %v4910_v45  ;;  %v6932_v36 = vld [vmem:[%s11208_s1 + $0x1e8] sm:$0xff]   ;;  %v6642_v45 = vunpack.c.l.bf16 %v6933_v63 }
 0x2ef   :  { %v5002_v17 = vrot.slane %v1941_v57, %v7652_v41  ;;  %v4998_v62 = vrot.slane %v1938_v3, %v7646_v39  ;;  %v5789_v8 = vsel %vm5785_vm12, %v4915_v56, %v8087_v61  ;;  %v868_v61 = vmax.f32 %v388_v27, 0.0  ;;  %v406_v57 = vld [vmem:[%s11207_s0 + $0xc38] sm:$0xff]  ;;  %v6924_v56 = vld [vmem:[%s11208_s1 + $0x1a8] sm:$0xff]  }
 0x2f0   :  { %5950 = vmatprep.mubr.f32.mxu1 %v5789_v8  ;;  %v6610_v3 = vunpack.c.l.bf16 %v6925_v52  ;;  %v6639_v9 = vunpack.c.h.bf16 %v6932_v36  ;;  %v911_v27 = vmax.f32 %v431_v28, 0.0  ;;  %v2098_v8 = vsel %vm975_vm0, %v869_v49, 0.0  ;;  %v6930_v49 = vld [vmem:[%s11208_s1 + $0x1d8] sm:$0xff]  }
 0x2f1   :  { %v5003_v46 = vsel %vm3394_vm1, %v5002_v17, %v4998_v62  ;;  %2090 = vadd.xlane.f32.xlu1 %v2089_v23  ;;  %2138 = vadd.xlane.f32.xlu0 %v2137_v30  ;;  %v2095_v34 = vsel %vm975_vm0, %v868_v61, 0.0  ;;  %v2146_v21 = vsel %vm975_vm0, %v885_v14, 0.0  ;;  %v432_v61 = vld [vmem:[%s11207_s0 + $0xd08] sm:$0xff]  ;;  %v6638_v52 = vunpack.c.l.bf16 %v6932_v36 }
 0x2f2   :  { %5951 = vmatmul.mubr.f32.vlgmr.msra.gmra.mxu1 %v5788_v33  ;;  %v1893_v13 = vpop.xlane.xlu1 %1892  ;;  %v1890_v24 = vpop.xlane.xlu0 %1889 }
 0x2f3   :  { %v4923_v31 = vrot.slane %v1893_v13, %v7652_v41  ;;  %v4919_v47 = vrot.slane %v1890_v24, %v7646_v39  ;;  %7097 = vmatpush3.msra.mxu1 %v6615_v44  ;;  %v886_v44 = vmax.f32 %v406_v57, 0.0  ;;  %v6931_v13 = vld [vmem:[%s11208_s1 + $0x1e0] sm:$0xff]   ;;  %v6606_v24 = vunpack.c.l.bf16 %v6924_v56 }
 0x2f4   :  { %7098 = vmatprep.subr.mxu1 %v6646_v55  ;;  %v6607_v55 = vunpack.c.h.bf16 %v6924_v56 }
 0x2f5   :  { %v4924_v26 = vsel %vm3394_vm1, %v4923_v31, %v4919_v47  ;;  %2093 = vadd.xlane.f32.xlu1 %v2092_v15  ;;  %2141 = vadd.xlane.f32.xlu0 %v2140_v38  ;;  %v6923_v15 = vld [vmem:[%s11208_s1 + $0x1a0] sm:$0xff]   ;;  %v2149_v54 = vsel %vm975_vm0, %v886_v44, 0.0 }
 0x2f6   :  { %v1896_v59 = vpop.xlane.xlu1 %1895  ;;  %v1944_v0 = vpop.xlane.xlu0 %1943  ;;  %7099 = vmatpush3.msra.mxu1 %v6614_v50  ;;  %v2224_v50 = vsel %vm975_vm0, %v911_v27, 0.0  ;;  %v433_v27 = vld [vmem:[%s11207_s0 + $0xd10] sm:$0xff] }
 0x2f7   :  { %v4928_v23 = vrot.slane %v1896_v59, %v7656_v43  ;;  %v5007_v30 = vrot.slane %v1944_v0, %v7656_v43  ;;  %7100 = vmatprep.subr.mxu1 %v6643_v25  ;;  %v912_v25 = vmax.f32 %v432_v61, 0.0  ;;  %v407_v59 = vld [vmem:[%s11207_s0 + $0xc40] sm:$0xff]  ;;  %v6603_v0 = vunpack.c.h.bf16 %v6923_v15 }
 0x2f8   :  { %7101 = vmatpush3.msra.mxu1 %v6611_v1  ;;  %v415_v1 = vld [vmem:[%s11207_s0 + $0xc80] sm:$0xff]  ;;  %v913_v61 = vmax.f32 %v433_v27, 0.0 }
 0x2f9   :  { %v4929_v11 = vsel %vm3401_vm2, %v4928_v23, %v4924_v26  ;;  %v5008_v18 = vsel %vm3401_vm2, %v5007_v30, %v5003_v46  ;;  %2096 = vadd.xlane.f32.xlu1 %v2095_v34  ;;  %2144 = vadd.xlane.f32.xlu0 %v2143_v10  ;;  %v390_v46 = vld [vmem:[%s11207_s0 + $0xbb8] sm:$0xff]  ;;  %v6635_v26 = vunpack.c.h.bf16 %v6931_v13  ;;  %v6634_v10 = vunpack.c.l.bf16 %v6931_v13  ;;  %v408_v13 = vld [vmem:[%s11207_s0 + $0xc48] sm:$0xff] }
 0x2fa   :  { %v1899_v17 = vpop.xlane.xlu1 %1898  ;;  %v1947_v62 = vpop.xlane.xlu0 %1946  ;;  %7102 = vmatprep.subr.mxu1 %v6642_v45  ;;  %v870_v6 = vmax.f32 %v390_v46, 0.0  ;;  %v895_v45 = vmax.f32 %v415_v1, 0.0  ;;  %v6922_v23 = vld [vmem:[%s11208_s1 + $0x198] sm:$0xff]   ;;  %v2227_v56 = vsel %vm975_vm0, %v912_v25, 0.0  ;;  %v2230_v1 = vsel %vm975_vm0, %v913_v61, 0.0  ;;  %v6919_v61 = vld [vmem:[%s11208_s1 + $0x180] sm:$0xff]  }
 0x2fb   :  { %v4933_v63 = vrot.slane %v1899_v17, %v7649_v40  ;;  %v5012_v33 = vrot.slane %v1947_v62, %v7649_v40  ;;  %7103 = vmatpush3.msra.mxu1 %v6610_v3  ;;  %v416_v17 = vld [vmem:[%s11207_s0 + $0xc88] sm:$0xff]  ;;  %v6631_v62 = vunpack.c.h.bf16 %v6930_v49 }
 0x2fc   :  { %7104 = vmatprep.subr.mxu1 %v6639_v9  ;;  %v2101_v3 = vsel %vm975_vm0, %v870_v6, 0.0  ;;  %v887_v9 = vmax.f32 %v407_v59, 0.0  ;;  %v2176_v44 = vsel %vm975_vm0, %v895_v45, 0.0  ;;  %v434_v59 = vld [vmem:[%s11207_s0 + $0xd18] sm:$0xff]  ;;  %v6920_v45 = vld [vmem:[%s11208_s1 + $0x188] sm:$0xff]  }
 0x2fd   :  { %v4934_v38 = vsel %vm3408_vm3, %v4933_v63, %v4929_v11  ;;  %v5013_v37 = vsel %vm3408_vm3, %v5012_v33, %v5008_v18  ;;  %2099 = vadd.xlane.f32.xlu1 %v2098_v8  ;;  %2147 = vadd.xlane.f32.xlu0 %v2146_v21  ;;  %v6602_v11 = vunpack.c.l.bf16 %v6923_v15  ;;  %v6599_v8 = vunpack.c.h.bf16 %v6922_v23 }
 0x2fe   :  { %v1902_v31 = vpop.xlane.xlu1 %1901  ;;  %v1950_v47 = vpop.xlane.xlu0 %1949  ;;  %7105 = vmatpush3.msra.mxu1 %v6607_v55  ;;  %v6929_v55 = vld [vmem:[%s11208_s1 + $0x1d0] sm:$0xff]   ;;  %v2152_v46 = vsel %vm975_vm0, %v887_v9, 0.0  ;;  %v914_v9 = vmax.f32 %v434_v59, 0.0 }
 0x2ff   :  { %v4938_v34 = vrot.slane %v1902_v31, %v7675_v58  ;;  %v5017_v36 = vrot.slane %v1950_v47, %v7675_v58  ;;  %7106 = vmatprep.subr.mxu1 %v6638_v52  ;;  %v896_v52 = vmax.f32 %v416_v17, 0.0  ;;  %v6627_v31 = vunpack.c.h.bf16 %v6929_v55 }
 0x300   :  { %7107 = vmatpush3.msra.mxu1 %v6606_v24  ;;  %v6630_v24 = vunpack.c.l.bf16 %v6930_v49  ;;  %v6928_v49 = vld [vmem:[%s11208_s1 + $0x1c8] sm:$0xff]  }
 0x301   :  { %v4939_v14 = vsel %vm3415_vm4, %v4938_v34, %v4934_v38  ;;  %v9880_v28 = vsel %vm3415_vm4, %v5017_v36, %v5013_v37  ;;  %2225 = vadd.xlane.f32.xlu1 %v2224_v50  ;;  %2150 = vadd.xlane.f32.xlu0 %v2149_v54  ;;  %v391_v38 = vld [vmem:[%s11207_s0 + $0xbc0] sm:$0xff]  ;;  %v6598_v37 = vunpack.c.l.bf16 %v6922_v23  ;;  %v6921_v50 = vld [vmem:[%s11208_s1 + $0x190] sm:$0xff]   ;;  %v888_v54 = vmax.f32 %v408_v13, 0.0 }
 0x302   :  { %v1905_v30 = vpop.xlane.xlu1 %1904  ;;  %v9885_v57 = vpop.xlane.xlu0 %1952  ;;  %7108 = vmatprep.subr.mxu1 %v6635_v26  ;;  %v2179_v26 = vsel %vm975_vm0, %v896_v52, 0.0  ;;  %v871_v34 = vmax.f32 %v391_v38, 0.0  ;;  %v6595_v36 = vunpack.c.h.bf16 %v6921_v50  ;;  %v6623_v27 = vunpack.c.h.bf16 %v6928_v49 }
 0x303   :  { %v4943_v18 = vrot.slane %v1905_v30, %v7664_v51  ;;  %7109 = vmatpush3.msra.mxu1 %v6603_v0  ;;  %v417_v0 = vld [vmem:[%s11207_s0 + $0xc90] sm:$0xff]  ;;  %v2155_v23 = vsel %vm975_vm0, %v888_v54, 0.0 }
 0x304   :  { %7110 = vmatprep.subr.mxu1 %v6634_v10  ;;  %v6626_v10 = vunpack.c.l.bf16 %v6929_v55  ;;  %v6927_v55 = vld [vmem:[%s11208_s1 + $0x1c0] sm:$0xff]  }
 0x305   :  { %v4944_v21 = vsel %vm3422_vm5, %v4943_v18, %v4939_v14  ;;  %2102 = vadd.xlane.f32.xlu1 %v2101_v3  ;;  %2228 = vadd.xlane.f32.xlu0 %v2227_v56  ;;  %v6594_v14 = vunpack.c.l.bf16 %v6921_v50  ;;  %v2104_v56 = vsel %vm975_vm0, %v871_v34, 0.0  ;;  %v409_v18 = vld [vmem:[%s11207_s0 + $0xc50] sm:$0xff]  ;;  %v435_v50 = vld [vmem:[%s11207_s0 + $0xd20] sm:$0xff]  ;;  %v6619_v54 = vunpack.c.h.bf16 %v6927_v55 }
 0x306   :  { %v1908_v63 = vpop.xlane.xlu1 %1907  ;;  %v9901_v33 = vpop.xlane.xlu0 %1955  ;;  %7111 = vmatpush3.msra.mxu1 %v6602_v11  ;;  %v897_v11 = vmax.f32 %v417_v0, 0.0  ;;  %v915_v59 = vmax.f32 %v435_v50, 0.0  ;;  %v411_v50 = vld [vmem:[%s11207_s0 + $0xc60] sm:$0xff] }
 0x307   :  { %v4948_v15 = vrot.slane %v1908_v63, %v7686_v5  ;;  %7112 = vmatprep.subr.mxu1 %v6631_v62 }
 0x308   :  { %7113 = vmatpush3.msra.mxu1 %v6599_v8  ;;  %v392_v8 = vld [vmem:[%s11207_s0 + $0xbc8] sm:$0xff] }
 0x309   :  { %v9915_v47 = vsel %vm3429_vm6, %v4948_v15, %v4944_v21  ;;  %2177 = vadd.xlane.f32.xlu1 %v2176_v44  ;;  %2153 = vadd.xlane.f32.xlu0 %v2152_v46  ;;  %v6591_v21 = vunpack.c.h.bf16 %v6920_v45  ;;  %v6622_v44 = vunpack.c.l.bf16 %v6928_v49  ;;  %v889_v46 = vmax.f32 %v409_v18, 0.0 }
 0x30a   :  { %v2034_v6 = vpop.xlane.xlu1 %2033  ;;  %v9917_v25 = vpop.xlane.xlu0 %1958  ;;  %7114 = vmatprep.subr.mxu1 %v6630_v24  ;;  %v2233_v24 = vsel %vm975_vm0, %v914_v9, 0.0  ;;  %v2182_v15 = vsel %vm975_vm0, %v897_v11, 0.0  ;;  %v872_v38 = vmax.f32 %v392_v8, 0.0 }
 0x30b   :  { %7115 = vmatpush3.msra.mxu1 %v6598_v37  ;;  %v5156_v17 = vrot.slane %v2034_v6, %v7646_v39  ;;  %v6590_v37 = vunpack.c.l.bf16 %v6920_v45  ;;  %v6587_v6 = vunpack.c.h.bf16 %v6919_v61 }
 0x30c   :  { %7116 = vmatprep.subr.mxu1 %v6627_v31  ;;  %v418_v31 = vld [vmem:[%s11207_s0 + $0xc98] sm:$0xff] }
 0x30d   :  { %2231 = vadd.xlane.f32.xlu1 %v2230_v1  ;;  %2180 = vadd.xlane.f32.xlu0 %v2179_v26  ;;  %v2158_v1 = vsel %vm975_vm0, %v889_v46, 0.0  ;;  %v898_v0 = vmax.f32 %v418_v31, 0.0  ;;  %v394_v31 = vld [vmem:[%s11207_s0 + $0xbd8] sm:$0xff] }
 0x30e   :  { %v9934_v30 = vpop.xlane.xlu1 %1910  ;;  %v2037_v3 = vpop.xlane.xlu0 %2036  ;;  %7117 = vmatpush3.msra.mxu1 %v6595_v36  ;;  %v2107_v36 = vsel %vm975_vm0, %v872_v38, 0.0 }
 0x30f   :  { %v5160_v62 = vrot.slane %v2037_v3, %v7652_v41  ;;  %7118 = vmatprep.subr.mxu1 %v6626_v10  ;;  %v6618_v10 = vunpack.c.l.bf16 %v6927_v55  ;;  %v393_v3 = vld [vmem:[%s11207_s0 + $0xbd0] sm:$0xff]  ;;  %v419_v55 = vld [vmem:[%s11207_s0 + $0xca0] sm:$0xff] }
 0x310   :  { %7119 = vmatpush3.msra.mxu1 %v6594_v14 }
 0x311   :  { %v5161_v63 = vsel %vm3394_vm1, %v5160_v62, %v5156_v17  ;;  %2156 = vadd.xlane.f32.xlu1 %v2155_v23  ;;  %2105 = vadd.xlane.f32.xlu0 %v2104_v56  ;;  %v410_v23 = vld [vmem:[%s11207_s0 + $0xc58] sm:$0xff]  ;;  %v6586_v56 = vunpack.c.l.bf16 %v6919_v61  ;;  %v2236_v17 = vsel %vm975_vm0, %v915_v59, 0.0  ;;  %v2185_v62 = vsel %vm975_vm0, %v898_v0, 0.0 }
 0x312   :  { %v1986_v52 = vpop.xlane.xlu1 %1985  ;;  %v9952_v13 = vpop.xlane.xlu0 %1961  ;;  %7120 = vmatprep.subr.mxu1 %v6623_v27  ;;  %v890_v8 = vmax.f32 %v410_v23, 0.0  ;;  %v891_v59 = vmax.f32 %v411_v50, 0.0  ;;  %v874_v0 = vmax.f32 %v394_v31, 0.0  ;;  %v413_v31 = vld [vmem:[%s11207_s0 + $0xc70] sm:$0xff] }
 0x313   :  { %7121 = vmatpush3.msra.mxu1 %v6591_v21  ;;  %v5077_v49 = vrot.slane %v1986_v52, %v7646_v39  ;;  %v873_v21 = vmax.f32 %v393_v3, 0.0 }
 0x314   :  { %7122 = vmatprep.subr.mxu1 %v6622_v44  ;;  %v436_v44 = vld [vmem:[%s11207_s0 + $0xd28] sm:$0xff]  ;;  %v2161_v61 = vsel %vm975_vm0, %v890_v8, 0.0  ;;  %v2164_v23 = vsel %vm975_vm0, %v891_v59, 0.0  ;;  %v2113_v3 = vsel %vm975_vm0, %v874_v0, 0.0 }
 0x315   :  { %2234 = vadd.xlane.f32.xlu1 %v2233_v24  ;;  %2183 = vadd.xlane.f32.xlu0 %v2182_v15  ;;  %v2110_v52 = vsel %vm975_vm0, %v873_v21, 0.0  ;;  %v916_v24 = vmax.f32 %v436_v44, 0.0  ;;  %v899_v15 = vmax.f32 %v419_v55, 0.0 }
 0x316   :  { %v2040_v26 = vpop.xlane.xlu1 %2039  ;;  %v1989_v34 = vpop.xlane.xlu0 %1988  ;;  %7123 = vmatpush3.msra.mxu1 %v6590_v37 }
 0x317   :  { %v5165_v14 = vrot.slane %v2040_v26, %v7656_v43  ;;  %v5081_v45 = vrot.slane %v1989_v34, %v7652_v41  ;;  %7124 = vmatprep.subr.mxu1 %v6619_v54  ;;  %v2239_v34 = vsel %vm975_vm0, %v916_v24, 0.0 }
 0x318   :  { %7125 = vmatpush3.msra.mxu1 %v6587_v6 }
 0x319   :  { %v5166_v9 = vsel %vm3401_vm2, %v5165_v14, %v5161_v63  ;;  %v5082_v11 = vsel %vm3394_vm1, %v5081_v45, %v5077_v49  ;;  %2159 = vadd.xlane.f32.xlu1 %v2158_v1  ;;  %2108 = vadd.xlane.f32.xlu0 %v2107_v36  ;;  %v2188_v36 = vsel %vm975_vm0, %v899_v15, 0.0  ;;  %v420_v49 = vld [vmem:[%s11207_s0 + $0xca8] sm:$0xff] }
 0x31a   :  { %v9975_v18 = vpop.xlane.xlu1 %1964  ;;  %v9977_v27 = vpop.xlane.xlu0 %1913  ;;  %7126 = vmatprep.subr.mxu1 %v6618_v10  ;;  %v437_v10 = vld [vmem:[%s11207_s0 + $0xd30] sm:$0xff] }
 0x31b   :  { %7127 = vmatpush3.msra.mxu1 %v6586_v56  ;;  %v917_v56 = vmax.f32 %v437_v10, 0.0 }
 0x31d   :  { %2237 = vadd.xlane.f32.xlu1 %v2236_v17  ;;  %2186 = vadd.xlane.f32.xlu0 %v2185_v62  ;;  %v395_v17 = vld [vmem:[%s11207_s0 + $0xbe0] sm:$0xff]  ;;  %v2242_v21 = vsel %vm975_vm0, %v917_v56, 0.0  ;;  %v422_v56 = vld [vmem:[%s11207_s0 + $0xcb8] sm:$0xff] }
 0x31e   :  { %v2043_v63 = vpop.xlane.xlu1 %2042  ;;  %v1992_v46 = vpop.xlane.xlu0 %1991 }
 0x31f   :  { %v5170_v38 = vrot.slane %v2043_v63, %v7649_v40  ;;  %v5086_v37 = vrot.slane %v1992_v46, %v7656_v43  ;;  %v875_v63 = vmax.f32 %v395_v17, 0.0  ;;  %v438_v46 = vld [vmem:[%s11207_s0 + $0xd38] sm:$0xff] }
 0x321   :  { %v9998_v54 = vsel %vm3408_vm3, %v5170_v38, %v5166_v9  ;;  %v10001_v6 = vsel %vm3401_vm2, %v5086_v37, %v5082_v11  ;;  %2162 = vadd.xlane.f32.xlu1 %v2161_v61  ;;  %2111 = vadd.xlane.f32.xlu0 %v2110_v52  ;;  %v900_v9 = vmax.f32 %v420_v49, 0.0  ;;  %v412_v11 = vld [vmem:[%s11207_s0 + $0xc68] sm:$0xff]  ;;  %v421_v61 = vld [vmem:[%s11207_s0 + $0xcb0] sm:$0xff]  ;;  %v2116_v38 = vsel %vm975_vm0, %v875_v63, 0.0 }
 0x322   :  { %v10003_v1 = vpop.xlane.xlu1 %1967  ;;  %v10005_v26 = vpop.xlane.xlu0 %1916  ;;  %v892_v55 = vmax.f32 %v412_v11, 0.0  ;;  %v918_v37 = vmax.f32 %v438_v46, 0.0  ;;  %v901_v50 = vmax.f32 %v421_v61, 0.0  ;;  %v10067_v11 = vld [vmem:[%s11208_s1 + $0x278] sm:$0xff]   ;;  %v902_v63 = vmax.f32 %v422_v56, 0.0 }
 0x323   :  { %v2191_v44 = vsel %vm975_vm0, %v900_v9, 0.0  ;;  %v6711_v46 = vunpack.c.h.bf16 %v10067_v11  ;;  %v414_v61 = vld [vmem:[%s11207_s0 + $0xc78] sm:$0xff] }
 0x324   :  { %v2167_v15 = vsel %vm975_vm0, %v892_v55, 0.0  ;;  %v2245_v10 = vsel %vm975_vm0, %v918_v37, 0.0  ;;  %v2194_v49 = vsel %vm975_vm0, %v901_v50, 0.0 }
 0x325   :  { %2240 = vadd.xlane.f32.xlu1 %v2239_v34  ;;  %2189 = vadd.xlane.f32.xlu0 %v2188_v36  ;;  %v396_v34 = vld [vmem:[%s11207_s0 + $0xbe8] sm:$0xff]  ;;  %v893_v36 = vmax.f32 %v413_v31, 0.0  ;;  %v2197_v31 = vsel %vm975_vm0, %v902_v63, 0.0 }
 0x326   :  { %v10015_v14 = vpop.xlane.xlu1 %2045  ;;  %v10017_v45 = vpop.xlane.xlu0 %1994  ;;  %7131 = vmatprep.subr.mxu0 %v6711_v46  ;;  %v424_v63 = vld [vmem:[%s11207_s0 + $0xcc8] sm:$0xff]  ;;  %v398_v46 = vld [vmem:[%s11207_s0 + $0xbf8] sm:$0xff] }
 0x327   :  { %v2170_v9 = vsel %vm975_vm0, %v893_v36, 0.0 }
 0x329   :  { %2165 = vadd.xlane.f32.xlu1 %v2164_v23  ;;  %2114 = vadd.xlane.f32.xlu0 %v2113_v3  ;;  %v876_v23 = vmax.f32 %v396_v34, 0.0  ;;  %v439_v3 = vld [vmem:[%s11207_s0 + $0xd40] sm:$0xff]  ;;  %v894_v34 = vmax.f32 %v414_v61, 0.0  ;;  %v5022_v61 = vrot.slane %v9885_v57, %v7664_v51 }
 0x32a   :  { %v10027_v62 = vpop.xlane.xlu1 %1970  ;;  %v10029_v8 = vpop.xlane.xlu0 %1919  ;;  %v919_v55 = vmax.f32 %v439_v3, 0.0 }
 0x32b   :  { %v2173_v56 = vsel %vm975_vm0, %v894_v34, 0.0  ;;  %v878_v34 = vmax.f32 %v398_v46, 0.0  ;;  %v426_v46 = vld [vmem:[%s11207_s0 + $0xcd8] sm:$0xff] }
 0x32c   :  { %v2248_v50 = vsel %vm975_vm0, %v919_v55, 0.0  ;;  %v906_v35 = vmax.f32 %v426_v46, 0.0  ;;  %v427_v46 = vld [vmem:[%s11207_s0 + $0xce0] sm:$0xff] }
 0x32d   :  { %2243 = vadd.xlane.f32.xlu1 %v2242_v21  ;;  %2192 = vadd.xlane.f32.xlu0 %v2191_v44  ;;  %v2119_v44 = vsel %vm975_vm0, %v876_v23, 0.0 }
 0x32e   :  { %v10039_v52 = vpop.xlane.xlu1 %2048  ;;  %v10041_v24 = vpop.xlane.xlu0 %1997 }
 0x331   :  { %2168 = vadd.xlane.f32.xlu1 %v2167_v15  ;;  %2117 = vadd.xlane.f32.xlu0 %v2116_v38  ;;  %v397_v15 = vld [vmem:[%s11207_s0 + $0xbf0] sm:$0xff] }
 0x332   :  { %v10051_v59 = vpop.xlane.xlu1 %1973  ;;  %v10053_v0 = vpop.xlane.xlu0 %1922  ;;  %v877_v36 = vmax.f32 %v397_v15, 0.0  ;;  %v5027_v15 = vrot.slane %v9901_v33, %v7686_v5  ;;  %v5023_v33 = vsel %vm3422_vm5, %v5022_v61, %v9880_v28  ;;  %v5052_v28 = vrot.slane %v10027_v62, %v7724_v42  ;;  %v442_v61 = vld [vmem:[%s11207_s0 + $0xd58] sm:$0xff] }
 0x335   :  { %2246 = vadd.xlane.f32.xlu1 %v2245_v10  ;;  %2195 = vadd.xlane.f32.xlu0 %v2194_v49  ;;  %v440_v10 = vld [vmem:[%s11207_s0 + $0xd48] sm:$0xff]  ;;  %v423_v49 = vld [vmem:[%s11207_s0 + $0xcc0] sm:$0xff] }
 0x336   :  { %v10069_v17 = vpop.xlane.xlu1 %2051  ;;  %v10071_v21 = vpop.xlane.xlu0 %2000  ;;  %v903_v55 = vmax.f32 %v423_v49, 0.0 }
 0x338   :  { %v2200_v57 = vsel %vm975_vm0, %v903_v55, 0.0 }
 0x339   :  { %2171 = vadd.xlane.f32.xlu1 %v2170_v9  ;;  %2120 = vadd.xlane.f32.xlu0 %v2119_v44  ;;  %v2122_v9 = vsel %vm975_vm0, %v877_v36, 0.0  ;;  %v920_v44 = vmax.f32 %v440_v10, 0.0  ;;  %v5037_v36 = vrot.slane %v9952_v13, %v7716_v29  ;;  %v441_v13 = vld [vmem:[%s11207_s0 + $0xd50] sm:$0xff] }
 0x33a   :  { %v10081_v38 = vpop.xlane.xlu1 %1976  ;;  %v10083_v37 = vpop.xlane.xlu0 %1925 }
 0x33b   :  { %v2251_v12 = vsel %vm975_vm0, %v920_v44, 0.0  ;;  %v5047_v44 = vrot.slane %v10003_v1, %v7733_v48 }
 0x33d   :  { %2249 = vadd.xlane.f32.xlu1 %v2248_v50  ;;  %2198 = vadd.xlane.f32.xlu0 %v2197_v31  ;;  %v5032_v50 = vrot.slane %v9917_v25, %v7683_v4  ;;  %v904_v31 = vmax.f32 %v424_v63, 0.0  ;;  %v5042_v25 = vrot.slane %v9975_v18, %v7707_v22  ;;  %v2125_v63 = vsel %vm975_vm0, %v878_v34, 0.0 }
 0x33e   :  { %v10093_v23 = vpop.xlane.xlu1 %2054  ;;  %v10095_v3 = vpop.xlane.xlu0 %2003 }
 0x33f   :  { %v2203_v18 = vsel %vm975_vm0, %v904_v31, 0.0  ;;  %v921_v31 = vmax.f32 %v441_v13, 0.0 }
 0x341   :  { %2174 = vadd.xlane.f32.xlu1 %v2173_v56  ;;  %2123 = vadd.xlane.f32.xlu0 %v2122_v9  ;;  %v425_v56 = vld [vmem:[%s11207_s0 + $0xcd0] sm:$0xff]  ;;  %v5028_v9 = vsel %vm3429_vm6, %v5027_v15, %v5023_v33  ;;  %v5057_v15 = vrot.slane %v10051_v59, %v7753_v2  ;;  %v4953_v59 = vrot.slane %v9934_v30, %v7683_v4 }
 0x342   :  { %v1980_v10 = vpop.xlane.xlu1 %1979  ;;  %v10113_v49 = vpop.xlane.xlu0 %1928  ;;  %v5033_v55 = vsel %vm11215_vm7, %v5032_v50, %v5028_v9  ;;  %v905_v50 = vmax.f32 %v425_v56, 0.0  ;;  %v4958_v56 = vrot.slane %v9977_v27, %v7716_v29  ;;  %v4963_v30 = vrot.slane %v10005_v26, %v7707_v22  ;;  %v443_v27 = vld [vmem:[%s11207_s0 + $0xd60] sm:$0xff] }
 0x343   :  { %v5038_v1 = vsel %vm11214_vm8, %v5037_v36, %v5033_v55  ;;  %v5067_v9 = vrot.slane %v1980_v10, %v7775_v20  ;;  %v922_v36 = vmax.f32 %v442_v61, 0.0  ;;  %v2254_v10 = vsel %vm975_vm0, %v921_v31, 0.0 }
 0x344   :  { %v5043_v34 = vsel %vm11225_vm9, %v5042_v25, %v5038_v1  ;;  %vm11227_vm9 = vcmask 851712   ;;  %v2209_v1 = vsel %vm975_vm0, %v906_v35, 0.0  ;;  %v4954_v26 = vsel %vm11215_vm7, %v4953_v59, %v9915_v47  ;;  %v10199_v59 = vld [vmem:[%s11208_s1 + $0x2f8] sm:$0xff]  }
 0x345   :  { %2252 = vadd.xlane.f32.xlu1 %v2251_v12  ;;  %2201 = vadd.xlane.f32.xlu0 %v2200_v57  ;;  %v5062_v57 = vrot.slane %v10081_v38, %v7744_v60  ;;  %v5048_v33 = vsel %vm11226_vm10, %v5047_v44, %v5043_v34  ;;  %v2206_v44 = vsel %vm975_vm0, %v905_v50, 0.0  ;;  %v4973_v50 = vrot.slane %v10053_v0, %v7724_v42 }
 0x346   :  { %v10144_v62 = vpop.xlane.xlu1 %2057  ;;  %v10146_v12 = vpop.xlane.xlu0 %2006  ;;  %v5053_v55 = vsel %vm3464_vm11, %v5052_v28, %v5048_v33  ;;  %v907_v34 = vmax.f32 %v427_v46, 0.0  ;;  %v4978_v35 = vrot.slane %v10083_v37, %v7753_v2  ;;  %vm11228_vm10 = vcmask 654912   ;;  %v429_v46 = vld [vmem:[%s11207_s0 + $0xcf0] sm:$0xff] }
 0x347   :  { %v5058_v25 = vsel %vm11227_vm9, %v5057_v15, %v5053_v55  ;;  %v2257_v15 = vsel %vm975_vm0, %v922_v36, 0.0  ;;  %v444_v36 = vld [vmem:[%s11207_s0 + $0xd68] sm:$0xff]  ;;  %v4983_v37 = vrot.slane %v10113_v49, %v7744_v60  ;;  %vm11229_vm9 = vcmask 720512   ;;  %v6942_v49 = vld [vmem:[%s11208_s1 + $0x238] sm:$0xff]  }
 0x348   :  { %v5063_v28 = vsel %vm3478_vm13, %v5062_v57, %v5058_v25  ;;  %v4959_v57 = vsel %vm11214_vm8, %v4958_v56, %v4954_v26  ;;  %v6775_v56 = vunpack.c.h.bf16 %v10199_v59  ;;  %v446_v26 = vld [vmem:[%s11207_s0 + $0xd78] sm:$0xff] }
 0x349   :  { %2204 = vadd.xlane.f32.xlu1 %v2203_v18  ;;  %2126 = vadd.xlane.f32.xlu0 %v2125_v63  ;;  %v4968_v63 = vrot.slane %v10029_v8, %v7733_v48  ;;  %v5068_v61 = vsel %vm3485_vm14, %v5067_v9, %v5063_v28  ;;  %v428_v8 = vld [vmem:[%s11207_s0 + $0xce8] sm:$0xff]  ;;  %v923_v9 = vmax.f32 %v443_v27, 0.0  ;;  %v4964_v55 = vsel %vm11228_vm10, %v4963_v30, %v4959_v57 }
 0x34a   :  { %v1983_v13 = vpop.xlane.xlu1 %1982  ;;  %v1932_v38 = vpop.xlane.xlu0 %1931  ;;  %vm11230_vm10 = vcmask 851712   ;;  %7166 = vmatprep.subr.mxu1 %v6775_v56  ;;  %v6679_v57 = vunpack.c.h.bf16 %v6942_v49 }
 0x34b   :  { %v5072_v18 = vrot.slane %v1983_v13, %v7764_v19  ;;  %v4988_v25 = vrot.slane %v1932_v38, %v7775_v20  ;;  %v908_v13 = vmax.f32 %v428_v8, 0.0  ;;  %v2212_v38 = vsel %vm975_vm0, %v907_v34, 0.0 }
 0x34c   :  { %v2260_v27 = vsel %vm975_vm0, %v923_v9, 0.0  ;;  %v909_v8 = vmax.f32 %v429_v46, 0.0  ;;  %v447_v46 = vld [vmem:[%s11207_s0 + $0xd80] sm:$0xff] }
 0x34d   :  { %2207 = vadd.xlane.f32.xlu1 %v2206_v44  ;;  %2255 = vadd.xlane.f32.xlu0 %v2254_v10  ;;  %v5073_v31 = vsel %vm3492_vm15, %v5072_v18, %v5068_v61  ;;  %v924_v10 = vmax.f32 %v444_v36, 0.0  ;;  %v430_v61 = vld [vmem:[%s11207_s0 + $0xcf8] sm:$0xff]  ;;  %v2215_v34 = vsel %vm975_vm0, %v908_v13, 0.0  ;;  %v926_v13 = vmax.f32 %v446_v26, 0.0 }
 0x34e   :  { %v10187_v33 = vpop.xlane.xlu1 %2060  ;;  %v10189_v47 = vpop.xlane.xlu0 %2009  ;;  %v5791_v0 = vsel %vm5785_vm12, %v5073_v31, %v8281_v16  ;;  %v4969_v16 = vsel %vm11229_vm9, %v4968_v63, %v4964_v55  ;;  %v445_v63 = vld [vmem:[%s11207_s0 + $0xd70] sm:$0xff]  ;;  %v910_v36 = vmax.f32 %v430_v61, 0.0  ;;  %v463_v55 = vld [vmem:[%s11207_s0 + $0xe00] sm:$0xff]  ;;  %v5175_v26 = vrot.slane %v10015_v14, %v7675_v58 }
 0x34f   :  { %6020 = vmatprep.mubr.f32.mxu0 %v5791_v0  ;;  %v4974_v44 = vsel %vm3464_vm11, %v4973_v50, %v4969_v16  ;;  %v464_v50 = vld [vmem:[%s11207_s0 + $0xe08] sm:$0xff]  ;;  %v2263_v0 = vsel %vm975_vm0, %v924_v10, 0.0  ;;  %v925_v9 = vmax.f32 %v445_v63, 0.0  ;;  %v449_v63 = vld [vmem:[%s11207_s0 + $0xd90] sm:$0xff]  ;;  %vm11231_vm9 = vcmask 654912  }
 0x350   :  { %v4979_v30 = vsel %vm11230_vm10, %v4978_v35, %v4974_v44  ;;  %v944_v44 = vmax.f32 %v464_v50, 0.0  ;;  %v448_v10 = vld [vmem:[%s11207_s0 + $0xd88] sm:$0xff]  ;;  %v10282_v14 = vld [vmem:[%s11207_s0 + $0xe10] sm:$0xff]  ;;  %vm11232_vm10 = vmmov %vm11231_vm9 }
 0x351   :  { %2210 = vadd.xlane.f32.xlu1 %v2209_v1  ;;  %2258 = vadd.xlane.f32.xlu0 %v2257_v15  ;;  %v4984_v1 = vsel %vm3478_vm13, %v4983_v37, %v4979_v30  ;;  %v6949_v37 = vld [vmem:[%s11208_s1 + $0x270] sm:$0xff]   ;;  %v6710_v30 = vunpack.c.l.bf16 %v10067_v11  ;;  %v2221_v11 = vsel %vm975_vm0, %v910_v36, 0.0 }
 0x352   :  { %v10215_v28 = vpop.xlane.xlu1 %2012  ;;  %v1935_v18 = vpop.xlane.xlu0 %1934  ;;  %v4989_v31 = vsel %vm3485_vm14, %v4988_v25, %v4984_v1  ;;  %v6707_v61 = vunpack.c.h.bf16 %v6949_v37  ;;  %v2266_v1 = vsel %vm975_vm0, %v925_v9, 0.0  ;;  %v929_v9 = vmax.f32 %v449_v63, 0.0 }
 0x353   :  { %v4993_v15 = vrot.slane %v1935_v18, %v7764_v19  ;;  %v6678_v18 = vunpack.c.l.bf16 %v6942_v49  ;;  %v928_v49 = vmax.f32 %v448_v10, 0.0  ;;  %v6706_v36 = vunpack.c.l.bf16 %v6949_v37 }
 0x354   :  { %v5101_v37 = vrot.slane %v10071_v21, %v7664_v51  ;;  %v5190_v10 = vrot.slane %v10093_v23, %v7683_v4  ;;  %v5106_v21 = vrot.slane %v10095_v3, %v7686_v5  ;;  %v10330_v3 = vsel %vm975_vm0, %v929_v9, 0.0 }
 0x355   :  { %2213 = vadd.xlane.f32.xlu1 %v2212_v38  ;;  %2261 = vadd.xlane.f32.xlu0 %v2260_v27  ;;  %v4994_v35 = vsel %vm3492_vm15, %v4993_v15, %v4989_v31  ;;  %v6941_v38 = vld [vmem:[%s11208_s1 + $0x230] sm:$0xff]   ;;  %v943_v27 = vmax.f32 %v463_v55, 0.0  ;;  %v927_v15 = vmax.f32 %v447_v46, 0.0  ;;  %v6948_v55 = vld [vmem:[%s11208_s1 + $0x268] sm:$0xff]   ;;  %v10310_v46 = vld [vmem:[%s11207_s0 + $0xd98] sm:$0xff]  ;;  %v5111_v9 = vrot.slane %v10146_v12, %v7683_v4 }
 0x356   :  { %v10243_v56 = vpop.xlane.xlu1 %2015  ;;  %v10245_v16 = vpop.xlane.xlu0 %2063  ;;  %v5790_v25 = vsel %vm5785_vm12, %v4994_v35, %v8184_v7  ;;  %v2218_v7 = vsel %vm975_vm0, %v909_v8, 0.0  ;;  %v2269_v8 = vsel %vm975_vm0, %v926_v13, 0.0  ;;  %v5091_v35 = vrot.slane %v10017_v45, %v7649_v40  ;;  %v10358_v12 = vld [vmem:[%s11208_s1 + $0x258] sm:$0xff]  }
 0x357   :  { %6021 = vmatmul.mubr.f32.vlgmr.msra.gmra.mxu0 %v5790_v25  ;;  %v5096_v25 = vrot.slane %v10041_v24, %v7675_v58  ;;  %v5185_v45 = vrot.slane %v10069_v17, %v7686_v5  ;;  %v6674_v13 = vunpack.c.l.bf16 %v6941_v38  ;;  %v10302_v24 = vsel %vm975_vm0, %v928_v49, 0.0 }
 0x358   :  { %7132 = vmatpush3.msra.mxu0 %v6679_v57  ;;  %v10273_v57 = vsel %vm975_vm0, %v944_v44, 0.0  ;;  %v10295_v44 = vld [vmem:[%s11208_s1 + $0x228] sm:$0xff]   ;;  %v10305_v17 = vsel %vm975_vm0, %v927_v15, 0.0  ;;  %v5092_v63 = vsel %vm3408_vm3, %v5091_v35, %v10001_v6  ;;  %v930_v15 = vmax.f32 %v10310_v46, 0.0  ;;  %v6947_v6 = vld [vmem:[%s11208_s1 + $0x260] sm:$0xff]  }
 0x359   :  { %2216 = vadd.xlane.f32.xlu1 %v2215_v34  ;;  %2264 = vadd.xlane.f32.xlu0 %v2263_v0  ;;  %v6675_v34 = vunpack.c.h.bf16 %v6941_v38  ;;  %v5180_v0 = vrot.slane %v10039_v52, %v7664_v51  ;;  %v2320_v52 = vsel %vm975_vm0, %v943_v27, 0.0  ;;  %v945_v38 = vmax.f32 %v10282_v14, 0.0 }
 0x35a   :  { %v10267_v50 = vpop.xlane.xlu1 %2018  ;;  %v10269_v31 = vpop.xlane.xlu0 %2066  ;;  %7133 = vmatprep.subr.mxu0 %v6710_v30  ;;  %v5176_v30 = vsel %vm3415_vm4, %v5175_v26, %v9998_v54  ;;  %v6703_v27 = vunpack.c.h.bf16 %v6948_v55  ;;  %v6702_v26 = vunpack.c.l.bf16 %v6948_v55 }
 0x35b   :  { %7134 = vmatpush3.msra.mxu0 %v6678_v18  ;;  %v5181_v54 = vsel %vm3422_vm5, %v5180_v0, %v5176_v30  ;;  %v6698_v30 = vunpack.c.l.bf16 %v6947_v6 }
 0x35c   :  { %7135 = vmatprep.subr.mxu0 %v6707_v61  ;;  %v6671_v61 = vunpack.c.h.bf16 %v10295_v44  ;;  %v5186_v49 = vsel %vm3429_vm6, %v5185_v45, %v5181_v54  ;;  %v5116_v45 = vrot.slane %v10189_v47, %v7716_v29 }
 0x35d   :  { %2219 = vadd.xlane.f32.xlu1 %v2218_v7  ;;  %2267 = vadd.xlane.f32.xlu0 %v2266_v1  ;;  %v10324_v7 = vld [vmem:[%s11207_s0 + $0xe18] sm:$0xff]  ;;  %v5097_v1 = vsel %vm3415_vm4, %v5096_v25, %v5092_v63  ;;  %v5191_v0 = vsel %vm11215_vm7, %v5190_v10, %v5186_v49  ;;  %v5195_v25 = vrot.slane %v10144_v62, %v7716_v29  ;;  %v6699_v62 = vunpack.c.h.bf16 %v6947_v6 }
 0x35e   :  { %v10316_v23 = vpop.xlane.xlu1 %2021  ;;  %v10318_v18 = vpop.xlane.xlu0 %2069  ;;  %7136 = vmatpush3.msra.mxu0 %v6675_v34  ;;  %v10342_v34 = vld [vmem:[%s11208_s1 + $0x220] sm:$0xff]   ;;  %v5102_v35 = vsel %vm3422_vm5, %v5101_v37, %v5097_v1  ;;  %v6670_v37 = vunpack.c.l.bf16 %v10295_v44  ;;  %v5126_v10 = vrot.slane %v10243_v56, %v7733_v48  ;;  %v5205_v44 = vrot.slane %v10245_v16, %v7733_v48 }
 0x35f   :  { %7137 = vmatprep.subr.mxu0 %v6706_v36  ;;  %v946_v36 = vmax.f32 %v10324_v7, 0.0  ;;  %v5107_v55 = vsel %vm3429_vm6, %v5106_v21, %v5102_v35  ;;  %v6667_v47 = vunpack.c.h.bf16 %v10342_v34  ;;  %v6666_v21 = vunpack.c.l.bf16 %v10342_v34 }
 0x360   :  { %7138 = vmatpush3.msra.mxu0 %v6674_v13  ;;  %v6695_v56 = vunpack.c.h.bf16 %v10358_v12  ;;  %v5196_v63 = vsel %vm11214_vm8, %v5195_v25, %v5191_v0  ;;  %v5136_v54 = vrot.slane %v10316_v23, %v7753_v2 }
 0x361   :  { %2222 = vadd.xlane.f32.xlu1 %v2221_v11  ;;  %2270 = vadd.xlane.f32.xlu0 %v2269_v8  ;;  %v5200_v11 = vrot.slane %v10187_v33, %v7707_v22  ;;  %v5121_v8 = vrot.slane %v10215_v28, %v7707_v22  ;;  %v5131_v33 = vrot.slane %v10267_v50, %v7724_v42 }
 0x362   :  { %v2025_v13 = vpop.xlane.xlu1 %2024  ;;  %v2073_v46 = vpop.xlane.xlu0 %2072  ;;  %7139 = vmatprep.subr.mxu0 %v6703_v27  ;;  %v5112_v27 = vsel %vm11215_vm7, %v5111_v9, %v5107_v55  ;;  %v5210_v28 = vrot.slane %v10269_v31, %v7724_v42  ;;  %v2326_v9 = vsel %vm975_vm0, %v945_v38, 0.0  ;;  %v2281_v55 = vsel %vm975_vm0, %v930_v15, 0.0 }
 0x363   :  { %7140 = vmatpush3.msra.mxu0 %v6671_v61  ;;  %v5117_v16 = vsel %vm11214_vm8, %v5116_v45, %v5112_v27  ;;  %v5215_v61 = vrot.slane %v10318_v18, %v7753_v2  ;;  %v5201_v31 = vsel %vm11231_vm9, %v5200_v11, %v5196_v63  ;;  %v5220_v49 = vrot.slane %v2073_v46, %v7744_v60 }
 0x364   :  { %7141 = vmatprep.subr.mxu0 %v6702_v26  ;;  %v6938_v26 = vld [vmem:[%s11208_s1 + $0x218] sm:$0xff]   ;;  %vm11233_vm8 = vcmask 720512   ;;  %vm11238_vm9 = vcmask 589312  }
 0x365   :  { %2324 = vadd.xlane.f32.xlu1 %v10273_v57  ;;  %2321 = vadd.xlane.f32.xlu0 %v2320_v52  ;;  %v5122_v57 = vsel %vm11232_vm10, %v5121_v8, %v5117_v16  ;;  %v5141_v52 = vrot.slane %v2025_v13, %v7744_v60  ;;  %vm11234_vm7 = vmmov %vm11233_vm8  ;;  %v6663_v14 = vunpack.c.h.bf16 %v6938_v26 }
 0x366   :  { %v2028_v1 = vpop.xlane.xlu1 %2027  ;;  %v2076_v50 = vpop.xlane.xlu0 %2075  ;;  %7142 = vmatpush3.msra.mxu0 %v6670_v37  ;;  %v5127_v23 = vsel %vm11233_vm8, %v5126_v10, %v5122_v57  ;;  %v5206_v18 = vsel %vm11234_vm7, %v5205_v44, %v5201_v31  ;;  %vm11235_vm7 = vcmask 851712   ;;  %v451_v37 = vld [vmem:[%s11207_s0 + $0xda0] sm:$0xff]  ;;  %v2329_v44 = vsel %vm975_vm0, %v946_v36, 0.0  ;;  %v468_v31 = vld [vmem:[%s11207_s0 + $0xe28] sm:$0xff]  ;;  %v6965_v57 = vld [vmem:[%s11208_s1 + $0x2f0] sm:$0xff]  }
 0x367   :  { %7143 = vmatprep.subr.mxu0 %v6699_v62  ;;  %v5146_v6 = vrot.slane %v2028_v1, %v7775_v20  ;;  %v5225_v34 = vrot.slane %v2076_v50, %v7775_v20  ;;  %v5132_v35 = vsel %vm3464_vm11, %v5131_v33, %v5127_v23  ;;  %v5211_v0 = vsel %vm3464_vm11, %v5210_v28, %v5206_v18  ;;  %vm11236_vm8 = vmmov %vm11235_vm7  ;;  %v6945_v62 = vld [vmem:[%s11208_s1 + $0x250] sm:$0xff]  }
 0x368   :  { %7144 = vmatpush3.msra.mxu0 %v6667_v47  ;;  %v5137_v25 = vsel %vm11235_vm7, %v5136_v54, %v5132_v35  ;;  %v5216_v45 = vsel %vm11236_vm8, %v5215_v61, %v5211_v0  ;;  %v6958_v47 = vld [vmem:[%s11208_s1 + $0x2b8] sm:$0xff]   ;;  %v931_v28 = vmax.f32 %v451_v37, 0.0  ;;  %v452_v54 = vld [vmem:[%s11207_s0 + $0xda8] sm:$0xff]  ;;  %v10459_v23 = vld [vmem:[%s11208_s1 + $0x2b0] sm:$0xff]   ;;  %vm11239_vm7 = vcmask 720512  }
 0x369   :  { %2276 = vadd.xlane.f32.xlu1 %v10302_v24  ;;  %2273 = vadd.xlane.f32.xlu0 %v10305_v17  ;;  %v467_v24 = vld [vmem:[%s11207_s0 + $0xe20] sm:$0xff]  ;;  %v6694_v17 = vunpack.c.l.bf16 %v10358_v12  ;;  %v5142_v38 = vsel %vm3478_vm13, %v5141_v52, %v5137_v25  ;;  %v5221_v15 = vsel %vm3478_vm13, %v5220_v49, %v5216_v45  ;;  %v6743_v61 = vunpack.c.h.bf16 %v6958_v47  ;;  %v10454_v49 = vld [vmem:[%s11208_s1 + $0x248] sm:$0xff]   ;;  %v453_v25 = vld [vmem:[%s11207_s0 + $0xdb0] sm:$0xff] }
 0x36a   :  { %v2031_v13 = vpop.xlane.xlu1 %2030  ;;  %v2079_v46 = vpop.xlane.xlu0 %2078  ;;  %7145 = vmatprep.subr.mxu0 %v6698_v30  ;;  %v5147_v10 = vsel %vm3485_vm14, %v5146_v6, %v5142_v38  ;;  %v5226_v12 = vsel %vm3485_vm14, %v5225_v34, %v5221_v15  ;;  %v6662_v30 = vunpack.c.l.bf16 %v6938_v26  ;;  %v947_v63 = vmax.f32 %v467_v24, 0.0  ;;  %v10468_v34 = vld [vmem:[%s11208_s1 + $0x208] sm:$0xff]  }
 0x36b   :  { %v5151_v11 = vrot.slane %v2031_v13, %v7764_v19  ;;  %v5230_v8 = vrot.slane %v2079_v46, %v7764_v19  ;;  %7146 = vmatpush3.msra.mxu0 %v6666_v21  ;;  %v10429_v21 = vld [vmem:[%s11208_s1 + $0x210] sm:$0xff]   ;;  %v6690_v52 = vunpack.c.l.bf16 %v6945_v62  ;;  %v6742_v26 = vunpack.c.l.bf16 %v6958_v47 }
 0x36c   :  { %7147 = vmatprep.subr.mxu0 %v6695_v56  ;;  %v2284_v18 = vsel %vm975_vm0, %v931_v28, 0.0  ;;  %v932_v6 = vmax.f32 %v452_v54, 0.0  ;;  %v2332_v0 = vsel %vm975_vm0, %v947_v63, 0.0  ;;  %v6658_v45 = vunpack.c.l.bf16 %v10429_v21 }
 0x36d   :  { %2279 = vadd.xlane.f32.xlu1 %v10330_v3  ;;  %2327 = vadd.xlane.f32.xlu0 %v2326_v9  ;;  %v5231_v27 = vsel %vm3492_vm15, %v5230_v8, %v5226_v12  ;;  %v5152_v33 = vsel %vm3492_vm15, %v5151_v11, %v5147_v10  ;;  %v6691_v3 = vunpack.c.h.bf16 %v6945_v62  ;;  %v948_v9 = vmax.f32 %v468_v31, 0.0  ;;  %v10486_v11 = vld [vmem:[%s11208_s1 + $0x2e8] sm:$0xff]   ;;  %v10492_v10 = vld [vmem:[%s11208_s1 + $0x240] sm:$0xff]  }
 0x36e   :  { %v2133_v16 = vpop.xlane.xlu1 %2132  ;;  %v2130_v7 = vpop.xlane.xlu0 %2129  ;;  %v5793_v36 = vsel %vm5785_vm12, %v5231_v27, %v8475_v53  ;;  %v5792_v56 = vsel %vm5785_vm12, %v5152_v33, %v8378_v32  ;;  %7148 = vmatpush3.msra.mxu0 %v6663_v14  ;;  %v6659_v53 = vunpack.c.h.bf16 %v10429_v21  ;;  %v6774_v32 = vunpack.c.l.bf16 %v10199_v59  ;;  %v10497_v12 = vld [vmem:[%s11208_s1 + $0x2a8] sm:$0xff]   ;;  %v454_v27 = vld [vmem:[%s11207_s0 + $0xdb8] sm:$0xff] }
 0x36f   :  { %v5318_v1 = vrot.slane %v2133_v16, %v7652_v41  ;;  %v5314_v50 = vrot.slane %v2130_v7, %v7646_v39  ;;  %6090 = vmatprep.mubr.f32.mxu1 %v5793_v36  ;;  %7149 = vmatprep.subr.mxu0 %v6694_v17  ;;  %v6771_v13 = vunpack.c.h.bf16 %v6965_v57  ;;  %v6687_v24 = vunpack.c.h.bf16 %v10454_v49  ;;  %v470_v7 = vld [vmem:[%s11207_s0 + $0xe38] sm:$0xff] }
 0x370   :  { %6091 = vmatmul.mubr.f32.vlgmr.msra.gmra.mxu1 %v5792_v56  ;;  %7150 = vmatpush3.msra.mxu0 %v6662_v30  ;;  %v6739_v14 = vunpack.c.h.bf16 %v10459_v23  ;;  %v6655_v38 = vunpack.c.h.bf16 %v10468_v34  ;;  %v6770_v15 = vunpack.c.l.bf16 %v6965_v57  ;;  %v2287_v8 = vsel %vm975_vm0, %v932_v6, 0.0  ;;  %v6935_v56 = vld [vmem:[%s11208_s1 + $0x200] sm:$0xff]  }
 0x371   :  { %v10462_v59 = vsel %vm3394_vm1, %v5318_v1, %v5314_v50  ;;  %2282 = vadd.xlane.f32.xlu1 %v2281_v55  ;;  %2330 = vadd.xlane.f32.xlu0 %v2329_v44  ;;  %v469_v55 = vld [vmem:[%s11207_s0 + $0xe30] sm:$0xff]  ;;  %v933_v62 = vmax.f32 %v453_v25, 0.0  ;;  %v2335_v21 = vsel %vm975_vm0, %v948_v9, 0.0  ;;  %v6686_v33 = vunpack.c.l.bf16 %v10454_v49  ;;  %v6963_v57 = vld [vmem:[%s11208_s1 + $0x2e0] sm:$0xff]  }
 0x372   :  { %v2085_v35 = vpop.xlane.xlu1 %2084  ;;  %7151 = vmatprep.subr.mxu0 %v6691_v3  ;;  %7167 = vmatpush3.msra.mxu1 %v6743_v61  ;;  %v2082_v37 = vpop.xlane.xlu0 %2081  ;;  %v949_v47 = vmax.f32 %v469_v55, 0.0  ;;  %v6738_v28 = vunpack.c.l.bf16 %v10459_v23  ;;  %v6654_v36 = vunpack.c.l.bf16 %v10468_v34  ;;  %v6767_v54 = vunpack.c.h.bf16 %v10486_v11  ;;  %v479_v23 = vld [vmem:[%s11207_s0 + $0xe80] sm:$0xff] }
 0x373   :  { %v5239_v46 = vrot.slane %v2085_v35, %v7652_v41  ;;  %7152 = vmatpush3.msra.mxu0 %v6659_v53  ;;  %7168 = vmatprep.subr.mxu1 %v6774_v32  ;;  %v5235_v17 = vrot.slane %v2082_v37, %v7646_v39  ;;  %v6683_v61 = vunpack.c.h.bf16 %v10492_v10  ;;  %v6735_v1 = vunpack.c.h.bf16 %v10497_v12  ;;  %v6955_v25 = vld [vmem:[%s11208_s1 + $0x2a0] sm:$0xff]  }
 0x374   :  { %7153 = vmatprep.subr.mxu0 %v6690_v52  ;;  %7169 = vmatpush3.msra.mxu1 %v6742_v26  ;;  %v2290_v31 = vsel %vm975_vm0, %v933_v62, 0.0  ;;  %v2338_v53 = vsel %vm975_vm0, %v949_v47, 0.0  ;;  %v934_v32 = vmax.f32 %v454_v27, 0.0  ;;  %v950_v26 = vmax.f32 %v470_v7, 0.0  ;;  %v455_v47 = vld [vmem:[%s11207_s0 + $0xdc0] sm:$0xff]  ;;  %v6954_v27 = vld [vmem:[%s11208_s1 + $0x298] sm:$0xff]  }
 0x375   :  { %2285 = vadd.xlane.f32.xlu1 %v2284_v18  ;;  %2333 = vadd.xlane.f32.xlu0 %v2332_v0  ;;  %v5240_v44 = vsel %vm3394_vm1, %v5239_v46, %v5235_v17  ;;  %v471_v18 = vld [vmem:[%s11207_s0 + $0xe40] sm:$0xff]  ;;  %v6651_v6 = vunpack.c.h.bf16 %v6935_v56  ;;  %v6766_v34 = vunpack.c.l.bf16 %v10486_v11  ;;  %v6734_v9 = vunpack.c.l.bf16 %v10497_v12 }
 0x376   :  { %v2088_v30 = vpop.xlane.xlu1 %2087  ;;  %7154 = vmatpush3.msra.mxu0 %v6658_v45  ;;  %7170 = vmatprep.subr.mxu1 %v6771_v13  ;;  %v2136_v16 = vpop.xlane.xlu0 %2135  ;;  %v6650_v45 = vunpack.c.l.bf16 %v6935_v56  ;;  %v6763_v13 = vunpack.c.h.bf16 %v6963_v57  ;;  %v959_v37 = vmax.f32 %v479_v23, 0.0  ;;  %v6731_v11 = vunpack.c.h.bf16 %v6955_v25 }
 0x377   :  { %v5244_v63 = vrot.slane %v2088_v30, %v7656_v43  ;;  %7155 = vmatprep.subr.mxu0 %v6687_v24  ;;  %7171 = vmatpush3.msra.mxu1 %v6739_v14  ;;  %v5323_v3 = vrot.slane %v2136_v16, %v7656_v43  ;;  %v951_v24 = vmax.f32 %v471_v18, 0.0  ;;  %v6762_v12 = vunpack.c.l.bf16 %v6963_v57 }
 0x378   :  { %7156 = vmatpush3.msra.mxu0 %v6655_v38  ;;  %7172 = vmatprep.subr.mxu1 %v6770_v15  ;;  %v2293_v38 = vsel %vm975_vm0, %v934_v32, 0.0  ;;  %v2341_v15 = vsel %vm975_vm0, %v950_v26, 0.0  ;;  %v6961_v32 = vld [vmem:[%s11208_s1 + $0x2d0] sm:$0xff]  }
 0x379   :  { %v5245_v50 = vsel %vm3401_vm2, %v5244_v63, %v5240_v44  ;;  %2288 = vadd.xlane.f32.xlu1 %v2287_v8  ;;  %2336 = vadd.xlane.f32.xlu0 %v2335_v21  ;;  %v5324_v52 = vsel %vm3401_vm2, %v5323_v3, %v10462_v59  ;;  %v6682_v59 = vunpack.c.l.bf16 %v10492_v10  ;;  %v480_v10 = vld [vmem:[%s11207_s0 + $0xe88] sm:$0xff]  ;;  %v6962_v44 = vld [vmem:[%s11208_s1 + $0x2d8] sm:$0xff]   ;;  %v6730_v21 = vunpack.c.l.bf16 %v6955_v25 }
 0x37a   :  { %v2091_v49 = vpop.xlane.xlu1 %2090  ;;  %7157 = vmatprep.subr.mxu0 %v6686_v33  ;;  %7173 = vmatpush3.msra.mxu1 %v6738_v28  ;;  %v2139_v0 = vpop.xlane.xlu0 %2138  ;;  %v2368_v28 = vsel %vm975_vm0, %v959_v37, 0.0  ;;  %v2344_v63 = vsel %vm975_vm0, %v951_v24, 0.0  ;;  %v960_v56 = vmax.f32 %v480_v10, 0.0  ;;  %v6759_v3 = vunpack.c.h.bf16 %v6962_v44 }
 0x37b   :  { %v5249_v35 = vrot.slane %v2091_v49, %v7649_v40  ;;  %7158 = vmatpush3.msra.mxu0 %v6654_v36  ;;  %7174 = vmatprep.subr.mxu1 %v6767_v54  ;;  %v5328_v55 = vrot.slane %v2139_v0, %v7649_v40  ;;  %v935_v36 = vmax.f32 %v455_v47, 0.0  ;;  %v481_v54 = vld [vmem:[%s11207_s0 + $0xe90] sm:$0xff]  ;;  %v6755_v25 = vunpack.c.h.bf16 %v6961_v32  ;;  %v6952_v47 = vld [vmem:[%s11208_s1 + $0x288] sm:$0xff]  }
 0x37c   :  { %7159 = vmatprep.subr.mxu0 %v6683_v61  ;;  %7175 = vmatpush3.msra.mxu1 %v6735_v1  ;;  %v6953_v49 = vld [vmem:[%s11208_s1 + $0x290] sm:$0xff]   ;;  %v2371_v18 = vsel %vm975_vm0, %v960_v56, 0.0  ;;  %v6959_v56 = vld [vmem:[%s11208_s1 + $0x2c0] sm:$0xff]  }
 0x37d   :  { %v5250_v46 = vsel %vm3408_vm3, %v5249_v35, %v5245_v50  ;;  %2291 = vadd.xlane.f32.xlu1 %v2290_v31  ;;  %2339 = vadd.xlane.f32.xlu0 %v2338_v53  ;;  %v5329_v14 = vsel %vm3408_vm3, %v5328_v55, %v5324_v52  ;;  %v472_v50 = vld [vmem:[%s11207_s0 + $0xe48] sm:$0xff]  ;;  %v6727_v31 = vunpack.c.h.bf16 %v6954_v27  ;;  %v6758_v53 = vunpack.c.l.bf16 %v6962_v44 }
 0x37e   :  { %v2094_v17 = vpop.xlane.xlu1 %2093  ;;  %7160 = vmatpush3.msra.mxu0 %v6651_v6  ;;  %7176 = vmatprep.subr.mxu1 %v6766_v34  ;;  %v2142_v62 = vpop.xlane.xlu0 %2141  ;;  %v961_v52 = vmax.f32 %v481_v54, 0.0  ;;  %v2296_v23 = vsel %vm975_vm0, %v935_v36, 0.0  ;;  %v952_v6 = vmax.f32 %v472_v50, 0.0  ;;  %v6726_v34 = vunpack.c.l.bf16 %v6954_v27  ;;  %v6951_v50 = vld [vmem:[%s11208_s1 + $0x280] sm:$0xff]  }
 0x37f   :  { %v5254_v8 = vrot.slane %v2094_v17, %v7675_v58  ;;  %7161 = vmatprep.subr.mxu0 %v6682_v59  ;;  %7177 = vmatpush3.msra.mxu1 %v6734_v9  ;;  %v5333_v30 = vrot.slane %v2142_v62, %v7675_v58  ;;  %v473_v59 = vld [vmem:[%s11207_s0 + $0xe50] sm:$0xff]  ;;  %v456_v9 = vld [vmem:[%s11207_s0 + $0xdc8] sm:$0xff]  ;;  %v6723_v55 = vunpack.c.h.bf16 %v6953_v49  ;;  %v6722_v62 = vunpack.c.l.bf16 %v6953_v49 }
 0x380   :  { %7162 = vmatpush3.msra.mxu0 %v6650_v45  ;;  %7178 = vmatprep.subr.mxu1 %v6763_v13  ;;  %v2374_v13 = vsel %vm975_vm0, %v961_v52, 0.0  ;;  %v2347_v24 = vsel %vm975_vm0, %v952_v6, 0.0  ;;  %v936_v17 = vmax.f32 %v456_v9, 0.0  ;;  %v458_v6 = vld [vmem:[%s11207_s0 + $0xdd8] sm:$0xff] }
 0x381   :  { %v5255_v33 = vsel %vm3415_vm4, %v5254_v8, %v5250_v46  ;;  %2294 = vadd.xlane.f32.xlu1 %v2293_v38  ;;  %2342 = vadd.xlane.f32.xlu0 %v2341_v15  ;;  %v10562_v16 = vsel %vm3415_vm4, %v5333_v30, %v5329_v14  ;;  %v6960_v46 = vld [vmem:[%s11208_s1 + $0x2c8] sm:$0xff]   ;;  %v953_v14 = vmax.f32 %v473_v59, 0.0  ;;  %v457_v38 = vld [vmem:[%s11207_s0 + $0xdd0] sm:$0xff]  ;;  %v482_v15 = vld [vmem:[%s11207_s0 + $0xe98] sm:$0xff] }
 0x382   :  { %v2097_v7 = vpop.xlane.xlu1 %2096  ;;  %7179 = vmatpush3.msra.mxu1 %v6731_v11  ;;  %v10568_v1 = vpop.xlane.xlu0 %2144  ;;  %v6754_v11 = vunpack.c.l.bf16 %v6961_v32  ;;  %v6751_v10 = vunpack.c.h.bf16 %v6960_v46  ;;  %v962_v44 = vmax.f32 %v482_v15, 0.0  ;;  %v2299_v27 = vsel %vm975_vm0, %v936_v17, 0.0  ;;  %v484_v17 = vld [vmem:[%s11207_s0 + $0xea8] sm:$0xff] }
 0x383   :  { %v5259_v61 = vrot.slane %v2097_v7, %v7664_v51  ;;  %7180 = vmatprep.subr.mxu1 %v6762_v12  ;;  %v937_v12 = vmax.f32 %v457_v38, 0.0  ;;  %v474_v7 = vld [vmem:[%s11207_s0 + $0xe58] sm:$0xff]  ;;  %v6750_v36 = vunpack.c.l.bf16 %v6960_v46  ;;  %v6714_v46 = vunpack.c.l.bf16 %v6951_v50 }
 0x384   :  { %7181 = vmatpush3.msra.mxu1 %v6730_v21  ;;  %v2350_v21 = vsel %vm975_vm0, %v953_v14, 0.0  ;;  %v954_v49 = vmax.f32 %v474_v7, 0.0  ;;  %v459_v14 = vld [vmem:[%s11207_s0 + $0xde0] sm:$0xff] }
 0x385   :  { %v5260_v57 = vsel %vm3422_vm5, %v5259_v61, %v5255_v33  ;;  %2369 = vadd.xlane.f32.xlu1 %v2368_v28  ;;  %2345 = vadd.xlane.f32.xlu0 %v2344_v63  ;;  %v6719_v33 = vunpack.c.h.bf16 %v6952_v47  ;;  %v483_v63 = vld [vmem:[%s11207_s0 + $0xea0] sm:$0xff]  ;;  %v6718_v61 = vunpack.c.l.bf16 %v6952_v47 }
 0x386   :  { %v2100_v26 = vpop.xlane.xlu1 %2099  ;;  %7182 = vmatprep.subr.mxu1 %v6759_v3  ;;  %v10583_v0 = vpop.xlane.xlu0 %2147  ;;  %v963_v52 = vmax.f32 %v483_v63, 0.0 }
 0x387   :  { %v5264_v35 = vrot.slane %v2100_v26, %v7686_v5  ;;  %7183 = vmatpush3.msra.mxu1 %v6727_v31  ;;  %v2302_v31 = vsel %vm975_vm0, %v937_v12, 0.0  ;;  %v475_v26 = vld [vmem:[%s11207_s0 + $0xe60] sm:$0xff] }
 0x388   :  { %7184 = vmatprep.subr.mxu1 %v6758_v53  ;;  %v2377_v53 = vsel %vm975_vm0, %v962_v44, 0.0  ;;  %v955_v59 = vmax.f32 %v475_v26, 0.0  ;;  %v939_v44 = vmax.f32 %v459_v14, 0.0 }
 0x389   :  { %v10592_v45 = vsel %vm3429_vm6, %v5264_v35, %v5260_v57  ;;  %2297 = vadd.xlane.f32.xlu1 %v2296_v23  ;;  %2372 = vadd.xlane.f32.xlu0 %v2371_v18  ;;  %v6747_v23 = vunpack.c.h.bf16 %v6959_v56  ;;  %v6746_v35 = vunpack.c.l.bf16 %v6959_v56 }
 0x38a   :  { %v2226_v37 = vpop.xlane.xlu1 %2225  ;;  %7185 = vmatpush3.msra.mxu1 %v6726_v34  ;;  %v10605_v8 = vpop.xlane.xlu0 %2150  ;;  %v6715_v34 = vunpack.c.h.bf16 %v6951_v50  ;;  %v2308_v56 = vsel %vm975_vm0, %v939_v44, 0.0  ;;  %v477_v50 = vld [vmem:[%s11207_s0 + $0xe70] sm:$0xff] }
 0x38b   :  { %7186 = vmatprep.subr.mxu1 %v6755_v25  ;;  %v5472_v54 = vrot.slane %v2226_v37, %v7646_v39  ;;  %v2380_v25 = vsel %vm975_vm0, %v963_v52, 0.0 }
 0x38c   :  { %7187 = vmatpush3.msra.mxu1 %v6723_v55  ;;  %v2353_v55 = vsel %vm975_vm0, %v954_v49, 0.0  ;;  %v10682_v49 = vld [vmem:[%s11208_s1 + $0x378] sm:$0xff]  }
 0x38d   :  { %2375 = vadd.xlane.f32.xlu1 %v2374_v13  ;;  %2348 = vadd.xlane.f32.xlu0 %v2347_v24  ;;  %v938_v13 = vmax.f32 %v458_v6, 0.0  ;;  %v957_v6 = vmax.f32 %v477_v50, 0.0 }
 0x38e   :  { %v10610_v30 = vpop.xlane.xlu1 %2102  ;;  %7188 = vmatprep.subr.mxu1 %v6754_v11  ;;  %v2229_v28 = vpop.xlane.xlu0 %2228 }
 0x38f   :  { %7189 = vmatpush3.msra.mxu1 %v6722_v62  ;;  %v5476_v3 = vrot.slane %v2229_v28, %v7652_v41  ;;  %v2356_v62 = vsel %vm975_vm0, %v955_v59, 0.0  ;;  %v2305_v12 = vsel %vm975_vm0, %v938_v13, 0.0  ;;  %v2362_v13 = vsel %vm975_vm0, %v957_v6, 0.0 }
 0x390   :  { %7190 = vmatprep.subr.mxu1 %v6751_v10  ;;  %v7313_v6 = vmov 0.0  }
 0x391   :  { %2351 = vadd.xlane.f32.xlu1 %v2350_v21  ;;  %2300 = vadd.xlane.f32.xlu0 %v2299_v27  ;;  %v5477_v32 = vsel %vm3394_vm1, %v5476_v3, %v5472_v54  ;;  %v964_v21 = vmax.f32 %v484_v17, 0.0  ;;  %v485_v27 = vld [vmem:[%s11207_s0 + $0xeb0] sm:$0xff]  ;;  %v487_v17 = vld [vmem:[%s11207_s0 + $0xec0] sm:$0xff] }
 0x392   :  { %v2178_v57 = vpop.xlane.xlu1 %2177  ;;  %7191 = vmatpush3.msra.mxu1 %v6719_v33  ;;  %v10634_v18 = vpop.xlane.xlu0 %2153  ;;  %v476_v33 = vld [vmem:[%s11207_s0 + $0xe68] sm:$0xff]  ;;  %v965_v63 = vmax.f32 %v485_v27, 0.0  ;;  %v462_v27 = vld [vmem:[%s11207_s0 + $0xdf8] sm:$0xff] }
 0x393   :  { %7192 = vmatprep.subr.mxu1 %v6750_v36  ;;  %v5393_v38 = vrot.slane %v2178_v57, %v7646_v39  ;;  %v956_v7 = vmax.f32 %v476_v33, 0.0  ;;  %v2383_v54 = vsel %vm975_vm0, %v964_v21, 0.0  ;;  %v488_v21 = vld [vmem:[%s11207_s0 + $0xec8] sm:$0xff] }
 0x394   :  { %7193 = vmatpush3.msra.mxu1 %v6718_v61  ;;  %v2386_v57 = vsel %vm975_vm0, %v965_v63, 0.0 }
 0x395   :  { %2303 = vadd.xlane.f32.xlu1 %v2302_v31  ;;  %2378 = vadd.xlane.f32.xlu0 %v2377_v53  ;;  %v460_v31 = vld [vmem:[%s11207_s0 + $0xde8] sm:$0xff]  ;;  %v2359_v52 = vsel %vm975_vm0, %v956_v7, 0.0 }
 0x396   :  { %v2232_v9 = vpop.xlane.xlu1 %2231  ;;  %7194 = vmatprep.subr.mxu1 %v6747_v23  ;;  %v2181_v24 = vpop.xlane.xlu0 %2180 }
 0x397   :  { %v5481_v37 = vrot.slane %v2232_v9, %v7656_v43  ;;  %7195 = vmatpush3.msra.mxu1 %v6715_v34  ;;  %v5397_v15 = vrot.slane %v2181_v24, %v7652_v41  ;;  %v940_v34 = vmax.f32 %v460_v31, 0.0  ;;  %v461_v9 = vld [vmem:[%s11207_s0 + $0xdf0] sm:$0xff] }
 0x398   :  { %7196 = vmatprep.subr.mxu1 %v6746_v35  ;;  %v6839_v35 = vunpack.c.h.bf16 %v10682_v49 }
 0x399   :  { %v5482_v11 = vsel %vm3401_vm2, %v5481_v37, %v5477_v32  ;;  %2381 = vadd.xlane.f32.xlu1 %v2380_v25  ;;  %2354 = vadd.xlane.f32.xlu0 %v2353_v55  ;;  %v5398_v47 = vsel %vm3394_vm1, %v5397_v15, %v5393_v38  ;;  %v486_v25 = vld [vmem:[%s11207_s0 + $0xeb8] sm:$0xff]  ;;  %v941_v37 = vmax.f32 %v461_v9, 0.0  ;;  %v492_v9 = vld [vmem:[%s11207_s0 + $0xee8] sm:$0xff] }
 0x39a   :  { %v10653_v10 = vpop.xlane.xlu1 %2156  ;;  %7197 = vmatpush3.msra.mxu1 %v6714_v46  ;;  %v10662_v28 = vpop.xlane.xlu0 %2105  ;;  %7201 = vmatprep.subr.mxu0 %v6839_v35  ;;  %v2311_v46 = vsel %vm975_vm0, %v940_v34, 0.0  ;;  %v966_v24 = vmax.f32 %v486_v25, 0.0  ;;  %v478_v38 = vld [vmem:[%s11207_s0 + $0xe78] sm:$0xff]  ;;  %v491_v35 = vld [vmem:[%s11207_s0 + $0xee0] sm:$0xff] }
 0x39b   :  { %7253 = vmatprep.subr.mxu1 %v7313_v6 }
 0x39d   :  { %2357 = vadd.xlane.f32.xlu1 %v2356_v62  ;;  %2306 = vadd.xlane.f32.xlu0 %v2305_v12  ;;  %v2389_v62 = vsel %vm975_vm0, %v966_v24, 0.0  ;;  %v958_v12 = vmax.f32 %v478_v38, 0.0  ;;  %v972_v24 = vmax.f32 %v492_v9, 0.0  ;;  %v493_v38 = vld [vmem:[%s11207_s0 + $0xef0] sm:$0xff] }
 0x39e   :  { %v2235_v36 = vpop.xlane.xlu1 %2234  ;;  %v2184_v61 = vpop.xlane.xlu0 %2183 }
 0x39f   :  { %v5486_v3 = vrot.slane %v2235_v36, %v7649_v40  ;;  %v5402_v53 = vrot.slane %v2184_v61, %v7656_v43  ;;  %v2365_v7 = vsel %vm975_vm0, %v958_v12, 0.0  ;;  %v968_v36 = vmax.f32 %v488_v21, 0.0  ;;  %v490_v61 = vld [vmem:[%s11207_s0 + $0xed8] sm:$0xff] }
 0x3a0   :  { %v2407_v12 = vsel %vm975_vm0, %v972_v24, 0.0  ;;  %v973_v21 = vmax.f32 %v493_v38, 0.0 }
 0x3a1   :  { %v10675_v32 = vsel %vm3408_vm3, %v5486_v3, %v5482_v11  ;;  %2309 = vadd.xlane.f32.xlu1 %v2308_v56  ;;  %2384 = vadd.xlane.f32.xlu0 %v2383_v54  ;;  %v10685_v26 = vsel %vm3401_vm2, %v5402_v53, %v5398_v47  ;;  %v2314_v11 = vsel %vm975_vm0, %v941_v37, 0.0  ;;  %v967_v47 = vmax.f32 %v487_v17, 0.0  ;;  %v489_v3 = vld [vmem:[%s11207_s0 + $0xed0] sm:$0xff] }
 0x3a2   :  { %v10687_v23 = vpop.xlane.xlu1 %2159  ;;  %v10690_v59 = vpop.xlane.xlu0 %2108  ;;  %v942_v56 = vmax.f32 %v462_v27, 0.0  ;;  %v2395_v31 = vsel %vm975_vm0, %v968_v36, 0.0  ;;  %v971_v37 = vmax.f32 %v491_v35, 0.0  ;;  %v2410_v36 = vsel %vm975_vm0, %v973_v21, 0.0 }
 0x3a3   :  { %v2392_v63 = vsel %vm975_vm0, %v967_v47, 0.0  ;;  %v5274_v21 = vrot.slane %v10662_v28, %v7716_v29 }
 0x3a4   :  { %v2317_v53 = vsel %vm975_vm0, %v942_v56, 0.0  ;;  %v2404_v47 = vsel %vm975_vm0, %v971_v37, 0.0 }
 0x3a5   :  { %2387 = vadd.xlane.f32.xlu1 %v2386_v57  ;;  %2360 = vadd.xlane.f32.xlu0 %v2359_v52  ;;  %v969_v57 = vmax.f32 %v489_v3, 0.0  ;;  %v970_v52 = vmax.f32 %v490_v61, 0.0  ;;  %v5338_v3 = vrot.slane %v10568_v1, %v7664_v51  ;;  %v5358_v1 = vrot.slane %v10653_v10, %v7707_v22 }
 0x3a6   :  { %v10698_v55 = vpop.xlane.xlu1 %2237  ;;  %v10702_v14 = vpop.xlane.xlu0 %2186 }
 0x3a7   :  { %v5339_v35 = vsel %vm3422_vm5, %v5338_v3, %v10562_v16 }
 0x3a9   :  { %2363 = vadd.xlane.f32.xlu1 %v2362_v13  ;;  %2312 = vadd.xlane.f32.xlu0 %v2311_v46  ;;  %v2398_v13 = vsel %vm975_vm0, %v969_v57, 0.0  ;;  %v2401_v46 = vsel %vm975_vm0, %v970_v52, 0.0  ;;  %v5353_v57 = vrot.slane %v10634_v18, %v7716_v29 }
 0x3aa   :  { %v10710_v15 = vpop.xlane.xlu1 %2162  ;;  %v10714_v44 = vpop.xlane.xlu0 %2111 }
 0x3ad   :  { %2315 = vadd.xlane.f32.xlu1 %v2314_v11  ;;  %2390 = vadd.xlane.f32.xlu0 %v2389_v62  ;;  %v494_v11 = vld [vmem:[%s11207_s0 + $0xef8] sm:$0xff] }
 0x3ae   :  { %v10722_v33 = vpop.xlane.xlu1 %2240  ;;  %v10726_v54 = vpop.xlane.xlu0 %2189  ;;  %v974_v27 = vmax.f32 %v494_v11, 0.0 }
 0x3b0   :  { %v2413_v56 = vsel %vm975_vm0, %v974_v27, 0.0  ;;  %vm11237_vm0 = vcmask 523712  }
 0x3b1   :  { %2393 = vadd.xlane.f32.xlu1 %v2392_v63  ;;  %2366 = vadd.xlane.f32.xlu0 %v2365_v7 }
 0x3b2   :  { %v2166_v50 = vpop.xlane.xlu1 %2165  ;;  %v10737_v34 = vpop.xlane.xlu0 %2114 }
 0x3b3   :  { %v5373_v37 = vrot.slane %v2166_v50, %v7753_v2  ;;  %v5289_v28 = vrot.slane %v10737_v34, %v7724_v42 }
 0x3b5   :  { %2396 = vadd.xlane.f32.xlu1 %v2395_v31  ;;  %2318 = vadd.xlane.f32.xlu0 %v2317_v53  ;;  %v5343_v31 = vrot.slane %v10583_v0, %v7686_v5  ;;  %v5348_v53 = vrot.slane %v10605_v8, %v7683_v4  ;;  %v5363_v0 = vrot.slane %v10687_v23, %v7733_v48 }
 0x3b6   :  { %v10745_v25 = vpop.xlane.xlu1 %2243  ;;  %v10749_v17 = vpop.xlane.xlu0 %2192 }
 0x3b9   :  { %2399 = vadd.xlane.f32.xlu0 %v2398_v13  ;;  %2402 = vadd.xlane.f32.xlu1 %v2401_v46  ;;  %v5344_v13 = vsel %vm3429_vm6, %v5343_v31, %v5339_v35  ;;  %v5368_v46 = vrot.slane %v10710_v15, %v7724_v42  ;;  %v5269_v15 = vrot.slane %v10610_v30, %v7683_v4 }
 0x3ba   :  { %v2169_v62 = vpop.xlane.xlu1 %2168  ;;  %v2118_v63 = vpop.xlane.xlu0 %2117  ;;  %v5349_v8 = vsel %vm11237_vm0, %v5348_v53, %v5344_v13  ;;  %v5284_v31 = vrot.slane %v10714_v44, %v7733_v48 }
 0x3bb   :  { %v5354_v18 = vsel %vm11238_vm9, %v5353_v57, %v5349_v8  ;;  %v5378_v10 = vrot.slane %v2169_v62, %v7744_v60  ;;  %v5270_v53 = vsel %vm11237_vm0, %v5269_v15, %v10592_v45 }
 0x3bc   :  { %v5359_v16 = vsel %vm11232_vm10, %v5358_v1, %v5354_v18  ;;  %v5294_v1 = vrot.slane %v2118_v63, %v7753_v2  ;;  %v6974_v18 = vld [vmem:[%s11208_s1 + $0x338] sm:$0xff]  }
 0x3bd   :  { %2405 = vadd.xlane.f32.xlu0 %v2404_v47  ;;  %2408 = vadd.xlane.f32.xlu1 %v2407_v12  ;;  %v5364_v11 = vsel %vm11239_vm7, %v5363_v0, %v5359_v16 }
 0x3be   :  { %v10759_v7 = vpop.xlane.xlu1 %2246  ;;  %v10765_v61 = vpop.xlane.xlu0 %2195  ;;  %v5369_v47 = vsel %vm3464_vm11, %v5368_v46, %v5364_v11  ;;  %v6807_v11 = vunpack.c.h.bf16 %v6974_v18 }
 0x3bf   :  { %v5374_v12 = vsel %vm11236_vm8, %v5373_v37, %v5369_v47 }
 0x3c0   :  { %v5379_v27 = vsel %vm3478_vm13, %v5378_v10, %v5374_v12  ;;  %v6838_v12 = vunpack.c.l.bf16 %v10682_v49  ;;  %v5491_v49 = vrot.slane %v10698_v55, %v7675_v58 }
 0x3c1   :  { %2411 = vadd.xlane.f32.xlu0 %v2410_v36  ;;  %2414 = vadd.xlane.f32.xlu1 %v2413_v56  ;;  %v5279_v56 = vrot.slane %v10690_v59, %v7707_v22  ;;  %v5275_v59 = vsel %vm11238_vm9, %v5274_v21, %v5270_v53  ;;  %vm11242_vm9 = vmmov %vm11237_vm0 }
 0x3c2   :  { %v2172_v52 = vpop.xlane.xlu1 %2171  ;;  %v2121_v9 = vpop.xlane.xlu0 %2120 }
 0x3c3   :  { %v5383_v23 = vrot.slane %v2172_v52, %v7775_v20  ;;  %v11240_v52 = vld [vmem:[#allocation6_spill] sm:$0xff]  ;;  %v5280_v44 = vsel %vm11232_vm10, %v5279_v56, %v5275_v59  ;;  %v5299_v0 = vrot.slane %v2121_v9, %v7744_v60  ;;  %vm11243_vm10 = vcmask 589312  }
 0x3c4   :  { %v5285_v45 = vsel %vm11239_vm7, %v5284_v31, %v5280_v44  ;;  %v6980_v31 = vld [vmem:[%s11208_s1 + $0x368] sm:$0xff]   ;;  %v6971_v44 = vld [vmem:[%s11208_s1 + $0x320] sm:$0xff]   ;;  %vm11244_vm7 = vmmov %vm11243_vm10 }
 0x3c5   :  { %v5384_v3 = vsel %vm3485_vm14, %v5383_v23, %v5379_v27  ;;  %v5290_v8 = vsel %vm3464_vm11, %v5289_v28, %v5285_v45  ;;  %v6981_v23 = vld [vmem:[%s11208_s1 + $0x370] sm:$0xff]   ;;  %v11241_v27 = vld [vmem:[#allocation5_spill] sm:$0xff]  ;;  %v6831_v55 = vunpack.c.h.bf16 %v6980_v31 }
 0x3c6   :  { %v10785_v24 = vpop.xlane.xlu1 %2249  ;;  %v10789_v38 = vpop.xlane.xlu0 %2198  ;;  %v5295_v63 = vsel %vm11236_vm8, %v5294_v1, %v5290_v8  ;;  %v6835_v56 = vunpack.c.h.bf16 %v6981_v23  ;;  %v6834_v28 = vunpack.c.l.bf16 %v6981_v23  ;;  %v5496_v1 = vrot.slane %v10722_v33, %v7664_v51 }
 0x3c7   :  { %v5300_v16 = vsel %vm3478_vm13, %v5299_v0, %v5295_v63  ;;  %v5412_v0 = vrot.slane %v10726_v54, %v7675_v58  ;;  %v10880_v63 = vld [vmem:[%s11208_s1 + $0x358] sm:$0xff]   ;;  %v5417_v54 = vrot.slane %v10749_v17, %v7664_v51  ;;  %vm11245_vm8 = vcmask 654912  }
 0x3ca   :  { %v2175_v50 = vpop.xlane.xlu1 %2174  ;;  %v2124_v36 = vpop.xlane.xlu0 %2123 }
 0x3cb   :  { %v5388_v62 = vrot.slane %v2175_v50, %v7764_v19  ;;  %v5304_v34 = vrot.slane %v2124_v36, %v7775_v20  ;;  %v6973_v50 = vld [vmem:[%s11208_s1 + $0x330] sm:$0xff]   ;;  %v6806_v36 = vunpack.c.l.bf16 %v6974_v18  ;;  %v6830_v18 = vunpack.c.l.bf16 %v6980_v31 }
 0x3cc   :  { %v6802_v59 = vunpack.c.l.bf16 %v6973_v50  ;;  %v5511_v31 = vrot.slane %v10785_v24, %v7716_v29 }
 0x3cd   :  { %v5389_v30 = vsel %vm3492_vm15, %v5388_v62, %v5384_v3  ;;  %v5305_v9 = vsel %vm3485_vm14, %v5304_v34, %v5300_v16  ;;  %v6803_v3 = vunpack.c.h.bf16 %v6973_v50  ;;  %v5492_v34 = vsel %vm3415_vm4, %v5491_v49, %v10675_v32 }
 0x3ce   :  { %v10811_v57 = vpop.xlane.xlu1 %2252  ;;  %v5795_v35 = vsel %vm5785_vm12, %v5389_v30, %v11240_v52  ;;  %v10817_v13 = vpop.xlane.xlu0 %2201  ;;  %v5407_v30 = vrot.slane %v10702_v14, %v7649_v40  ;;  %v6972_v52 = vld [vmem:[%s11208_s1 + $0x328] sm:$0xff]   ;;  %v6979_v14 = vld [vmem:[%s11208_s1 + $0x360] sm:$0xff]   ;;  %v5427_v50 = vrot.slane %v10789_v38, %v7683_v4  ;;  %v6822_v38 = vunpack.c.l.bf16 %v10880_v63 }
 0x3cf   :  { %6160 = vmatprep.mubr.f32.mxu0 %v5795_v35  ;;  %v6799_v45 = vunpack.c.h.bf16 %v6972_v52  ;;  %v6798_v16 = vunpack.c.l.bf16 %v6972_v52  ;;  %v6827_v32 = vunpack.c.h.bf16 %v6979_v14  ;;  %v6826_v23 = vunpack.c.l.bf16 %v6979_v14 }
 0x3d0   :  { %v5408_v33 = vsel %vm3408_vm3, %v5407_v30, %v10685_v26  ;;  %v10889_v26 = vld [vmem:[%s11208_s1 + $0x318] sm:$0xff]  }
 0x3d1   :  { %v5413_v17 = vsel %vm3415_vm4, %v5412_v0, %v5408_v33 }
 0x3d2   :  { %v10824_v46 = vpop.xlane.xlu1 %2204  ;;  %v2127_v37 = vpop.xlane.xlu0 %2126 }
 0x3d3   :  { %v5309_v10 = vrot.slane %v2127_v37, %v7764_v19  ;;  %v5437_v49 = vrot.slane %v10824_v46, %v7707_v22 }
 0x3d5   :  { %v5310_v47 = vsel %vm3492_vm15, %v5309_v10, %v5305_v9  ;;  %v6795_v10 = vunpack.c.h.bf16 %v6971_v44  ;;  %v5497_v9 = vsel %vm3422_vm5, %v5496_v1, %v5492_v34 }
 0x3d6   :  { %v10837_v15 = vpop.xlane.xlu1 %2207  ;;  %v10843_v21 = vpop.xlane.xlu0 %2255  ;;  %v5794_v62 = vsel %vm5785_vm12, %v5310_v47, %v11241_v27  ;;  %v6794_v47 = vunpack.c.l.bf16 %v6971_v44  ;;  %v6823_v27 = vunpack.c.h.bf16 %v10880_v63 }
 0x3d7   :  { %6161 = vmatmul.mubr.f32.vlgmr.msra.gmra.mxu0 %v5794_v62  ;;  %v10903_v62 = vld [vmem:[%s11208_s1 + $0x350] sm:$0xff]   ;;  %v5442_v52 = vrot.slane %v10837_v15, %v7733_v48  ;;  %v5521_v46 = vrot.slane %v10843_v21, %v7733_v48 }
 0x3d8   :  { %7202 = vmatpush3.msra.mxu0 %v6807_v11  ;;  %v5422_v11 = vrot.slane %v10765_v61, %v7686_v5  ;;  %v5506_v61 = vrot.slane %v10759_v7, %v7683_v4  ;;  %v6790_v7 = vunpack.c.l.bf16 %v10889_v26  ;;  %v6969_v21 = vld [vmem:[%s11208_s1 + $0x310] sm:$0xff]  }
 0x3d9   :  { %7203 = vmatprep.subr.mxu0 %v6838_v12  ;;  %v5501_v12 = vrot.slane %v10745_v25, %v7686_v5  ;;  %v6791_v25 = vunpack.c.h.bf16 %v10889_v26  ;;  %v6976_v26 = vld [vmem:[%s11208_s1 + $0x348] sm:$0xff]  }
 0x3da   :  { %v10854_v53 = vpop.xlane.xlu1 %2210  ;;  %v10859_v35 = vpop.xlane.xlu0 %2258  ;;  %7204 = vmatpush3.msra.mxu0 %v6806_v36  ;;  %v5432_v36 = vrot.slane %v10817_v13, %v7716_v29 }
 0x3db   :  { %7205 = vmatprep.subr.mxu0 %v6835_v56  ;;  %v5502_v24 = vsel %vm3429_vm6, %v5501_v12, %v5497_v9  ;;  %v5526_v15 = vrot.slane %v10859_v35, %v7724_v42 }
 0x3dc   :  { %7206 = vmatpush3.msra.mxu0 %v6803_v3  ;;  %v5418_v3 = vsel %vm3422_vm5, %v5417_v54, %v5413_v17  ;;  %v5507_v14 = vsel %vm11242_vm9, %v5506_v61, %v5502_v24  ;;  %vm11247_vm9 = vcmask 720512   ;;  %v6968_v17 = vld [vmem:[%s11208_s1 + $0x308] sm:$0xff]  }
 0x3dd   :  { %7207 = vmatprep.subr.mxu0 %v6834_v28  ;;  %v5423_v13 = vsel %vm3429_vm6, %v5422_v11, %v5418_v3  ;;  %v5516_v28 = vrot.slane %v10811_v57, %v7707_v22  ;;  %v6815_v3 = vunpack.c.h.bf16 %v6976_v26 }
 0x3de   :  { %v10875_v8 = vpop.xlane.xlu1 %2213  ;;  %v10884_v37 = vpop.xlane.xlu0 %2261  ;;  %7208 = vmatpush3.msra.mxu0 %v6802_v59  ;;  %v6819_v59 = vunpack.c.h.bf16 %v10903_v62  ;;  %v5428_v1 = vsel %vm11237_vm0, %v5427_v50, %v5423_v13  ;;  %vm11246_vm0 = vmmov %vm11245_vm8  ;;  %v6975_v13 = vld [vmem:[%s11208_s1 + $0x340] sm:$0xff]  }
 0x3df   :  { %7209 = vmatprep.subr.mxu0 %v6831_v55  ;;  %v5447_v55 = vrot.slane %v10854_v53, %v7724_v42  ;;  %v5433_v57 = vsel %vm11243_vm10, %v5432_v36, %v5428_v1  ;;  %v5452_v44 = vrot.slane %v10875_v8, %v7753_v2  ;;  %v5531_v34 = vrot.slane %v10884_v37, %v7753_v2  ;;  %vm11248_vm10 = vmmov %vm11247_vm9  ;;  %v6990_v36 = vld [vmem:[%s11208_s1 + $0x3b8] sm:$0xff]  }
 0x3e0   :  { %7210 = vmatpush3.msra.mxu0 %v6799_v45  ;;  %v5512_v45 = vsel %vm11244_vm7, %v5511_v31, %v5507_v14  ;;  %v5438_v53 = vsel %vm11245_vm8, %v5437_v49, %v5433_v57  ;;  %v6787_v37 = vunpack.c.h.bf16 %v6969_v21  ;;  %vm11249_vm7 = vcmask 851712   ;;  %v11252_v14 = vld [vmem:[#allocation8_spill] sm:$0xff] }
 0x3e1   :  { %7211 = vmatprep.subr.mxu0 %v6830_v18  ;;  %v5517_v35 = vsel %vm11246_vm0, %v5516_v28, %v5512_v45  ;;  %v5443_v8 = vsel %vm11247_vm9, %v5442_v52, %v5438_v53  ;;  %vm11250_vm8 = vmmov %vm11249_vm7  ;;  %v11251_v52 = vld [vmem:[#allocation7_spill] sm:$0xff]  ;;  %v6871_v1 = vunpack.c.h.bf16 %v6990_v36  ;;  %vm7314_vm0 = vmmov 0  }
 0x3e2   :  { %v2217_v56 = vpop.xlane.xlu1 %2216  ;;  %v2265_v30 = vpop.xlane.xlu0 %2264  ;;  %7212 = vmatpush3.msra.mxu0 %v6798_v16  ;;  %v5522_v16 = vsel %vm11248_vm10, %v5521_v46, %v5517_v35  ;;  %v6967_v46 = vld [vmem:[%s11208_s1 + $0x300] sm:$0xff]   ;;  %v6988_v35 = vld [vmem:[%s11208_s1 + $0x3a8] sm:$0xff]   ;;  %vm11253_vm9 = vcmask 523712   ;;  %vm11254_vm10 = vcmask 589312  }
 0x3e3   :  { %7213 = vmatprep.subr.mxu0 %v6827_v32  ;;  %v5457_v33 = vrot.slane %v2217_v56, %v7744_v60  ;;  %v5536_v63 = vrot.slane %v2265_v30, %v7744_v60  ;;  %v5448_v32 = vsel %vm3464_vm11, %v5447_v55, %v5443_v8  ;;  %v5527_v9 = vsel %vm3464_vm11, %v5526_v15, %v5522_v16  ;;  %v6989_v15 = vld [vmem:[%s11208_s1 + $0x3b0] sm:$0xff]  }
 0x3e4   :  { %7214 = vmatpush3.msra.mxu0 %v6795_v10  ;;  %v5453_v11 = vsel %vm11249_vm7, %v5452_v44, %v5448_v32  ;;  %v5532_v12 = vsel %vm11250_vm8, %v5531_v34, %v5527_v9  ;;  %v6786_v56 = vunpack.c.l.bf16 %v6969_v21  ;;  %v6783_v30 = vunpack.c.h.bf16 %v6968_v17  ;;  %vm11255_vm7 = vmmov %vm11253_vm9 }
 0x3e5   :  { %7215 = vmatprep.subr.mxu0 %v6826_v23  ;;  %v5458_v50 = vsel %vm3478_vm13, %v5457_v33, %v5453_v11  ;;  %v6782_v44 = vunpack.c.l.bf16 %v6968_v17  ;;  %v6811_v21 = vunpack.c.h.bf16 %v6975_v13  ;;  %v6779_v45 = vunpack.c.h.bf16 %v6967_v46 }
 0x3e6   :  { %v2220_v0 = vpop.xlane.xlu1 %2219  ;;  %v2268_v18 = vpop.xlane.xlu0 %2267  ;;  %7216 = vmatpush3.msra.mxu0 %v6794_v47  ;;  %v6818_v47 = vunpack.c.l.bf16 %v10903_v62  ;;  %v6867_v34 = vunpack.c.h.bf16 %v6989_v15  ;;  %v6810_v33 = vunpack.c.l.bf16 %v6975_v13  ;;  %v6778_v8 = vunpack.c.l.bf16 %v6967_v46 }
 0x3e7   :  { %v5462_v54 = vrot.slane %v2220_v0, %v7775_v20  ;;  %7217 = vmatprep.subr.mxu0 %v6823_v27  ;;  %v5541_v10 = vrot.slane %v2268_v18, %v7775_v20  ;;  %v6870_v0 = vunpack.c.l.bf16 %v6990_v36  ;;  %v6863_v16 = vunpack.c.h.bf16 %v6988_v35 }
 0x3e8   :  { %7218 = vmatpush3.msra.mxu0 %v6791_v25  ;;  %v5537_v25 = vsel %vm3478_vm13, %v5536_v63, %v5532_v12  ;;  %v6866_v63 = vunpack.c.l.bf16 %v6989_v15  ;;  %vm11256_vm8 = vcmask 654912  }
 0x3e9   :  { %7219 = vmatprep.subr.mxu0 %v6822_v38  ;;  %v5463_v62 = vsel %vm3485_vm14, %v5462_v54, %v5458_v50  ;;  %v5542_v31 = vsel %vm3485_vm14, %v5541_v10, %v5537_v25  ;;  %v6987_v10 = vld [vmem:[%s11208_s1 + $0x3a0] sm:$0xff]  }
 0x3ea   :  { %v2223_v23 = vpop.xlane.xlu1 %2222  ;;  %v2271_v61 = vpop.xlane.xlu0 %2270  ;;  %7220 = vmatpush3.msra.mxu0 %v6790_v7  ;;  %v6859_v9 = vunpack.c.h.bf16 %v6987_v10 }
 0x3eb   :  { %v5467_v27 = vrot.slane %v2223_v23, %v7764_v19  ;;  %v5546_v38 = vrot.slane %v2271_v61, %v7764_v19  ;;  %7221 = vmatprep.subr.mxu0 %v6819_v59  ;;  %v6814_v59 = vunpack.c.l.bf16 %v6976_v26  ;;  %v6986_v23 = vld [vmem:[%s11208_s1 + $0x398] sm:$0xff]  }
 0x3ec   :  { %7222 = vmatpush3.msra.mxu0 %v6787_v37  ;;  %v6862_v37 = vunpack.c.l.bf16 %v6988_v35  ;;  %v6855_v12 = vunpack.c.h.bf16 %v6986_v23  ;;  %v6854_v61 = vunpack.c.l.bf16 %v6986_v23 }
 0x3ed   :  { %v5468_v49 = vsel %vm3492_vm15, %v5467_v27, %v5463_v62  ;;  %v5547_v28 = vsel %vm3492_vm15, %v5546_v38, %v5542_v31  ;;  %7223 = vmatprep.subr.mxu0 %v6818_v47  ;;  %v6858_v47 = vunpack.c.l.bf16 %v6987_v10  ;;  %v6985_v27 = vld [vmem:[%s11208_s1 + $0x390] sm:$0xff]   ;;  %v6984_v62 = vld [vmem:[%s11208_s1 + $0x388] sm:$0xff]  }
 0x3ee   :  { %v10973_v7 = vpop.xlane.xlu1 %2324  ;;  %v5796_v24 = vsel %vm5785_vm12, %v5468_v49, %v11251_v52  ;;  %v10981_v55 = vpop.xlane.xlu0 %2321  ;;  %v5797_v57 = vsel %vm5785_vm12, %v5547_v28, %v11252_v14  ;;  %7224 = vmatpush3.msra.mxu0 %v6786_v56  ;;  %v6851_v56 = vunpack.c.h.bf16 %v6985_v27  ;;  %v6850_v38 = vunpack.c.l.bf16 %v6985_v27 }
 0x3ef   :  { %6230 = vmatprep.mubr.f32.mxu1 %v5797_v57  ;;  %7225 = vmatprep.subr.mxu0 %v6815_v3  ;;  %v6847_v31 = vunpack.c.h.bf16 %v6984_v62  ;;  %v6846_v13 = vunpack.c.l.bf16 %v6984_v62  ;;  %v5634_v10 = vrot.slane %v10973_v7, %v7652_v41 }
 0x3f0   :  { %6231 = vmatmul.mubr.f32.vlgmr.msra.gmra.mxu1 %v5796_v24  ;;  %7226 = vmatpush3.msra.mxu0 %v6783_v30  ;;  %v6983_v30 = vld [vmem:[%s11208_s1 + $0x380] sm:$0xff]  }
 0x3f1   :  { %7254 = vmatpush3.msra.mxu1 %v6871_v1  ;;  %7227 = vmatprep.subr.mxu0 %v6814_v59  ;;  %v6843_v52 = vunpack.c.h.bf16 %v6983_v30  ;;  %v6842_v1 = vunpack.c.l.bf16 %v6983_v30 }
 0x3f2   :  { %v10988_v53 = vpop.xlane.xlu1 %2276  ;;  %v10990_v18 = vpop.xlane.xlu0 %2273  ;;  %7255 = vmatprep.subr.mxu1 %v7313_v6  ;;  %7228 = vmatpush3.msra.mxu0 %v6782_v44 }
 0x3f3   :  { %7256 = vmatpush3.msra.mxu1 %v6870_v0  ;;  %7229 = vmatprep.subr.mxu0 %v6811_v21  ;;  %v5555_v23 = vrot.slane %v10988_v53, %v7652_v41 }
 0x3f4   :  { %7257 = vmatprep.subr.mxu1 %v7313_v6  ;;  %7230 = vmatpush3.msra.mxu0 %v6779_v45 }
 0x3f5   :  { %7258 = vmatpush3.msra.mxu1 %v6867_v34  ;;  %7231 = vmatprep.subr.mxu0 %v6810_v33 }
 0x3f6   :  { %v10997_v54 = vpop.xlane.xlu1 %2279  ;;  %v10999_v32 = vpop.xlane.xlu0 %2327  ;;  %7259 = vmatprep.subr.mxu1 %v7313_v6  ;;  %7232 = vmatpush3.msra.mxu0 %v6778_v8 }
 0x3f7   :  { %7260 = vmatpush3.msra.mxu1 %v6866_v63  ;;  %7285 = vmatprep.mubr.msk.f32.mxu1 %vm7314_vm0, %v7313_v6  ;;  %v5560_v7 = vrot.slane %v10997_v54, %v7656_v43  ;;  %vm11257_vm0 = vmmov %vm11254_vm10 }
 0x3f8   :  { %7261 = vmatprep.subr.mxu1 %v7313_v6 }
 0x3f9   :  { %7262 = vmatpush3.msra.mxu1 %v6863_v16 }
 0x3fa   :  { %v11007_v26 = vpop.xlane.xlu1 %2282  ;;  %v11009_v11 = vpop.xlane.xlu0 %2330  ;;  %7263 = vmatprep.subr.mxu1 %v7313_v6 }
 0x3fb   :  { %7264 = vmatpush3.msra.mxu1 %v6862_v37  ;;  %v5630_v37 = vrot.slane %v10981_v55, %v7646_v39  ;;  %v5565_v53 = vrot.slane %v11007_v26, %v7649_v40 }
 0x3fc   :  { %7265 = vmatprep.subr.mxu1 %v7313_v6 }
 0x3fd   :  { %7266 = vmatpush3.msra.mxu1 %v6859_v9  ;;  %v5639_v9 = vrot.slane %v10999_v32, %v7656_v43  ;;  %v5635_v32 = vsel %vm3394_vm1, %v5634_v10, %v5630_v37 }
 0x3fe   :  { %v11016_v17 = vpop.xlane.xlu1 %2285  ;;  %v11018_v50 = vpop.xlane.xlu0 %2333  ;;  %7267 = vmatprep.subr.mxu1 %v7313_v6 }
 0x3ff   :  { %7268 = vmatpush3.msra.mxu1 %v6858_v47  ;;  %v5551_v47 = vrot.slane %v10990_v18, %v7646_v39  ;;  %v5649_v55 = vrot.slane %v11018_v50, %v7675_v58 }
 0x400   :  { %7269 = vmatprep.subr.mxu1 %v7313_v6 }
 0x401   :  { %7270 = vmatpush3.msra.mxu1 %v6855_v12  ;;  %v5644_v12 = vrot.slane %v11009_v11, %v7649_v40  ;;  %v5570_v11 = vrot.slane %v11016_v17, %v7675_v58  ;;  %v5556_v62 = vsel %vm3394_vm1, %v5555_v23, %v5551_v47 }
 0x402   :  { %v11025_v36 = vpop.xlane.xlu1 %2288  ;;  %v11027_v25 = vpop.xlane.xlu0 %2336  ;;  %7271 = vmatprep.subr.mxu1 %v7313_v6 }
 0x403   :  { %7272 = vmatpush3.msra.mxu1 %v6854_v61  ;;  %v5654_v18 = vrot.slane %v11027_v25, %v7664_v51  ;;  %v5561_v25 = vsel %vm3401_vm2, %v5560_v7, %v5556_v62 }
 0x404   :  { %7273 = vmatprep.subr.mxu1 %v7313_v6 }
 0x405   :  { %7274 = vmatpush3.msra.mxu1 %v6851_v56  ;;  %v5640_v56 = vsel %vm3401_vm2, %v5639_v9, %v5635_v32 }
 0x406   :  { %v11034_v3 = vpop.xlane.xlu1 %2291  ;;  %v11036_v49 = vpop.xlane.xlu0 %2339  ;;  %7275 = vmatprep.subr.mxu1 %v7313_v6  ;;  %v5645_v50 = vsel %vm3408_vm3, %v5644_v12, %v5640_v56 }
 0x407   :  { %7276 = vmatpush3.msra.mxu1 %v6850_v38  ;;  %v5659_v54 = vrot.slane %v11036_v49, %v7686_v5  ;;  %v5575_v38 = vrot.slane %v11025_v36, %v7664_v51  ;;  %v5650_v30 = vsel %vm3415_vm4, %v5649_v55, %v5645_v50  ;;  %v5580_v17 = vrot.slane %v11034_v3, %v7686_v5 }
 0x408   :  { %7277 = vmatprep.subr.mxu1 %v7313_v6 }
 0x409   :  { %7278 = vmatpush3.msra.mxu1 %v6847_v31 }
 0x40a   :  { %v11043_v28 = vpop.xlane.xlu1 %2294  ;;  %v2343_v24 = vpop.xlane.xlu0 %2342  ;;  %7279 = vmatprep.subr.mxu1 %v7313_v6 }
 0x40b   :  { %7280 = vmatpush3.msra.mxu1 %v6846_v13  ;;  %v5664_v26 = vrot.slane %v2343_v24, %v7683_v4  ;;  %v5585_v36 = vrot.slane %v11043_v28, %v7683_v4 }
 0x40c   :  { %7281 = vmatprep.subr.mxu1 %v7313_v6 }
 0x40d   :  { %7282 = vmatpush3.msra.mxu1 %v6843_v52  ;;  %v5566_v52 = vsel %vm3408_vm3, %v5565_v53, %v5561_v25 }
 0x40e   :  { %v11047_v59 = vpop.xlane.xlu1 %2369  ;;  %v2346_v46 = vpop.xlane.xlu0 %2345  ;;  %7283 = vmatprep.subr.mxu1 %v7313_v6  ;;  %v5571_v10 = vsel %vm3415_vm4, %v5570_v11, %v5566_v52  ;;  %v11263_v52 = vld [vmem:[#allocation10_spill] sm:$0xff] }
 0x40f   :  { %7284 = vmatpush3.msra.mxu1 %v6842_v1  ;;  %v5669_v13 = vrot.slane %v2346_v46, %v7716_v29  ;;  %v5655_v1 = vsel %vm3422_vm5, %v5654_v18, %v5650_v30  ;;  %v5576_v46 = vsel %vm3422_vm5, %v5575_v38, %v5571_v10  ;;  %v5709_v53 = vrot.slane %v11047_v59, %v7646_v39 }
 0x410   :  { %v5660_v37 = vsel %vm3429_vm6, %v5659_v54, %v5655_v1 }
 0x411   :  { %v5665_v23 = vsel %vm11253_vm9, %v5664_v26, %v5660_v37  ;;  %vm11258_vm9 = vcmask 720512  }
 0x412   :  { %v11050_v14 = vpop.xlane.xlu1 %2297  ;;  %v11052_v57 = vpop.xlane.xlu0 %2372  ;;  %v5670_v7 = vsel %vm11254_vm10, %v5669_v13, %v5665_v23  ;;  %vm11259_vm10 = vmmov %vm11256_vm8 }
 0x413   :  { %v5590_v9 = vrot.slane %v11050_v14, %v7716_v29  ;;  %v5713_v47 = vrot.slane %v11052_v57, %v7652_v41 }
 0x416   :  { %v11054_v15 = vpop.xlane.xlu1 %2375  ;;  %v2349_v44 = vpop.xlane.xlu0 %2348 }
 0x417   :  { %v5674_v24 = vrot.slane %v2349_v44, %v7707_v22  ;;  %v5581_v44 = vsel %vm3429_vm6, %v5580_v17, %v5576_v46  ;;  %v5718_v11 = vrot.slane %v11054_v15, %v7656_v43 }
 0x418   :  { %v5586_v32 = vsel %vm11255_vm7, %v5585_v36, %v5581_v44  ;;  %vm11260_vm7 = vcmask 851712  }
 0x419   :  { %v5675_v41 = vsel %vm11256_vm8, %v5674_v24, %v5670_v7  ;;  %vm11262_vm8 = vmmov %vm11260_vm7 }
 0x41a   :  { %v2352_v0 = vpop.xlane.xlu1 %2351  ;;  %v11056_v21 = vpop.xlane.xlu0 %2300 }
 0x41b   :  { %v5679_v3 = vrot.slane %v2352_v0, %v7733_v48  ;;  %v5595_v55 = vrot.slane %v11056_v21, %v7707_v22 }
 0x41d   :  { %v5680_v18 = vsel %vm11258_vm9, %v5679_v3, %v5675_v41 }
 0x41e   :  { %v11058_v45 = vpop.xlane.xlu1 %2303  ;;  %v11060_v34 = vpop.xlane.xlu0 %2378 }
 0x41f   :  { %v5600_v21 = vrot.slane %v11058_v45, %v7733_v48  ;;  %v5723_v62 = vrot.slane %v11060_v34, %v7649_v40 }
 0x422   :  { %v11062_v33 = vpop.xlane.xlu1 %2381  ;;  %v2355_v35 = vpop.xlane.xlu0 %2354 }
 0x423   :  { %v5684_v28 = vrot.slane %v2355_v35, %v7724_v42  ;;  %v5591_v35 = vsel %vm11257_vm0, %v5590_v9, %v5586_v32  ;;  %v5728_v43 = vrot.slane %v11062_v33, %v7675_v58 }
 0x424   :  { %v5596_v54 = vsel %vm11259_vm10, %v5595_v55, %v5591_v35 }
 0x425   :  { %v5685_v39 = vsel %vm3464_vm11, %v5684_v28, %v5680_v18  ;;  %v11265_v28 = vld [vmem:[#allocation9_spill] sm:$0xff] }
 0x426   :  { %v11064_v8 = vpop.xlane.xlu1 %2357  ;;  %v11066_v6 = vpop.xlane.xlu0 %2306 }
 0x427   :  { %v5689_v14 = vrot.slane %v11064_v8, %v7753_v2  ;;  %v5714_v8 = vsel %vm3394_vm1, %v5713_v47, %v5709_v53  ;;  %v5605_v59 = vrot.slane %v11066_v6, %v7724_v42  ;;  %vm11261_vm1 = vmmov %vm11258_vm9 }
 0x429   :  { %v5690_v45 = vsel %vm11260_vm7, %v5689_v14, %v5685_v39  ;;  %v7023_v39 = vpop.f32.mrf.mxu0 }
 0x42a   :  { %v11068_v63 = vpop.xlane.xlu1 %2309  ;;  %v11070_v16 = vpop.xlane.xlu0 %2384 }
 0x42b   :  { %v5610_v50 = vrot.slane %v11068_v63, %v7753_v2  ;;  %v5733_v40 = vrot.slane %v11070_v16, %v7664_v51  ;;  %v5719_v63 = vsel %vm3401_vm2, %v5718_v11, %v5714_v8  ;;  %vm11264_vm2 = vcmask 523712   ;;  %v11270_v11 = vld [vmem:[#allocation11_spill] sm:$0xff] }
 0x42c   :  { %v5724_v13 = vsel %vm3408_vm3, %v5723_v62, %v5719_v63  ;;  %vm11266_vm3 = vmmov %vm11257_vm0 }
 0x42d   :  { %v5729_v36 = vsel %vm3415_vm4, %v5728_v43, %v5724_v13  ;;  %vm11267_vm4 = vmmov %vm11259_vm10 }
 0x42e   :  { %v11084_v27 = vpop.xlane.xlu1 %2387  ;;  %v2361_v61 = vpop.xlane.xlu0 %2360 }
 0x42f   :  { %v5694_v57 = vrot.slane %v2361_v61, %v7744_v60  ;;  %v5738_v58 = vrot.slane %v11084_v27, %v7686_v5  ;;  %v5734_v27 = vsel %vm3422_vm5, %v5733_v40, %v5729_v36  ;;  %vm11268_vm5 = vmmov %vm11261_vm1 }
 0x431   :  { %v5695_v15 = vsel %vm3478_vm13, %v5694_v57, %v5690_v45 }
 0x432   :  { %v2364_v31 = vpop.xlane.xlu1 %2363  ;;  %v2313_v49 = vpop.xlane.xlu0 %2312 }
 0x433   :  { %v5699_v56 = vrot.slane %v2364_v31, %v7775_v20  ;;  %v5615_v26 = vrot.slane %v2313_v49, %v7744_v60  ;;  %v5601_v31 = vsel %vm11261_vm1, %v5600_v21, %v5596_v54 }
 0x434   :  { %v5606_v30 = vsel %vm3464_vm11, %v5605_v59, %v5601_v31  ;;  %v7058_v59 = vpop.f32.mrf.mxu1 }
 0x435   :  { %v5700_v34 = vsel %vm3485_vm14, %v5699_v56, %v5695_v15  ;;  %v5611_v49 = vsel %vm11262_vm8, %v5610_v50, %v5606_v30 }
 0x436   :  { %v2316_v12 = vpop.xlane.xlu1 %2315  ;;  %v2391_v0 = vpop.xlane.xlu0 %2390  ;;  %v5616_v24 = vsel %vm3478_vm13, %v5615_v26, %v5611_v49 }
 0x437   :  { %v5620_v25 = vrot.slane %v2316_v12, %v7775_v20  ;;  %v5743_v51 = vrot.slane %v2391_v0, %v7683_v4  ;;  %v5739_v4 = vsel %vm3429_vm6, %v5738_v58, %v5734_v27  ;;  %vm11269_vm6 = vmmov %vm11260_vm7  ;;  %v7059_v54 = vpop.f32.mrf.mxu1 }
 0x438   :  { %v7060_v43 = vadd.f32 %v7059_v54, %v7058_v59 }
 0x439   :  { %v5621_v37 = vsel %vm3485_vm14, %v5620_v25, %v5616_v24  ;;  %v5744_v23 = vsel %vm11264_vm2, %v5743_v51, %v5739_v4  ;;  %v7128_v45 = vpop.f32.mrf.mxu1 }
 0x43a   :  { %v2394_v61 = vpop.xlane.xlu1 %2393  ;;  %v2367_v38 = vpop.xlane.xlu0 %2366 }
 0x43b   :  { %v5704_v6 = vrot.slane %v2367_v38, %v7764_v19  ;;  %v5748_v10 = vrot.slane %v2394_v61, %v7716_v29  ;;  %v7129_v38 = vpop.f32.mrf.mxu1 }
 0x43c   :  { %v7130_v25 = vadd.f32 %v7129_v38, %v7128_v45 }
 0x43d   :  { %v5705_v17 = vsel %vm3492_vm15, %v5704_v6, %v5700_v34  ;;  %v5749_v12 = vsel %vm11266_vm3, %v5748_v10, %v5744_v23 }
 0x43e   :  { %v2397_v33 = vpop.xlane.xlu1 %2396  ;;  %v2319_v16 = vpop.xlane.xlu0 %2318  ;;  %v5799_v1 = vsel %vm5785_vm12, %v5705_v17, %v11263_v52 }
 0x43f   :  { %v5625_v5 = vrot.slane %v2319_v16, %v7764_v19  ;;  %6300 = vmatprep.mubr.f32.mxu0 %v5799_v1  ;;  %v5753_v9 = vrot.slane %v2397_v33, %v7707_v22 }
 0x441   :  { %v5626_v3 = vsel %vm3492_vm15, %v5625_v5, %v5621_v37  ;;  %v5754_v7 = vsel %vm11267_vm4, %v5753_v9, %v5749_v12 }
 0x442   :  { %v2403_v46 = vpop.xlane.xlu1 %2402  ;;  %v2400_v47 = vpop.xlane.xlu0 %2399  ;;  %v5798_v29 = vsel %vm5785_vm12, %v5626_v3, %v11265_v28 }
 0x443   :  { %v5758_v44 = vrot.slane %v2400_v47, %v7733_v48  ;;  %6301 = vmatmul.mubr.f32.vlgmr.msra.gmra.mxu0 %v5798_v29  ;;  %v5763_v22 = vrot.slane %v2403_v46, %v7724_v42 }
 0x445   :  { %v5759_v55 = vsel %vm11268_vm5, %v5758_v44, %v5754_v7 }
 0x446   :  { %v2409_v14 = vpop.xlane.xlu1 %2408  ;;  %v2406_v0 = vpop.xlane.xlu0 %2405  ;;  %v5764_v53 = vsel %vm3464_vm11, %v5763_v22, %v5759_v55 }
 0x447   :  { %v5768_v32 = vrot.slane %v2406_v0, %v7753_v2  ;;  %v5773_v41 = vrot.slane %v2409_v14, %v7744_v60  ;;  %v7024_v60 = vpop.f32.mrf.mxu0 }
 0x448   :  { %v7025_v50 = vadd.f32 %v7024_v60, %v7023_v39 }
 0x449   :  { %v5769_v57 = vsel %vm11269_vm6, %v5768_v32, %v5764_v53  ;;  %v7093_v61 = vpop.f32.mrf.mxu0 }
 0x44a   :  { %v2415_v35 = vpop.xlane.xlu1 %2414  ;;  %v2412_v18 = vpop.xlane.xlu0 %2411  ;;  %v5774_v42 = vsel %vm3478_vm13, %v5773_v41, %v5769_v57 }
 0x44b   :  { %v5783_v48 = vrot.slane %v2415_v35, %v7764_v19  ;;  %v5778_v21 = vrot.slane %v2412_v18, %v7775_v20  ;;  %v7094_v62 = vpop.f32.mrf.mxu0  ;;  %v6391_v20 = vld [vmem:[%s11209_s2] ss:$0 sm:$0xff]  ;;  %s6383_s2 = sshll.u32 %s7315_s23, 4  ;;  %s6384_s2 = int_to_ptr.vmem [resolvable:$true] %s6383_s2 }
 0x44c   :  { %v5883_v6 = vadd.f32 %v7025_v50, %v6391_v20  ;;  %v7095_v31 = vadd.f32 %v7094_v62, %v7093_v61  ;;  %s7291_s24 = scalar_lea.vmem %s6384_s2, 32  ;;  %p7296_p1 = scmp.lt.s32.totalorder %s6384_s2, %s6384_s2 }
 0x44d   :  { %v5779_v56 = vsel %vm3485_vm14, %v5778_v21, %v5774_v42  ;;  %p7292_p0 = scmp.ne.s32.totalorder %s6384_s2, %s7291_s24  ;;  %p7297_p2 = scmp.lt.s32.totalorder %s7291_s24, %s7291_s24 }
 0x44e   :  { %v5784_v8 = vsel %vm3492_vm15, %v5783_v48, %v5779_v56  ;;  %v5953_v34 = vadd.f32 %v7060_v43, %v5883_v6 }
 0x44f   :  { %v5800_v2 = vsel %vm5785_vm12, %v5784_v8, %v11270_v11  ;;  %p7298_p3 = por %p7297_p2, %p7296_p1 }
 0x450   :  { %7286 = vmatmul.mubr.f32.vlgmr.msra.gmra.mxu1 %v5800_v2  ;;  %v6023_v30 = vadd.f32 %v7095_v31, %v5953_v34 }
 0x451   :  { %p7299_p4 = pnand %p7298_p3, %p7292_p0 }
 0x452   :  { %v6093_v17 = vadd.f32 %v7130_v25, %v6023_v30 }
 0x497   :  { %v7163_v19 = vpop.f32.mrf.mxu0 }
 0x499   :  { %v7164_v15 = vpop.f32.mrf.mxu0 }
 0x49a   :  { %v7165_v58 = vadd.f32 %v7164_v15, %v7163_v19 }
 0x49c   :  { %v6163_v49 = vadd.f32 %v7165_v58, %v6093_v17 }
 0x4b0   :  { %v7198_v26 = vpop.f32.mrf.mxu1 }
 0x4b2   :  { %v7199_v63 = vpop.f32.mrf.mxu1 }
 0x4b3   :  { %v7200_v13 = vadd.f32 %v7199_v63, %v7198_v26 }
 0x4b5   :  { %v6233_v16 = vadd.f32 %v7200_v13, %v6163_v49 }
 0x503   :  { %v7233_v40 = vpop.f32.mrf.mxu0 }
 0x505   :  { %v7234_v33 = vpop.f32.mrf.mxu0 }
 0x506   :  { %v7235_v51 = vadd.f32 %v7234_v33, %v7233_v40 }
 0x508   :  { %v6303_v52 = vadd.f32 %v7235_v51, %v6233_v16 }
 0x510   :  { %v6372_v1 = vpop.f32.mrf.mxu1 }
 0x511   :  { %v6373_v36 = vadd.f32 %v6372_v1, %v6303_v52 }
 0x512   :  { %v7287_v24 = vpop.f32.mrf.mxu1 }
 0x513   :  { %6376 = vst [vmem:[#allocation2] sm:$0x3] %v6373_v36 }
 0x514   :  { %7302 = shalt.err (!%p7299_p4)
}
 0x515   :  { %6386 = dma.vmem_to_hbm [thread:$0]  %s6384_s2, 32, %s11210_s3, [#allocation3]  }
 0x516   :  { %7311 = dma.done.wait [#allocation3], 32  }
 0x517   :  { %7312 = vsyncadd [#allocation3], 4294967264 }
 0x518   :  { %6390 = vsyncpa [#allocation3], 1 }

</bundles_post_ra>
